<compile_context>
chip_gen: v7x
topology: tpu7x:2x2x1
jax: 0.10.0
libtpu: 0.0.40
codegen_flags: <defaults>
</compile_context>

<pallas_src>
import functools

import jax
import jax.numpy as jnp
import numpy as np
from jax import lax
from jax.experimental import pallas as pl
from jax.experimental.pallas import tpu as pltpu

C_MID = 256  # hidden channel width hard-coded by PoseDecoder


def _round_up(x, m):
    return ((x + m - 1) // m) * m


def _pose_decoder_kernel(H, W, WP, M,
                         x_ref, mask_ref,
                         wsq_ref, bsq_ref,
                         wp0_ref, bp0_ref, wp1_ref, bp1_ref,
                         wp2_ref, bp2_ref,
                         o_ref,
                         pad0_ref, pad1_ref):
    """One batch element per grid step.

    x_ref:   (1, M, Cin)   input in row-strided padded layout (row h*WP + w
                           holds pixel (h, w); rows with w >= W are zero)
    mask_ref:(M, 1)        1.0 on real pixels, 0.0 on the w >= W slack rows
    wsq:     (Cin, 256)    bsq: (1, 256)        'squeeze' 1x1 conv
    wp0/wp1: (3,3,256,256) bp0/bp1: (1, 256)    'pose',0 / 'pose',1 3x3 convs
    wp2:     (256, 6F)     bp2: (1, 6F)         'pose',2 1x1 conv
    o_ref:   (1, 1, 6F)    0.01 * spatial mean
    pad0/1:  (NP, 256)     flat zero-padded VMEM scratch, NP = (H+3)*WP
    """
    NP = pad0_ref.shape[0]
    head = WP + 1                 # rows [0, WP+1): top pad row + left pad of row 1
    tail = (H + 1) * WP + 1       # rows [tail, NP): bottom pad row + slack rows

    # Keep the zero-padding invariant only for rows the stores below never
    # touch.  O(W*C) per step; everything else is overwritten (with masked
    # zeros landing exactly on the remaining padding positions).
    zh = jnp.zeros((head, C_MID), jnp.float32)
    zt = jnp.zeros((NP - tail, C_MID), jnp.float32)
    pad0_ref[0:head, :] = zh
    pad1_ref[0:head, :] = zh
    pad0_ref[tail:NP, :] = zt
    pad1_ref[tail:NP, :] = zt

    mask = mask_ref[...]          # (M, 1)

    # ---- squeeze: 1x1 conv + ReLU as one (M, Cin) x (Cin, 256) matmul ----
    x = x_ref[0]                                                    # (M, Cin)
    y = jnp.dot(x, wsq_ref[...], preferred_element_type=jnp.float32)
    y = jnp.maximum(y + bsq_ref[...], 0.0)
    y = jnp.where(mask > 0.0, y, 0.0)
    pad0_ref[WP + 1:WP + 1 + M, :] = y

    # ---- 3x3 conv (stride 1, pad 1) + ReLU: 9 batched matmuls, bias once ----
    def conv3x3_relu(src_ref, w_ref, b_ref):
        acc = jnp.zeros((M, C_MID), jnp.float32)
        for kh in range(3):
            for kw in range(3):
                off = kh * WP + kw
                tap = src_ref[off:off + M, :]                       # (M, 256)
                acc = acc + jnp.dot(tap, w_ref[kh, kw],
                                    preferred_element_type=jnp.float32)
        out = jnp.maximum(acc + b_ref[...], 0.0)
        return jnp.where(mask > 0.0, out, 0.0)

    y0 = conv3x3_relu(pad0_ref, wp0_ref, bp0_ref)                   # 'pose',0
    pad1_ref[WP + 1:WP + 1 + M, :] = y0
    y1 = conv3x3_relu(pad1_ref, wp1_ref, bp1_ref)                   # 'pose',1

    # ---- spatial mean first (commutes with the 1x1 'pose',2 conv) ----
    mean_hw = jnp.sum(y1, axis=0, keepdims=True) * (1.0 / (H * W))  # (1, 256)
    out = jnp.dot(mean_hw, wp2_ref[...],
                  preferred_element_type=jnp.float32) + bp2_ref[...]
    o_ref[0] = 0.01 * out


def init_params(key, c_enc_last, num_frames=1):
    """Deterministic synthetic parameters (shapes from PoseDecoder.__init__)."""
    ks = jax.random.split(key, 8)
    s = 0.05
    w_sq = s * jax.random.normal(ks[0], (c_enc_last, C_MID), jnp.float32)
    b_sq = 0.01 * jax.random.normal(ks[1], (1, C_MID), jnp.float32)
    w_p0 = s * jax.random.normal(ks[2], (3, 3, C_MID, C_MID), jnp.float32)
    b_p0 = 0.01 * jax.random.normal(ks[3], (1, C_MID), jnp.float32)
    w_p1 = s * jax.random.normal(ks[4], (3, 3, C_MID, C_MID), jnp.float32)
    b_p1 = 0.01 * jax.random.normal(ks[5], (1, C_MID), jnp.float32)
    w_p2 = s * jax.random.normal(ks[6], (C_MID, 6 * num_frames), jnp.float32)
    b_p2 = 0.01 * jax.random.normal(ks[7], (1, 6 * num_frames), jnp.float32)
    return (w_sq, b_sq, w_p0, b_p0, w_p1, b_p1, w_p2, b_p2)


@functools.partial(jax.jit, static_argnames=("num_frames",))
def pose_decoder_pallas(x_nhwc, params, num_frames=1):
    B, H, W, Cin = x_nhwc.shape
    F = num_frames
    WP = _round_up(W + 2, 8)          # sublane-aligned padded row stride
    M = H * WP                        # batched matmul M dimension
    NP = (H + 3) * WP                 # flat padded buffer rows (incl. slack)

    # Row-strided padded input layout: row h*WP + w holds pixel (h, w);
    # rows with w >= W are zero.
    x_strided = jnp.pad(x_nhwc.astype(jnp.float32),
                        ((0, 0), (0, 0), (0, WP - W), (0, 0)))
    x_strided = x_strided.reshape(B, M, Cin)
    mask = jnp.tile(jnp.arange(WP) < W, (H,)).astype(jnp.float32).reshape(M, 1)

    w_sq, b_sq, w_p0, b_p0, w_p1, b_p1, w_p2, b_p2 = params
    kernel = functools.partial(_pose_decoder_kernel, H, W, WP, M)

    out = pl.pallas_call(
        kernel,
        out_shape=jax.ShapeDtypeStruct((B, 1, 6 * F), jnp.float32),
        grid=(B,),
        in_specs=[
            pl.BlockSpec((1, M, Cin), lambda b: (b, 0, 0)),
            pl.BlockSpec((M, 1), lambda b: (0, 0)),
            pl.BlockSpec((Cin, C_MID), lambda b: (0, 0)),
            pl.BlockSpec((1, C_MID), lambda b: (0, 0)),
            pl.BlockSpec((3, 3, C_MID, C_MID), lambda b: (0, 0, 0, 0)),
            pl.BlockSpec((1, C_MID), lambda b: (0, 0)),
            pl.BlockSpec((3, 3, C_MID, C_MID), lambda b: (0, 0, 0, 0)),
            pl.BlockSpec((1, C_MID), lambda b: (0, 0)),
            pl.BlockSpec((C_MID, 6 * F), lambda b: (0, 0)),
            pl.BlockSpec((1, 6 * F), lambda b: (0, 0)),
        ],
        out_specs=pl.BlockSpec((1, 1, 6 * F), lambda b: (b, 0, 0)),
        scratch_shapes=[
            pltpu.VMEM((NP, C_MID), jnp.float32),
            pltpu.VMEM((NP, C_MID), jnp.float32),
        ],
        compiler_params=pltpu.CompilerParams(
            dimension_semantics=("parallel",)),
    )(x_strided, mask, w_sq, b_sq, w_p0, b_p0, w_p1, b_p1, w_p2, b_p2)

    # out already contains 0.01 * mean; match torch's `.view(-1, 6)`.
    return out.reshape(-1, 6)


def pose_decoder_ref(x_nhwc, params, num_frames=1):
    """Pure-JAX reference (NHWC) mirroring the PyTorch forward."""
    w_sq, b_sq, w_p0, b_p0, w_p1, b_p1, w_p2, b_p2 = params
    dn = ('NHWC', 'HWIO', 'NHWC')
    h = jax.nn.relu(jnp.einsum('bhwc,cd->bhwd', x_nhwc, w_sq) + b_sq[0])
    h = jax.nn.relu(lax.conv_general_dilated(h, w_p0, (1, 1), 'SAME',
                                             dimension_numbers=dn) + b_p0[0])
    h = jax.nn.relu(lax.conv_general_dilated(h, w_p1, (1, 1), 'SAME',
                                             dimension_numbers=dn) + b_p1[0])
    out = jnp.einsum('bhwc,cd->bhwd', h, w_p2) + b_p2[0]
    out = out.mean(axis=2).mean(axis=1)          # == mean(3).mean(2) in NCHW
    return 0.01 * out.reshape(-1, 6)


if __name__ == "__main__":
    key = jax.random.PRNGKey(0)
    k_x, k_p = jax.random.split(key)

    # PoseDecoder(num_ch_enc=[16,32,64], num_input_features=1,
    #             num_frames_to_predict_for=1, stride=1)
    num_ch_enc = (16, 32, 64)
    B, H, W = 2, 4, 6
    num_frames = 1

    # PyTorch-convention NCHW input (last encoder feature), transposed to NHWC.
    x_nchw = jax.random.normal(k_x, (B, num_ch_enc[-1], H, W), jnp.float32)
    x_nhwc = jnp.transpose(x_nchw, (0, 2, 3, 1))

    params = init_params(k_p, num_ch_enc[-1], num_frames=num_frames)

    pose = pose_decoder_pallas(x_nhwc, params, num_frames=num_frames)
    pose = jax.block_until_ready(pose)

    ref = pose_decoder_ref(x_nhwc, params, num_frames=num_frames)
    assert pose.shape == (B * num_frames, 6)
    np.testing.assert_allclose(np.asarray(pose), np.asarray(ref),
                               rtol=5e-4, atol=1e-5)
    print("KERNEL_OK")
</pallas_src>

<mosaic_0001>
module attributes {stable_mosaic.version = 11 : i64} {
  func.func @_pose_decoder_kernel(%arg0: i32, %arg1: memref<1x32x64xf32, #tpu.memory_space<vmem>>, %arg2: memref<32x1xf32, #tpu.memory_space<vmem>>, %arg3: memref<64x256xf32, #tpu.memory_space<vmem>>, %arg4: memref<1x256xf32, #tpu.memory_space<vmem>>, %arg5: memref<3x3x256x256xf32, #tpu.memory_space<vmem>>, %arg6: memref<1x256xf32, #tpu.memory_space<vmem>>, %arg7: memref<3x3x256x256xf32, #tpu.memory_space<vmem>>, %arg8: memref<1x256xf32, #tpu.memory_space<vmem>>, %arg9: memref<256x6xf32, #tpu.memory_space<vmem>>, %arg10: memref<1x6xf32, #tpu.memory_space<vmem>>, %arg11: memref<1x1x6xf32, #tpu.memory_space<vmem>>, %arg12: memref<56x256xf32, #tpu.memory_space<vmem>>, %arg13: memref<56x256xf32, #tpu.memory_space<vmem>>) attributes {dimension_semantics = [#tpu.dimension_semantics<parallel>], iteration_bounds = array<i64: 2>, scalar_prefetch = 0 : i64, scratch_operands = 2 : i64, tpu.core_type = #tpu.core_type<tc>, window_params = [{transform_indices = @transform_0, window_bounds = array<i64: 1, 32, 64>}, {pipeline_mode = #tpu.pipeline_mode<synchronous>, transform_indices = @transform_1, window_bounds = array<i64: 32, 1>}, {pipeline_mode = #tpu.pipeline_mode<synchronous>, transform_indices = @transform_2, window_bounds = array<i64: 64, 256>}, {pipeline_mode = #tpu.pipeline_mode<synchronous>, transform_indices = @transform_3, window_bounds = array<i64: 1, 256>}, {pipeline_mode = #tpu.pipeline_mode<synchronous>, transform_indices = @transform_4, window_bounds = array<i64: 3, 3, 256, 256>}, {pipeline_mode = #tpu.pipeline_mode<synchronous>, transform_indices = @transform_5, window_bounds = array<i64: 1, 256>}, {pipeline_mode = #tpu.pipeline_mode<synchronous>, transform_indices = @transform_6, window_bounds = array<i64: 3, 3, 256, 256>}, {pipeline_mode = #tpu.pipeline_mode<synchronous>, transform_indices = @transform_7, window_bounds = array<i64: 1, 256>}, {pipeline_mode = #tpu.pipeline_mode<synchronous>, transform_indices = @transform_8, window_bounds = array<i64: 256, 6>}, {pipeline_mode = #tpu.pipeline_mode<synchronous>, transform_indices = @transform_9, window_bounds = array<i64: 1, 6>}, {transform_indices = @transform_10, window_bounds = array<i64: 1, 1, 6>}]} {
    %cst = arith.constant 0.000000e+00 : f32
    %0 = vector.broadcast %cst : f32 to vector<9x256xf32>
    %cst_0 = arith.constant 0.000000e+00 : f32
    %1 = vector.broadcast %cst_0 : f32 to vector<15x256xf32>
    %c0 = arith.constant 0 : index
    %c0_1 = arith.constant 0 : index
    %2 = vector.load %arg12[%c0, %c0_1] : memref<56x256xf32, #tpu.memory_space<vmem>>, vector<9x256xf32>
    tpu.vector_store %arg12[%c0, %c0_1], %0 {strides = array<i32>} : memref<56x256xf32, #tpu.memory_space<vmem>>, vector<9x256xf32>,
    %c0_2 = arith.constant 0 : index
    %c0_3 = arith.constant 0 : index
    %3 = vector.load %arg13[%c0_2, %c0_3] : memref<56x256xf32, #tpu.memory_space<vmem>>, vector<9x256xf32>
    tpu.vector_store %arg13[%c0_2, %c0_3], %0 {strides = array<i32>} : memref<56x256xf32, #tpu.memory_space<vmem>>, vector<9x256xf32>,
    %c41 = arith.constant 41 : index
    %c0_4 = arith.constant 0 : index
    %4 = vector.load %arg12[%c41, %c0_4] : memref<56x256xf32, #tpu.memory_space<vmem>>, vector<15x256xf32>
    tpu.vector_store %arg12[%c41, %c0_4], %1 {strides = array<i32>} : memref<56x256xf32, #tpu.memory_space<vmem>>, vector<15x256xf32>,
    %c41_5 = arith.constant 41 : index
    %c0_6 = arith.constant 0 : index
    %5 = vector.load %arg13[%c41_5, %c0_6] : memref<56x256xf32, #tpu.memory_space<vmem>>, vector<15x256xf32>
    tpu.vector_store %arg13[%c41_5, %c0_6], %1 {strides = array<i32>} : memref<56x256xf32, #tpu.memory_space<vmem>>, vector<15x256xf32>,
    %c0_7 = arith.constant 0 : index
    %c0_8 = arith.constant 0 : index
    %6 = vector.load %arg2[%c0_7, %c0_8] : memref<32x1xf32, #tpu.memory_space<vmem>>, vector<32x1xf32>
    %c0_9 = arith.constant 0 : index
    %c0_10 = arith.constant 0 : index
    %c0_11 = arith.constant 0 : index
    %7 = vector.load %arg1[%c0_9, %c0_10, %c0_11] : memref<1x32x64xf32, #tpu.memory_space<vmem>>, vector<1x32x64xf32>
    %8 = vector.shape_cast %7 : vector<1x32x64xf32> to vector<32x64xf32>
    %c0_12 = arith.constant 0 : index
    %c0_13 = arith.constant 0 : index
    %9 = vector.load %arg3[%c0_12, %c0_13] : memref<64x256xf32, #tpu.memory_space<vmem>>, vector<64x256xf32>
    %cst_14 = arith.constant dense<0.000000e+00> : vector<32x256xf32>
    %10 = tpu.matmul %8, %9, %cst_14 {dimension_numbers = #tpu.dot_dimension_numbers<[1], [0], [0], [1], [0, 0, 1, 1], [], []>} : vector<32x64xf32>, vector<64x256xf32>, vector<32x256xf32> -> vector<32x256xf32>
    %c0_15 = arith.constant 0 : index
    %c0_16 = arith.constant 0 : index
    %11 = vector.load %arg4[%c0_15, %c0_16] : memref<1x256xf32, #tpu.memory_space<vmem>>, vector<1x256xf32>
    %12 = vector.broadcast %11 : vector<1x256xf32> to vector<32x256xf32>
    %13 = arith.addf %10, %12 : vector<32x256xf32>
    %cst_17 = arith.constant 0.000000e+00 : f32
    %14 = vector.broadcast %cst_17 : f32 to vector<32x256xf32>
    %15 = arith.maximumf %13, %14 : vector<32x256xf32>
    %cst_18 = arith.constant 0.000000e+00 : f32
    %16 = vector.broadcast %cst_18 : f32 to vector<32x1xf32>
    %17 = arith.cmpf ogt, %6, %16 : vector<32x1xf32>
    %cst_19 = arith.constant 0.000000e+00 : f32
    %18 = vector.shape_cast %17 : vector<32x1xi1> to vector<32x1xi1>
    %19 = vector.broadcast %18 : vector<32x1xi1> to vector<32x256xi1>
    %20 = vector.broadcast %cst_19 : f32 to vector<32x256xf32>
    %21 = arith.select %19, %15, %20 : vector<32x256xi1>, vector<32x256xf32>
    %c9 = arith.constant 9 : index
    %c0_20 = arith.constant 0 : index
    %22 = vector.load %arg12[%c9, %c0_20] : memref<56x256xf32, #tpu.memory_space<vmem>>, vector<32x256xf32>
    tpu.vector_store %arg12[%c9, %c0_20], %21 {strides = array<i32>} : memref<56x256xf32, #tpu.memory_space<vmem>>, vector<32x256xf32>,
    %cst_21 = arith.constant 0.000000e+00 : f32
    %23 = vector.broadcast %cst_21 : f32 to vector<32x256xf32>
    %c0_22 = arith.constant 0 : index
    %c0_23 = arith.constant 0 : index
    %24 = vector.load %arg12[%c0_22, %c0_23] : memref<56x256xf32, #tpu.memory_space<vmem>>, vector<32x256xf32>
    %c0_24 = arith.constant 0 : index
    %c0_25 = arith.constant 0 : index
    %c0_26 = arith.constant 0 : index
    %c0_27 = arith.constant 0 : index
    %25 = vector.load %arg5[%c0_24, %c0_25, %c0_26, %c0_27] : memref<3x3x256x256xf32, #tpu.memory_space<vmem>>, vector<1x1x256x256xf32>
    %26 = vector.shape_cast %25 : vector<1x1x256x256xf32> to vector<256x256xf32>
    %cst_28 = arith.constant dense<0.000000e+00> : vector<32x256xf32>
    %27 = tpu.matmul %24, %26, %cst_28 {dimension_numbers = #tpu.dot_dimension_numbers<[1], [0], [0], [1], [0, 0, 1, 1], [], []>} : vector<32x256xf32>, vector<256x256xf32>, vector<32x256xf32> -> vector<32x256xf32>
    %28 = arith.addf %23, %27 : vector<32x256xf32>
    %c1 = arith.constant 1 : index
    %c0_29 = arith.constant 0 : index
    %29 = vector.load %arg12[%c1, %c0_29] : memref<56x256xf32, #tpu.memory_space<vmem>>, vector<32x256xf32>
    %c0_30 = arith.constant 0 : index
    %c1_31 = arith.constant 1 : index
    %c0_32 = arith.constant 0 : index
    %c0_33 = arith.constant 0 : index
    %30 = vector.load %arg5[%c0_30, %c1_31, %c0_32, %c0_33] : memref<3x3x256x256xf32, #tpu.memory_space<vmem>>, vector<1x1x256x256xf32>
    %31 = vector.shape_cast %30 : vector<1x1x256x256xf32> to vector<256x256xf32>
    %cst_34 = arith.constant dense<0.000000e+00> : vector<32x256xf32>
    %32 = tpu.matmul %29, %31, %cst_34 {dimension_numbers = #tpu.dot_dimension_numbers<[1], [0], [0], [1], [0, 0, 1, 1], [], []>} : vector<32x256xf32>, vector<256x256xf32>, vector<32x256xf32> -> vector<32x256xf32>
    %33 = arith.addf %28, %32 : vector<32x256xf32>
    %c2 = arith.constant 2 : index
    %c0_35 = arith.constant 0 : index
    %34 = vector.load %arg12[%c2, %c0_35] : memref<56x256xf32, #tpu.memory_space<vmem>>, vector<32x256xf32>
    %c0_36 = arith.constant 0 : index
    %c2_37 = arith.constant 2 : index
    %c0_38 = arith.constant 0 : index
    %c0_39 = arith.constant 0 : index
    %35 = vector.load %arg5[%c0_36, %c2_37, %c0_38, %c0_39] : memref<3x3x256x256xf32, #tpu.memory_space<vmem>>, vector<1x1x256x256xf32>
    %36 = vector.shape_cast %35 : vector<1x1x256x256xf32> to vector<256x256xf32>
    %cst_40 = arith.constant dense<0.000000e+00> : vector<32x256xf32>
    %37 = tpu.matmul %34, %36, %cst_40 {dimension_numbers = #tpu.dot_dimension_numbers<[1], [0], [0], [1], [0, 0, 1, 1], [], []>} : vector<32x256xf32>, vector<256x256xf32>, vector<32x256xf32> -> vector<32x256xf32>
    %38 = arith.addf %33, %37 : vector<32x256xf32>
    %c8 = arith.constant 8 : index
    %c0_41 = arith.constant 0 : index
    %39 = vector.load %arg12[%c8, %c0_41] : memref<56x256xf32, #tpu.memory_space<vmem>>, vector<32x256xf32>
    %c1_42 = arith.constant 1 : index
    %c0_43 = arith.constant 0 : index
    %c0_44 = arith.constant 0 : index
    %c0_45 = arith.constant 0 : index
    %40 = vector.load %arg5[%c1_42, %c0_43, %c0_44, %c0_45] : memref<3x3x256x256xf32, #tpu.memory_space<vmem>>, vector<1x1x256x256xf32>
    %41 = vector.shape_cast %40 : vector<1x1x256x256xf32> to vector<256x256xf32>
    %cst_46 = arith.constant dense<0.000000e+00> : vector<32x256xf32>
    %42 = tpu.matmul %39, %41, %cst_46 {dimension_numbers = #tpu.dot_dimension_numbers<[1], [0], [0], [1], [0, 0, 1, 1], [], []>} : vector<32x256xf32>, vector<256x256xf32>, vector<32x256xf32> -> vector<32x256xf32>
    %43 = arith.addf %38, %42 : vector<32x256xf32>
    %c9_47 = arith.constant 9 : index
    %c0_48 = arith.constant 0 : index
    %44 = vector.load %arg12[%c9_47, %c0_48] : memref<56x256xf32, #tpu.memory_space<vmem>>, vector<32x256xf32>
    %c1_49 = arith.constant 1 : index
    %c1_50 = arith.constant 1 : index
    %c0_51 = arith.constant 0 : index
    %c0_52 = arith.constant 0 : index
    %45 = vector.load %arg5[%c1_49, %c1_50, %c0_51, %c0_52] : memref<3x3x256x256xf32, #tpu.memory_space<vmem>>, vector<1x1x256x256xf32>
    %46 = vector.shape_cast %45 : vector<1x1x256x256xf32> to vector<256x256xf32>
    %cst_53 = arith.constant dense<0.000000e+00> : vector<32x256xf32>
    %47 = tpu.matmul %44, %46, %cst_53 {dimension_numbers = #tpu.dot_dimension_numbers<[1], [0], [0], [1], [0, 0, 1, 1], [], []>} : vector<32x256xf32>, vector<256x256xf32>, vector<32x256xf32> -> vector<32x256xf32>
    %48 = arith.addf %43, %47 : vector<32x256xf32>
    %c10 = arith.constant 10 : index
    %c0_54 = arith.constant 0 : index
    %49 = vector.load %arg12[%c10, %c0_54] : memref<56x256xf32, #tpu.memory_space<vmem>>, vector<32x256xf32>
    %c1_55 = arith.constant 1 : index
    %c2_56 = arith.constant 2 : index
    %c0_57 = arith.constant 0 : index
    %c0_58 = arith.constant 0 : index
    %50 = vector.load %arg5[%c1_55, %c2_56, %c0_57, %c0_58] : memref<3x3x256x256xf32, #tpu.memory_space<vmem>>, vector<1x1x256x256xf32>
    %51 = vector.shape_cast %50 : vector<1x1x256x256xf32> to vector<256x256xf32>
    %cst_59 = arith.constant dense<0.000000e+00> : vector<32x256xf32>
    %52 = tpu.matmul %49, %51, %cst_59 {dimension_numbers = #tpu.dot_dimension_numbers<[1], [0], [0], [1], [0, 0, 1, 1], [], []>} : vector<32x256xf32>, vector<256x256xf32>, vector<32x256xf32> -> vector<32x256xf32>
    %53 = arith.addf %48, %52 : vector<32x256xf32>
    %c16 = arith.constant 16 : index
    %c0_60 = arith.constant 0 : index
    %54 = vector.load %arg12[%c16, %c0_60] : memref<56x256xf32, #tpu.memory_space<vmem>>, vector<32x256xf32>
    %c2_61 = arith.constant 2 : index
    %c0_62 = arith.constant 0 : index
    %c0_63 = arith.constant 0 : index
    %c0_64 = arith.constant 0 : index
    %55 = vector.load %arg5[%c2_61, %c0_62, %c0_63, %c0_64] : memref<3x3x256x256xf32, #tpu.memory_space<vmem>>, vector<1x1x256x256xf32>
    %56 = vector.shape_cast %55 : vector<1x1x256x256xf32> to vector<256x256xf32>
    %cst_65 = arith.constant dense<0.000000e+00> : vector<32x256xf32>
    %57 = tpu.matmul %54, %56, %cst_65 {dimension_numbers = #tpu.dot_dimension_numbers<[1], [0], [0], [1], [0, 0, 1, 1], [], []>} : vector<32x256xf32>, vector<256x256xf32>, vector<32x256xf32> -> vector<32x256xf32>
    %58 = arith.addf %53, %57 : vector<32x256xf32>
    %c17 = arith.constant 17 : index
    %c0_66 = arith.constant 0 : index
    %59 = vector.load %arg12[%c17, %c0_66] : memref<56x256xf32, #tpu.memory_space<vmem>>, vector<32x256xf32>
    %c2_67 = arith.constant 2 : index
    %c1_68 = arith.constant 1 : index
    %c0_69 = arith.constant 0 : index
    %c0_70 = arith.constant 0 : index
    %60 = vector.load %arg5[%c2_67, %c1_68, %c0_69, %c0_70] : memref<3x3x256x256xf32, #tpu.memory_space<vmem>>, vector<1x1x256x256xf32>
    %61 = vector.shape_cast %60 : vector<1x1x256x256xf32> to vector<256x256xf32>
    %cst_71 = arith.constant dense<0.000000e+00> : vector<32x256xf32>
    %62 = tpu.matmul %59, %61, %cst_71 {dimension_numbers = #tpu.dot_dimension_numbers<[1], [0], [0], [1], [0, 0, 1, 1], [], []>} : vector<32x256xf32>, vector<256x256xf32>, vector<32x256xf32> -> vector<32x256xf32>
    %63 = arith.addf %58, %62 : vector<32x256xf32>
    %c18 = arith.constant 18 : index
    %c0_72 = arith.constant 0 : index
    %64 = vector.load %arg12[%c18, %c0_72] : memref<56x256xf32, #tpu.memory_space<vmem>>, vector<32x256xf32>
    %c2_73 = arith.constant 2 : index
    %c2_74 = arith.constant 2 : index
    %c0_75 = arith.constant 0 : index
    %c0_76 = arith.constant 0 : index
    %65 = vector.load %arg5[%c2_73, %c2_74, %c0_75, %c0_76] : memref<3x3x256x256xf32, #tpu.memory_space<vmem>>, vector<1x1x256x256xf32>
    %66 = vector.shape_cast %65 : vector<1x1x256x256xf32> to vector<256x256xf32>
    %cst_77 = arith.constant dense<0.000000e+00> : vector<32x256xf32>
    %67 = tpu.matmul %64, %66, %cst_77 {dimension_numbers = #tpu.dot_dimension_numbers<[1], [0], [0], [1], [0, 0, 1, 1], [], []>} : vector<32x256xf32>, vector<256x256xf32>, vector<32x256xf32> -> vector<32x256xf32>
    %68 = arith.addf %63, %67 : vector<32x256xf32>
    %c0_78 = arith.constant 0 : index
    %c0_79 = arith.constant 0 : index
    %69 = vector.load %arg6[%c0_78, %c0_79] : memref<1x256xf32, #tpu.memory_space<vmem>>, vector<1x256xf32>
    %70 = vector.broadcast %69 : vector<1x256xf32> to vector<32x256xf32>
    %71 = arith.addf %68, %70 : vector<32x256xf32>
    %cst_80 = arith.constant 0.000000e+00 : f32
    %72 = vector.broadcast %cst_80 : f32 to vector<32x256xf32>
    %73 = arith.maximumf %71, %72 : vector<32x256xf32>
    %cst_81 = arith.constant 0.000000e+00 : f32
    %74 = vector.broadcast %cst_81 : f32 to vector<32x1xf32>
    %75 = arith.cmpf ogt, %6, %74 : vector<32x1xf32>
    %cst_82 = arith.constant 0.000000e+00 : f32
    %76 = vector.shape_cast %75 : vector<32x1xi1> to vector<32x1xi1>
    %77 = vector.broadcast %76 : vector<32x1xi1> to vector<32x256xi1>
    %78 = vector.broadcast %cst_82 : f32 to vector<32x256xf32>
    %79 = arith.select %77, %73, %78 : vector<32x256xi1>, vector<32x256xf32>
    %c9_83 = arith.constant 9 : index
    %c0_84 = arith.constant 0 : index
    %80 = vector.load %arg13[%c9_83, %c0_84] : memref<56x256xf32, #tpu.memory_space<vmem>>, vector<32x256xf32>
    tpu.vector_store %arg13[%c9_83, %c0_84], %79 {strides = array<i32>} : memref<56x256xf32, #tpu.memory_space<vmem>>, vector<32x256xf32>,
    %cst_85 = arith.constant 0.000000e+00 : f32
    %81 = vector.broadcast %cst_85 : f32 to vector<32x256xf32>
    %c0_86 = arith.constant 0 : index
    %c0_87 = arith.constant 0 : index
    %82 = vector.load %arg13[%c0_86, %c0_87] : memref<56x256xf32, #tpu.memory_space<vmem>>, vector<32x256xf32>
    %c0_88 = arith.constant 0 : index
    %c0_89 = arith.constant 0 : index
    %c0_90 = arith.constant 0 : index
    %c0_91 = arith.constant 0 : index
    %83 = vector.load %arg7[%c0_88, %c0_89, %c0_90, %c0_91] : memref<3x3x256x256xf32, #tpu.memory_space<vmem>>, vector<1x1x256x256xf32>
    %84 = vector.shape_cast %83 : vector<1x1x256x256xf32> to vector<256x256xf32>
    %cst_92 = arith.constant dense<0.000000e+00> : vector<32x256xf32>
    %85 = tpu.matmul %82, %84, %cst_92 {dimension_numbers = #tpu.dot_dimension_numbers<[1], [0], [0], [1], [0, 0, 1, 1], [], []>} : vector<32x256xf32>, vector<256x256xf32>, vector<32x256xf32> -> vector<32x256xf32>
    %86 = arith.addf %81, %85 : vector<32x256xf32>
    %c1_93 = arith.constant 1 : index
    %c0_94 = arith.constant 0 : index
    %87 = vector.load %arg13[%c1_93, %c0_94] : memref<56x256xf32, #tpu.memory_space<vmem>>, vector<32x256xf32>
    %c0_95 = arith.constant 0 : index
    %c1_96 = arith.constant 1 : index
    %c0_97 = arith.constant 0 : index
    %c0_98 = arith.constant 0 : index
    %88 = vector.load %arg7[%c0_95, %c1_96, %c0_97, %c0_98] : memref<3x3x256x256xf32, #tpu.memory_space<vmem>>, vector<1x1x256x256xf32>
    %89 = vector.shape_cast %88 : vector<1x1x256x256xf32> to vector<256x256xf32>
    %cst_99 = arith.constant dense<0.000000e+00> : vector<32x256xf32>
    %90 = tpu.matmul %87, %89, %cst_99 {dimension_numbers = #tpu.dot_dimension_numbers<[1], [0], [0], [1], [0, 0, 1, 1], [], []>} : vector<32x256xf32>, vector<256x256xf32>, vector<32x256xf32> -> vector<32x256xf32>
    %91 = arith.addf %86, %90 : vector<32x256xf32>
    %c2_100 = arith.constant 2 : index
    %c0_101 = arith.constant 0 : index
    %92 = vector.load %arg13[%c2_100, %c0_101] : memref<56x256xf32, #tpu.memory_space<vmem>>, vector<32x256xf32>
    %c0_102 = arith.constant 0 : index
    %c2_103 = arith.constant 2 : index
    %c0_104 = arith.constant 0 : index
    %c0_105 = arith.constant 0 : index
    %93 = vector.load %arg7[%c0_102, %c2_103, %c0_104, %c0_105] : memref<3x3x256x256xf32, #tpu.memory_space<vmem>>, vector<1x1x256x256xf32>
    %94 = vector.shape_cast %93 : vector<1x1x256x256xf32> to vector<256x256xf32>
    %cst_106 = arith.constant dense<0.000000e+00> : vector<32x256xf32>
    %95 = tpu.matmul %92, %94, %cst_106 {dimension_numbers = #tpu.dot_dimension_numbers<[1], [0], [0], [1], [0, 0, 1, 1], [], []>} : vector<32x256xf32>, vector<256x256xf32>, vector<32x256xf32> -> vector<32x256xf32>
    %96 = arith.addf %91, %95 : vector<32x256xf32>
    %c8_107 = arith.constant 8 : index
    %c0_108 = arith.constant 0 : index
    %97 = vector.load %arg13[%c8_107, %c0_108] : memref<56x256xf32, #tpu.memory_space<vmem>>, vector<32x256xf32>
    %c1_109 = arith.constant 1 : index
    %c0_110 = arith.constant 0 : index
    %c0_111 = arith.constant 0 : index
    %c0_112 = arith.constant 0 : index
    %98 = vector.load %arg7[%c1_109, %c0_110, %c0_111, %c0_112] : memref<3x3x256x256xf32, #tpu.memory_space<vmem>>, vector<1x1x256x256xf32>
    %99 = vector.shape_cast %98 : vector<1x1x256x256xf32> to vector<256x256xf32>
    %cst_113 = arith.constant dense<0.000000e+00> : vector<32x256xf32>
    %100 = tpu.matmul %97, %99, %cst_113 {dimension_numbers = #tpu.dot_dimension_numbers<[1], [0], [0], [1], [0, 0, 1, 1], [], []>} : vector<32x256xf32>, vector<256x256xf32>, vector<32x256xf32> -> vector<32x256xf32>
    %101 = arith.addf %96, %100 : vector<32x256xf32>
    %c9_114 = arith.constant 9 : index
    %c0_115 = arith.constant 0 : index
    %102 = vector.load %arg13[%c9_114, %c0_115] : memref<56x256xf32, #tpu.memory_space<vmem>>, vector<32x256xf32>
    %c1_116 = arith.constant 1 : index
    %c1_117 = arith.constant 1 : index
    %c0_118 = arith.constant 0 : index
    %c0_119 = arith.constant 0 : index
    %103 = vector.load %arg7[%c1_116, %c1_117, %c0_118, %c0_119] : memref<3x3x256x256xf32, #tpu.memory_space<vmem>>, vector<1x1x256x256xf32>
    %104 = vector.shape_cast %103 : vector<1x1x256x256xf32> to vector<256x256xf32>
    %cst_120 = arith.constant dense<0.000000e+00> : vector<32x256xf32>
    %105 = tpu.matmul %102, %104, %cst_120 {dimension_numbers = #tpu.dot_dimension_numbers<[1], [0], [0], [1], [0, 0, 1, 1], [], []>} : vector<32x256xf32>, vector<256x256xf32>, vector<32x256xf32> -> vector<32x256xf32>
    %106 = arith.addf %101, %105 : vector<32x256xf32>
    %c10_121 = arith.constant 10 : index
    %c0_122 = arith.constant 0 : index
    %107 = vector.load %arg13[%c10_121, %c0_122] : memref<56x256xf32, #tpu.memory_space<vmem>>, vector<32x256xf32>
    %c1_123 = arith.constant 1 : index
    %c2_124 = arith.constant 2 : index
    %c0_125 = arith.constant 0 : index
    %c0_126 = arith.constant 0 : index
    %108 = vector.load %arg7[%c1_123, %c2_124, %c0_125, %c0_126] : memref<3x3x256x256xf32, #tpu.memory_space<vmem>>, vector<1x1x256x256xf32>
    %109 = vector.shape_cast %108 : vector<1x1x256x256xf32> to vector<256x256xf32>
    %cst_127 = arith.constant dense<0.000000e+00> : vector<32x256xf32>
    %110 = tpu.matmul %107, %109, %cst_127 {dimension_numbers = #tpu.dot_dimension_numbers<[1], [0], [0], [1], [0, 0, 1, 1], [], []>} : vector<32x256xf32>, vector<256x256xf32>, vector<32x256xf32> -> vector<32x256xf32>
    %111 = arith.addf %106, %110 : vector<32x256xf32>
    %c16_128 = arith.constant 16 : index
    %c0_129 = arith.constant 0 : index
    %112 = vector.load %arg13[%c16_128, %c0_129] : memref<56x256xf32, #tpu.memory_space<vmem>>, vector<32x256xf32>
    %c2_130 = arith.constant 2 : index
    %c0_131 = arith.constant 0 : index
    %c0_132 = arith.constant 0 : index
    %c0_133 = arith.constant 0 : index
    %113 = vector.load %arg7[%c2_130, %c0_131, %c0_132, %c0_133] : memref<3x3x256x256xf32, #tpu.memory_space<vmem>>, vector<1x1x256x256xf32>
    %114 = vector.shape_cast %113 : vector<1x1x256x256xf32> to vector<256x256xf32>
    %cst_134 = arith.constant dense<0.000000e+00> : vector<32x256xf32>
    %115 = tpu.matmul %112, %114, %cst_134 {dimension_numbers = #tpu.dot_dimension_numbers<[1], [0], [0], [1], [0, 0, 1, 1], [], []>} : vector<32x256xf32>, vector<256x256xf32>, vector<32x256xf32> -> vector<32x256xf32>
    %116 = arith.addf %111, %115 : vector<32x256xf32>
    %c17_135 = arith.constant 17 : index
    %c0_136 = arith.constant 0 : index
    %117 = vector.load %arg13[%c17_135, %c0_136] : memref<56x256xf32, #tpu.memory_space<vmem>>, vector<32x256xf32>
    %c2_137 = arith.constant 2 : index
    %c1_138 = arith.constant 1 : index
    %c0_139 = arith.constant 0 : index
    %c0_140 = arith.constant 0 : index
    %118 = vector.load %arg7[%c2_137, %c1_138, %c0_139, %c0_140] : memref<3x3x256x256xf32, #tpu.memory_space<vmem>>, vector<1x1x256x256xf32>
    %119 = vector.shape_cast %118 : vector<1x1x256x256xf32> to vector<256x256xf32>
    %cst_141 = arith.constant dense<0.000000e+00> : vector<32x256xf32>
    %120 = tpu.matmul %117, %119, %cst_141 {dimension_numbers = #tpu.dot_dimension_numbers<[1], [0], [0], [1], [0, 0, 1, 1], [], []>} : vector<32x256xf32>, vector<256x256xf32>, vector<32x256xf32> -> vector<32x256xf32>
    %121 = arith.addf %116, %120 : vector<32x256xf32>
    %c18_142 = arith.constant 18 : index
    %c0_143 = arith.constant 0 : index
    %122 = vector.load %arg13[%c18_142, %c0_143] : memref<56x256xf32, #tpu.memory_space<vmem>>, vector<32x256xf32>
    %c2_144 = arith.constant 2 : index
    %c2_145 = arith.constant 2 : index
    %c0_146 = arith.constant 0 : index
    %c0_147 = arith.constant 0 : index
    %123 = vector.load %arg7[%c2_144, %c2_145, %c0_146, %c0_147] : memref<3x3x256x256xf32, #tpu.memory_space<vmem>>, vector<1x1x256x256xf32>
    %124 = vector.shape_cast %123 : vector<1x1x256x256xf32> to vector<256x256xf32>
    %cst_148 = arith.constant dense<0.000000e+00> : vector<32x256xf32>
    %125 = tpu.matmul %122, %124, %cst_148 {dimension_numbers = #tpu.dot_dimension_numbers<[1], [0], [0], [1], [0, 0, 1, 1], [], []>} : vector<32x256xf32>, vector<256x256xf32>, vector<32x256xf32> -> vector<32x256xf32>
    %126 = arith.addf %121, %125 : vector<32x256xf32>
    %c0_149 = arith.constant 0 : index
    %c0_150 = arith.constant 0 : index
    %127 = vector.load %arg8[%c0_149, %c0_150] : memref<1x256xf32, #tpu.memory_space<vmem>>, vector<1x256xf32>
    %128 = vector.broadcast %127 : vector<1x256xf32> to vector<32x256xf32>
    %129 = arith.addf %126, %128 : vector<32x256xf32>
    %cst_151 = arith.constant 0.000000e+00 : f32
    %130 = vector.broadcast %cst_151 : f32 to vector<32x256xf32>
    %131 = arith.maximumf %129, %130 : vector<32x256xf32>
    %cst_152 = arith.constant 0.000000e+00 : f32
    %132 = vector.broadcast %cst_152 : f32 to vector<32x1xf32>
    %133 = arith.cmpf ogt, %6, %132 : vector<32x1xf32>
    %cst_153 = arith.constant 0.000000e+00 : f32
    %134 = vector.shape_cast %133 : vector<32x1xi1> to vector<32x1xi1>
    %135 = vector.broadcast %134 : vector<32x1xi1> to vector<32x256xi1>
    %136 = vector.broadcast %cst_153 : f32 to vector<32x256xf32>
    %137 = arith.select %135, %131, %136 : vector<32x256xi1>, vector<32x256xf32>
    %cst_154 = arith.constant dense<0.000000e+00> : vector<256xf32>
    %138 = vector.multi_reduction <add>, %137, %cst_154 [0] : vector<32x256xf32> to vector<256xf32>
    %139 = vector.shape_cast %138 : vector<256xf32> to vector<1x256xf32>
    %cst_155 = arith.constant 0.0416666679 : f32
    %140 = vector.broadcast %cst_155 : f32 to vector<1x256xf32>
    %141 = arith.mulf %139, %140 : vector<1x256xf32>
    %c0_156 = arith.constant 0 : index
    %c0_157 = arith.constant 0 : index
    %142 = vector.load %arg9[%c0_156, %c0_157] : memref<256x6xf32, #tpu.memory_space<vmem>>, vector<256x6xf32>
    %cst_158 = arith.constant dense<0.000000e+00> : vector<1x6xf32>
    %143 = tpu.matmul %141, %142, %cst_158 {dimension_numbers = #tpu.dot_dimension_numbers<[1], [0], [0], [1], [0, 0, 1, 1], [], []>} : vector<1x256xf32>, vector<256x6xf32>, vector<1x6xf32> -> vector<1x6xf32>
    %c0_159 = arith.constant 0 : index
    %c0_160 = arith.constant 0 : index
    %144 = vector.load %arg10[%c0_159, %c0_160] : memref<1x6xf32, #tpu.memory_space<vmem>>, vector<1x6xf32>
    %145 = arith.addf %143, %144 : vector<1x6xf32>
    %cst_161 = arith.constant 0.00999999977 : f32
    %146 = vector.broadcast %cst_161 : f32 to vector<1x6xf32>
    %147 = arith.mulf %146, %145 : vector<1x6xf32>
    %c0_162 = arith.constant 0 : index
    %c0_163 = arith.constant 0 : index
    %c0_164 = arith.constant 0 : index
    %148 = vector.load %arg11[%c0_162, %c0_163, %c0_164] : memref<1x1x6xf32, #tpu.memory_space<vmem>>, vector<1x1x6xf32>
    %149 = vector.shape_cast %148 : vector<1x1x6xf32> to vector<1x6xf32>
    %150 = vector.shape_cast %147 : vector<1x6xf32> to vector<1x1x6xf32>
    tpu.vector_store %arg11[%c0_162, %c0_163, %c0_164], %150 {strides = array<i32>} : memref<1x1x6xf32, #tpu.memory_space<vmem>>, vector<1x1x6xf32>,
    return
  }
  func.func @transform_0(%arg0: i32) -> (i32, i32, i32) {
    %c0_i32 = arith.constant 0 : i32
    %c0_i32_0 = arith.constant 0 : i32
    %c0_i32_1 = arith.constant 0 : i32
    return %arg0, %c0_i32, %c0_i32_0 : i32, i32, i32
  }
  func.func @transform_1(%arg0: i32) -> (i32, i32) {
    %c0_i32 = arith.constant 0 : i32
    %c0_i32_0 = arith.constant 0 : i32
    %c0_i32_1 = arith.constant 0 : i32
    return %c0_i32, %c0_i32_0 : i32, i32
  }
  func.func @transform_2(%arg0: i32) -> (i32, i32) {
    %c0_i32 = arith.constant 0 : i32
    %c0_i32_0 = arith.constant 0 : i32
    %c0_i32_1 = arith.constant 0 : i32
    return %c0_i32, %c0_i32_0 : i32, i32
  }
  func.func @transform_3(%arg0: i32) -> (i32, i32) {
    %c0_i32 = arith.constant 0 : i32
    %c0_i32_0 = arith.constant 0 : i32
    %c0_i32_1 = arith.constant 0 : i32
    return %c0_i32, %c0_i32_0 : i32, i32
  }
  func.func @transform_4(%arg0: i32) -> (i32, i32, i32, i32) {
    %c0_i32 = arith.constant 0 : i32
    %c0_i32_0 = arith.constant 0 : i32
    %c0_i32_1 = arith.constant 0 : i32
    %c0_i32_2 = arith.constant 0 : i32
    %c0_i32_3 = arith.constant 0 : i32
    return %c0_i32, %c0_i32_0, %c0_i32_1, %c0_i32_2 : i32, i32, i32, i32
  }
  func.func @transform_5(%arg0: i32) -> (i32, i32) {
    %c0_i32 = arith.constant 0 : i32
    %c0_i32_0 = arith.constant 0 : i32
    %c0_i32_1 = arith.constant 0 : i32
    return %c0_i32, %c0_i32_0 : i32, i32
  }
  func.func @transform_6(%arg0: i32) -> (i32, i32, i32, i32) {
    %c0_i32 = arith.constant 0 : i32
    %c0_i32_0 = arith.constant 0 : i32
    %c0_i32_1 = arith.constant 0 : i32
    %c0_i32_2 = arith.constant 0 : i32
    %c0_i32_3 = arith.constant 0 : i32
    return %c0_i32, %c0_i32_0, %c0_i32_1, %c0_i32_2 : i32, i32, i32, i32
  }
  func.func @transform_7(%arg0: i32) -> (i32, i32) {
    %c0_i32 = arith.constant 0 : i32
    %c0_i32_0 = arith.constant 0 : i32
    %c0_i32_1 = arith.constant 0 : i32
    return %c0_i32, %c0_i32_0 : i32, i32
  }
  func.func @transform_8(%arg0: i32) -> (i32, i32) {
    %c0_i32 = arith.constant 0 : i32
    %c0_i32_0 = arith.constant 0 : i32
    %c0_i32_1 = arith.constant 0 : i32
    return %c0_i32, %c0_i32_0 : i32, i32
  }
  func.func @transform_9(%arg0: i32) -> (i32, i32) {
    %c0_i32 = arith.constant 0 : i32
    %c0_i32_0 = arith.constant 0 : i32
    %c0_i32_1 = arith.constant 0 : i32
    return %c0_i32, %c0_i32_0 : i32, i32
  }
  func.func @transform_10(%arg0: i32) -> (i32, i32, i32) {
    %c0_i32 = arith.constant 0 : i32
    %c0_i32_0 = arith.constant 0 : i32
    %c0_i32_1 = arith.constant 0 : i32
    return %arg0, %c0_i32, %c0_i32_0 : i32, i32, i32
  }
}

</mosaic_0001>

<bundles_post_ra>
// kernel: pose_decoder_pallas.1
= control target key start
LH: loop header
LB: loop body
LE: loop exit
PB: predicated region body
PF: predicated region fallthrough
CT: control target
= control target key end

     0   :  { %s7209_s0 = inlined_call_operand.vmem [shape: f32[2,32,64], index: 0, kind: input, shape index: {}]   ;;  %s7210_s1 = inlined_call_operand.vmem [shape: f32[32,1], index: 1, kind: input, shape index: {}]   ;;  %s7211_s2 = inlined_call_operand.hbm [shape: f32[64,256], index: 2, kind: input, shape index: {}]   ;;  %s7212_s3 = inlined_call_operand.hbm [shape: f32[1,256], index: 3, kind: input, shape index: {}]   ;;  %s7213_s4 = inlined_call_operand.hbm [shape: f32[3,3,256,256], index: 4, kind: input, shape index: {}]   ;;  %s7214_s5 = inlined_call_operand.hbm [shape: f32[1,256], index: 5, kind: input, shape index: {}]   ;;  %s7215_s6 = inlined_call_operand.hbm [shape: f32[3,3,256,256], index: 6, kind: input, shape index: {}]   ;;  %s7216_s7 = inlined_call_operand.hbm [shape: f32[1,256], index: 7, kind: input, shape index: {}]   ;;  %s7217_s8 = inlined_call_operand.vmem [shape: f32[256,6], index: 8, kind: input, shape index: {}]   ;;  %s7218_s9 = inlined_call_operand.hbm [shape: f32[1,6], index: 9, kind: input, shape index: {}]   ;;  %s7219_s10 = inlined_call_operand.hbm [shape: f32[2,1,6], index: 10, kind: output, shape index: {}]  }
   0x1   :  { %7227 = sst [smem:[#allocation26_spill]] %s7212_s3 }
   0x2   :  { %7228 = sst [smem:[#allocation27_spill]] %s7214_s5 }
   0x3   :  { %15 = vsyncpa [#allocation5], 0 }
   0x4   :  { %16 = vsyncpa [#allocation8], 0 }
   0x5   :  { %17 = vsyncpa [#allocation11], 0 }
   0x6   :  { %18 = vsyncpa [#allocation14], 0 }
   0x7   :  { %19 = vsyncpa [#allocation6], 0 }
   0x8   :  { %21 = vsyncpa [#allocation6 + $0x1], 0  ;;  %s6294_s13 = smov 0   ;;  %s6296_s14 = smov 0  }
   0x9   :  { %s6298_s15 = smov 0   ;;  %s6300_s16 = smov 0  }
   0xa LB: > { %7229 = sst [smem:[#allocation22_spill]] %s6221_s15  ;;  %s6315_s17 = sadd.s32 4294967295, %s6225_s16   ;;  %s6225_s16 = sphi %s6300_s16, %s7252_s16   ;;  %s6221_s15 = sphi %s6298_s15, %s7254_s15   ;;  %s6217_s14 = sphi %s6296_s14, %s7256_s14   ;;  %s6213_s13 = sphi %s6294_s13, %s7255_s13  }
   0xb   : > { %s4441_s18 = sadd.s32 4294967294, %s6225_s16   ;;  %s6319_s19 = sadd.s32 1, %s6225_s16  }
   0xc   : > { %7230 = sst [smem:[#allocation23_spill]] %s6319_s19  ;;  %s249_s20 = sadd.s32 1, %s6221_s15 }
   0xd   : > { %s246_s21 = ssub.s32 %s6225_s16, %s6319_s19  ;;  %p259_p0 = scmp.ne.s32.totalorder %s6221_s15, %s6217_s14 }
   0xe   : > { %p247_p1 = scmp.eq.s32.totalorder %s246_s21, 0  ;;  %p260_p2 = scmp.eq.s32.totalorder %s6315_s17, 1 }
   0xf   : > { %p265_p3 = scmp.ne.s32.totalorder %s6217_s14, %s6213_s13  ;;  %p266_p4 = scmp.eq.s32.totalorder %s4441_s18, 1 }
  0x10   : > { %s6330_s22 = scalar_select %p247_p1, %s6221_s15, %s249_s20  }
  0x11   : > { %p6332_p5 = por %p260_p2, %p259_p0  ;;  %p6336_p6 = por %p266_p4, %p265_p3 }
  0x12   : > { %7231 = sst [smem:[#allocation24_spill]] %s6330_s22  ;;  %p4442_p7 = scmp.ge.s32.totalorder %s6225_s16, 1 }
  0x13   : > { %s7232_s23 = scalar_select %p6332_p5, 1, 0 }
  0x14   : > { %s7233_s24 = scalar_select %p6336_p6, 1, 0 }
  0x15   : > { %p273_p8 = scmp.lt.s32.totalorder %s6225_s16, 3  ;;  %p7221_p9 = scmp.eq.s32.totalorder %s6315_s17, 0 }
  0x16   : > { %7234 = sst [smem:[#allocation25_spill]] %s7233_s24  ;;  %s6227_s26 = smov [#allocation7]  }
  0x17   : > { %p6343_p10 = pnand %p4442_p7, %p273_p8  ;;  %s302_s27 = sshll.u32 %s6227_s26, 4  ;;  %s303_s27 = int_to_ptr.vmem [resolvable:$true] %s302_s27 }
  0x18   : > { %s6228_s28 = smov [#allocation10]   ;;  %s6229_s11 = smov [#allocation13]  }
  0x19   : > { %s7235_s25 = scalar_select %p6343_p10, 1, 0 }
  0x1a   : > { %p5862_p11 = pneg %p6343_p10  ;;  %s326_s29 = sshll.u32 %s6228_s28, 4  ;;  %s6355_s29 = int_to_ptr.vmem [resolvable:$true] %s326_s29 }
  0x1b   : > { %s350_s12 = sshll.u32 %s6229_s11, 4  ;;  %s7237_s3 = sld [smem:[#allocation26_spill]]  ;;  %s6357_s12 = int_to_ptr.vmem [resolvable:$true] %s350_s12 }
  0x1c   : > { %p6351_p12 = pnand %p7221_p9, %p5862_p11 }
  0x1e   : > { %p6367_p0 = pneg %p6351_p12 }
  0x21   : > { %s5951_s21 = scalar_lea.hbm %s7237_s3, 32 }
  0x22   : > { %p5952_p13 = scmp.ne.s32.totalorder %s7237_s3, %s5951_s21  ;;  %p5958_p3 = scmp.lt.u32.totalorder %s5951_s21, %s7237_s3 }
  0x24   : > { %p5954_p1 = pnand %p6367_p0, %p5952_p13 }
  0x26   : > { %p5955_p2 = pneg %p5954_p1 }
  0x28   : > { %p5960_p4 = pnand %p5958_p3, %p5955_p2 }
  0x2a   : > { %5963 = shalt.err (!%p5960_p4)
}
  0x2b   : > { %s5964_s18 = scalar_lea.vmem %s303_s27, 32  ;;  %p5972_p9 = scmp.lt.s32.totalorder %s303_s27, %s303_s27 }
  0x2c   : > { %p5965_p7 = scmp.ne.s32.totalorder %s303_s27, %s5964_s18  ;;  %p5973_p6 = scmp.lt.s32.totalorder %s5964_s18, %s5964_s18 }
  0x2e   : > { %p5967_p8 = pnand %p5965_p7, %p6367_p0  ;;  %p5974_p5 = por %p5973_p6, %p5972_p9 }
  0x30   : > { %p5968_p11 = pneg %p5967_p8 }
  0x32   : > { %p5975_p10 = pnand %p5974_p5, %p5968_p11 }
  0x34   : > { %5978 = shalt.err (!%p5975_p10)
}
  0x35   : > { %5868 = dma.hbm_to_vmem [thread:$0]  (!%p6351_p12), %s7237_s3, 32, %s303_s27, [#allocation8]  }
  0x36   : > { %s7239_s5 = sld [smem:[#allocation27_spill]] }
  0x3c   : > { %s5979_s26 = scalar_lea.hbm %s7239_s5, 32 }
  0x3d   : > { %p5980_p13 = scmp.ne.s32.totalorder %s7239_s5, %s5979_s26  ;;  %p5986_p5 = scmp.lt.u32.totalorder %s5979_s26, %s7239_s5 }
  0x3f   : > { %p5982_p1 = pnand %p5980_p13, %p6367_p0 }
  0x41   : > { %p5983_p6 = pneg %p5982_p1 }
  0x43   : > { %p5988_p9 = pnand %p5986_p5, %p5983_p6 }
  0x45   : > { %5991 = shalt.err (!%p5988_p9)
}
  0x46   : > { %s5992_s27 = scalar_lea.vmem %s6355_s29, 32  ;;  %p6000_p4 = scmp.lt.s32.totalorder %s6355_s29, %s6355_s29 }
  0x47   : > { %p5993_p10 = scmp.ne.s32.totalorder %s6355_s29, %s5992_s27  ;;  %p6001_p7 = scmp.lt.s32.totalorder %s5992_s27, %s5992_s27 }
  0x49   : > { %p5995_p2 = pnand %p5993_p10, %p6367_p0  ;;  %p6002_p8 = por %p6001_p7, %p6000_p4 }
  0x4b   : > { %p5996_p3 = pneg %p5995_p2 }
  0x4d   : > { %p6003_p11 = pnand %p6002_p8, %p5996_p3 }
  0x4f   : > { %6006 = shalt.err (!%p6003_p11)
}
  0x50   : > { %5874 = dma.hbm_to_vmem [thread:$0]  (!%p6351_p12), %s7239_s5, 32, %s6355_s29, [#allocation11]  }
  0x51   : > { %s6007_s15 = scalar_lea.hbm %s7216_s7, 32 }
  0x52   : > { %p6008_p13 = scmp.ne.s32.totalorder %s7216_s7, %s6007_s15  ;;  %p6014_p5 = scmp.lt.u32.totalorder %s6007_s15, %s7216_s7 }
  0x54   : > { %p6010_p1 = pnand %p6008_p13, %p6367_p0 }
  0x56   : > { %p6011_p6 = pneg %p6010_p1 }
  0x58   : > { %p6016_p9 = pnand %p6014_p5, %p6011_p6 }
  0x5a   : > { %6019 = shalt.err (!%p6016_p9)
}
  0x5b   : > { %s6020_s29 = scalar_lea.vmem %s6357_s12, 32  ;;  %p6028_p4 = scmp.lt.s32.totalorder %s6357_s12, %s6357_s12 }
  0x5c   : > { %p6021_p10 = scmp.ne.s32.totalorder %s6357_s12, %s6020_s29  ;;  %p6029_p7 = scmp.lt.s32.totalorder %s6020_s29, %s6020_s29 }
  0x5e   : > { %p6023_p2 = pnand %p6021_p10, %p6367_p0  ;;  %p6030_p8 = por %p6029_p7, %p6028_p4 }
  0x60   : > { %p6024_p3 = pneg %p6023_p2 }
  0x62   : > { %p6031_p11 = pnand %p6030_p8, %p6024_p3 }
  0x64   : > { %6034 = shalt.err (!%p6031_p11)
}
  0x65   : > { %5880 = dma.hbm_to_vmem [thread:$0]  (!%p6351_p12), %s7216_s7, 32, %s6357_s12, [#allocation14]  }
  0x66   : > { %s6230_s24 = smov [#allocation4]   ;;  %s6035_s21 = scalar_lea.hbm %s7211_s2, 2048 }
  0x67   : > { %s288_s22 = sshll.u32 %s6230_s24, 4  ;;  %p6036_p13 = scmp.ne.s32.totalorder %s7211_s2, %s6035_s21  ;;  %s289_s22 = int_to_ptr.vmem [resolvable:$true] %s288_s22 }
  0x68   : > { %p6042_p5 = scmp.lt.u32.totalorder %s6035_s21, %s7211_s2 }
  0x69   : > { %p6038_p1 = pnand %p6036_p13, %p6367_p0 }
  0x6b   : > { %p6039_p6 = pneg %p6038_p1 }
  0x6d   : > { %p6044_p9 = pnand %p6042_p5, %p6039_p6 }
  0x6f   : > { %6047 = shalt.err (!%p6044_p9)
}
  0x70   : > { %s6048_s12 = scalar_lea.vmem %s289_s22, 2048  ;;  %p6056_p4 = scmp.lt.s32.totalorder %s289_s22, %s289_s22 }
  0x71   : > { %p6049_p10 = scmp.ne.s32.totalorder %s289_s22, %s6048_s12  ;;  %p6057_p7 = scmp.lt.s32.totalorder %s6048_s12, %s6048_s12 }
  0x73   : > { %p6051_p2 = pnand %p6049_p10, %p6367_p0  ;;  %p6058_p8 = por %p6057_p7, %p6056_p4 }
  0x75   : > { %p6052_p3 = pneg %p6051_p2 }
  0x77   : > { %p6059_p11 = pnand %p6058_p8, %p6052_p3 }
  0x79   : > { %6062 = shalt.err (!%p6059_p11)
}
  0x7a   : > { %s6231_s27 = smov 256   ;;  %s6232_s19 = smov 16  }
  0x7b   : > { %5865 = dma.hbm_to_vmem [thread:$0]  (!%p6351_p12), %s7211_s2, 2048, %s289_s22, [#allocation5], %s6231_s27, %s6231_s27, %s6232_s19  }
  0x7c   : > { %s6233_s15 = smov [#allocation9]   ;;  %s6234_s26 = smov [#allocation12]  }
  0x7d   : > { %s312_s21 = sshll.u32 %s6233_s15, 4  ;;  %s336_s11 = sshll.u32 %s6234_s26, 4  ;;  %s313_s21 = int_to_ptr.vmem [resolvable:$true] %s312_s21  ;;  %s6450_s11 = int_to_ptr.vmem [resolvable:$true] %s336_s11 }
  0x7e   : > { %s6063_s12 = scalar_lea.hbm %s7213_s4, 73728 }
  0x7f   : > { %p6064_p13 = scmp.ne.s32.totalorder %s7213_s4, %s6063_s12  ;;  %p6070_p5 = scmp.lt.u32.totalorder %s6063_s12, %s7213_s4 }
  0x81   : > { %p6066_p1 = pnand %p6064_p13, %p6367_p0 }
  0x83   : > { %p6067_p6 = pneg %p6066_p1 }
  0x85   : > { %p6072_p9 = pnand %p6070_p5, %p6067_p6 }
  0x87   : > { %6075 = shalt.err (!%p6072_p9)
}
  0x88   : > { %s6076_s20 = scalar_lea.vmem %s313_s21, 73728  ;;  %p6084_p4 = scmp.lt.s32.totalorder %s313_s21, %s313_s21 }
  0x89   : > { %p6077_p10 = scmp.ne.s32.totalorder %s313_s21, %s6076_s20  ;;  %p6085_p7 = scmp.lt.s32.totalorder %s6076_s20, %s6076_s20 }
  0x8b   : > { %p6079_p2 = pnand %p6077_p10, %p6367_p0  ;;  %p6086_p8 = por %p6085_p7, %p6084_p4 }
  0x8d   : > { %p6080_p3 = pneg %p6079_p2 }
  0x8f   : > { %p6087_p11 = pnand %p6086_p8, %p6080_p3 }
  0x91   : > { %6090 = shalt.err (!%p6087_p11)
}
  0x92   : > { %5871 = dma.hbm_to_vmem [thread:$0]  (!%p6351_p12), %s7213_s4, 73728, %s313_s21, [#allocation8], %s6231_s27, %s6231_s27, %s6232_s19  }
  0x93   : > { %s6091_s18 = scalar_lea.hbm %s7215_s6, 73728 }
  0x94   : > { %p6092_p13 = scmp.ne.s32.totalorder %s7215_s6, %s6091_s18  ;;  %p6098_p5 = scmp.lt.u32.totalorder %s6091_s18, %s7215_s6 }
  0x96   : > { %p6094_p1 = pnand %p6092_p13, %p6367_p0 }
  0x98   : > { %p6095_p6 = pneg %p6094_p1 }
  0x9a   : > { %p6100_p9 = pnand %p6098_p5, %p6095_p6 }
  0x9c   : > { %6103 = shalt.err (!%p6100_p9)
}
  0x9d   : > { %s6104_s21 = scalar_lea.vmem %s6450_s11, 73728  ;;  %p6112_p4 = scmp.lt.s32.totalorder %s6450_s11, %s6450_s11 }
  0x9e   : > { %p6105_p10 = scmp.ne.s32.totalorder %s6450_s11, %s6104_s21  ;;  %p6113_p7 = scmp.lt.s32.totalorder %s6104_s21, %s6104_s21 }
  0xa0   : > { %p6107_p2 = pnand %p6105_p10, %p6367_p0  ;;  %p6114_p8 = por %p6113_p7, %p6112_p4 }
  0xa2   : > { %p6108_p3 = pneg %p6107_p2 }
  0xa4   : > { %p6115_p11 = pnand %p6114_p8, %p6108_p3 }
  0xa6   : > { %6118 = shalt.err (!%p6115_p11)
}
  0xa7   : > { %5877 = dma.hbm_to_vmem [thread:$0]  (!%p6351_p12), %s7215_s6, 73728, %s6450_s11, [#allocation11], %s6231_s27, %s6231_s27, %s6232_s19  }
  0xa8   : > { %s6235_s5 = smov [#allocation15]   ;;  %s6119_s29 = scalar_lea.hbm %s7218_s9, 16 }
  0xa9   : > { %s364_s15 = sshll.u32 %s6235_s5, 4  ;;  %p6120_p13 = scmp.ne.s32.totalorder %s7218_s9, %s6119_s29  ;;  %s365_s15 = int_to_ptr.vmem [resolvable:$true] %s364_s15 }
  0xaa   : > { %p6126_p5 = scmp.lt.u32.totalorder %s6119_s29, %s7218_s9 }
  0xab   : > { %p6122_p1 = pnand %p6120_p13, %p6367_p0 }
  0xad   : > { %p6123_p6 = pneg %p6122_p1 }
  0xaf   : > { %p6128_p9 = pnand %p6126_p5, %p6123_p6 }
  0xb1   : > { %6131 = shalt.err (!%p6128_p9)
}
  0xb2   : > { %s6132_s27 = scalar_lea.vmem %s365_s15, 16  ;;  %s6139_s19 = scalar_lea.vmem %s365_s15, 32 }
  0xb3   : > { %p6133_p10 = scmp.ne.s32.totalorder %s365_s15, %s6132_s27  ;;  %p6140_p4 = scmp.lt.s32.totalorder %s365_s15, %s365_s15 }
  0xb4   : > { %p6141_p7 = scmp.lt.s32.totalorder %s6139_s19, %s6132_s27 }
  0xb5   : > { %p6135_p2 = pnand %p6133_p10, %p6367_p0 }
  0xb6   : > { %p6142_p8 = por %p6141_p7, %p6140_p4 }
  0xb7   : > { %p6136_p3 = pneg %p6135_p2 }
  0xb9   : > { %p6143_p11 = pnand %p6142_p8, %p6136_p3 }
  0xbb   : > { %6146 = shalt.err (!%p6143_p11)
}
  0xbc   : > { %5883 = dma.hbm_to_vmem [thread:$0]  (!%p6351_p12), %s7218_s9, 16, %s365_s15, [#allocation14]  }
  0xbd   : > { %p7240_p13 = scmp.ne.s32.totalorder %s7235_s25, 0 }
  0xbe   : > { %p7241_p1 = scmp.eq.s32.totalorder (!%p7240_p13), %s6315_s17, 0 }
  0xbf   : > { %385 = sbr.rel (%p7240_p13) target bundleno = 2196 (0x894), region = 60 }
  0xc6   : > { %6192 = dma.done.wait (%p7241_p1), [#allocation5], 2048   ;;  %p7242_p0 = pmov %p7241_p1 }
  0xc8   : > { %6194 = vsyncadd (%p7242_p0), [#allocation5], 4294965248  ;;  %p7243_p6 = pmov %p7242_p0 }
  0xc9   : > { %p7244_p5 = pmov %p7242_p0 }
  0xca   : > { %6196 = dma.done.wait (%p7243_p6), [#allocation8], 73760  }
  0xcb   : > { %6198 = vsyncadd (%p7244_p5), [#allocation8], 4294893536  ;;  %p7245_p9 = pmov %p7242_p0 }
  0xcc   : > { %p7246_p12 = pmov %p7242_p0 }
  0xcd   : > { %6200 = dma.done.wait (%p7245_p9), [#allocation11], 73760  }
  0xce   : > { %6202 = vsyncadd (%p7246_p12), [#allocation11], 4294893536  ;;  %p7247_p10 = pmov %p7242_p0 }
  0xcf   : > { %p7248_p2 = pmov %p7242_p0 }
  0xd0   : > { %6204 = dma.done.wait (%p7247_p10), [#allocation14], 48  }
  0xd1   : > { %6206 = vsyncadd (%p7248_p2), [#allocation14], 4294967248  ;;  %v6236_v0 = vmov 0.0   ;;  %v6237_v1 = vmov 0   ;;  %v476_v2 = vld [vmem:[#allocation4 + $0x8] sm:$0xff]  ;;  %v478_v3 = vld [vmem:[#allocation4 + $0x18] sm:$0xff] }
  0xd2   : > { %580 = vmatprep.mubr.f32.mxu0 %v6236_v0  ;;  %451 = vst [vmem:[#allocation2] sm:$0xff] %v6236_v0  ;;  %452 = vst [vmem:[#allocation2 + $0x8] sm:$0xff] %v6236_v0  ;;  %5946 = vset.pattern.permute.xlu0 %v6237_v1  ;;  %v475_v4 = vld [vmem:[#allocation4] sm:$0xff]  ;;  %v4504_v5 = vpack.c.bf16 %v478_v3, %v476_v2  ;;  %v477_v6 = vld [vmem:[#allocation4 + $0x10] sm:$0xff]  ;;  %p446_p3 = scmp.lt.s32.totalorder %s6315_s17, 1  ;;  %vm503_vm4 = vcmask 523264  }
  0xd3   : > { %453 = vst [vmem:[#allocation2 + $0x10] sm:$0x1] %v6236_v0  ;;  %454 = vst [vmem:[#allocation2 + $0x18] sm:$0x1] %v6236_v0  ;;  %5947 = vset.pattern.permute.xlu1 %v6237_v1  ;;  %v480_v7 = vld [vmem:[#allocation4 + $0x28] sm:$0xff]  ;;  %v482_v8 = vld [vmem:[#allocation4 + $0x38] sm:$0xff]  ;;  %v4506_v9 = vpack.c.bf16 %v477_v6, %v475_v4 }
  0xd4   : > { %455 = vst [vmem:[#allocation3] sm:$0xff] %v6236_v0  ;;  %456 = vst [vmem:[#allocation3 + $0x8] sm:$0xff] %v6236_v0  ;;  %v4508_v10 = vpack.c.bf16 %v482_v8, %v480_v7  ;;  %v479_v11 = vld [vmem:[#allocation4 + $0x20] sm:$0xff]  ;;  %v481_v12 = vld [vmem:[#allocation4 + $0x30] sm:$0xff]  ;;  %4505 = vmatprep.subr.bf16.mxu0 %v4504_v5  ;;  %s6554_s25 = scalar_select %p446_p3, %s6315_s17, 1  ;;  %vm653_vm7 = vcmask 1040384  }
  0xd5   : > { %457 = vst [vmem:[#allocation3 + $0x10] sm:$0x1] %v6236_v0  ;;  %458 = vst [vmem:[#allocation3 + $0x18] sm:$0x1] %v6236_v0  ;;  %v484_v13 = vld [vmem:[#allocation4 + $0x48] sm:$0xff]  ;;  %v486_v14 = vld [vmem:[#allocation4 + $0x58] sm:$0xff]  ;;  %4507 = vmatpush1.bf16.msra.mxu0 %v4506_v9  ;;  %v4510_v15 = vpack.c.bf16 %v481_v12, %v479_v11 }
  0xd6   : > { %459 = vst [vmem:[#allocation2 + $0x50] sm:$0xfe] %v6236_v0  ;;  %460 = vst [vmem:[#allocation2 + $0x58] sm:$0xfe] %v6236_v0  ;;  %v483_v16 = vld [vmem:[#allocation4 + $0x40] sm:$0xff]  ;;  %v485_v17 = vld [vmem:[#allocation4 + $0x50] sm:$0xff]  ;;  %4509 = vmatprep.subr.bf16.mxu0 %v4508_v10  ;;  %v4512_v18 = vpack.c.bf16 %v486_v14, %v484_v13 }
  0xd7   : > { %461 = vst [vmem:[#allocation2 + $0x60] sm:$0xff] %v6236_v0  ;;  %462 = vst [vmem:[#allocation2 + $0x68] sm:$0xff] %v6236_v0  ;;  %v488_v19 = vld [vmem:[#allocation4 + $0x68] sm:$0xff]  ;;  %v490_v20 = vld [vmem:[#allocation4 + $0x78] sm:$0xff]  ;;  %v4514_v22 = vpack.c.bf16 %v485_v17, %v483_v16  ;;  %s4468_s12 = sshll.u32 %s6554_s25, 5  ;;  %vm839_vm10 = vcmask 1046528  }
  0xd8   : > { %463 = vst [vmem:[#allocation3 + $0x50] sm:$0xfe] %v6236_v0  ;;  %464 = vst [vmem:[#allocation3 + $0x58] sm:$0xfe] %v6236_v0  ;;  %v467_v21 = vld [vmem:[%s7210_s1] sm:$0xff]  ;;  %v489_v24 = vld [vmem:[#allocation4 + $0x70] sm:$0xff]  ;;  %v4516_v31 = vpack.c.bf16 %v490_v20, %v488_v19  ;;  %s6573_s21 = scalar_lea.vmem %s7209_s0, %s4468_s12 }
  0xd9   : > { %465 = vst [vmem:[#allocation3 + $0x60] sm:$0xff] %v6236_v0  ;;  %466 = vst [vmem:[#allocation3 + $0x68] sm:$0xff] %v6236_v0  ;;  %v487_v23 = vld [vmem:[#allocation4 + $0x60] sm:$0xff]  ;;  %vm613_vm0 = vcmp.gt.f32.partialorder %v467_v21, 0.0  ;;  %v468_v25 = vld [vmem:[%s7210_s1 + $0x8] sm:$0xff]  ;;  %4511 = vmatpush1.bf16.msra.mxu0 %v4510_v15  ;;  %vm1117_vm11 = vcmask 1045504  }
  0xda   : > { %v469_v26 = vld [vmem:[%s7210_s1 + $0x10] sm:$0xff]  ;;  %v470_v27 = vld [vmem:[%s7210_s1 + $0x18] sm:$0xff]  ;;  %v617_v28 = vsel %vm613_vm0, 1, %v6237_v1  ;;  %vm614_vm1 = vcmp.gt.f32.partialorder %v468_v25, 0.0  ;;  %4513 = vmatprep.subr.bf16.mxu0 %v4512_v18  ;;  %v765_v34 = vld [vmem:[#allocation9 + $0x200] sm:$0xff]  ;;  %v4518_v46 = vpack.c.bf16 %v489_v24, %v487_v23  ;;  %s444_s12 = sand.u32 1, %s6217_s14  }
  0xdb   : > { %vm615_vm2 = vcmp.gt.f32.partialorder %v469_v26, 0.0  ;;  %vm616_vm3 = vcmp.gt.f32.partialorder %v470_v27, 0.0  ;;  %v766_v29 = vld [vmem:[#allocation9 + $0x208] sm:$0xff]  ;;  %v768_v30 = vld [vmem:[#allocation9 + $0x218] sm:$0xff]  ;;  %622 = vperm.xlu0 %5946, %v617_v28   ;;  %v767_v35 = vld [vmem:[#allocation9 + $0x210] sm:$0xff]  ;;  %v618_v37 = vsel %vm614_vm1, 1, %v6237_v1 }
  0xdc   : > { %v619_v32 = vsel %vm615_vm2, 1, %v6237_v1  ;;  %v4520_v33 = vpack.c.bf16 %v768_v30, %v766_v29  ;;  %v770_v36 = vld [vmem:[#allocation9 + $0x228] sm:$0xff]  ;;  %v4522_v38 = vpack.c.bf16 %v767_v35, %v765_v34  ;;  %v772_v39 = vld [vmem:[#allocation9 + $0x238] sm:$0xff]  ;;  %v769_v40 = vld [vmem:[#allocation9 + $0x220] sm:$0xff]  ;;  %v620_v42 = vsel %vm616_vm3, 1, %v6237_v1  ;;  %s4465_s24 = sshll.u32 %s6315_s17, 4 }
  0xdd   : > { %628 = vperm.xlu1 %5947, %v619_v32   ;;  %v771_v41 = vld [vmem:[#allocation9 + $0x230] sm:$0xff]  ;;  %v4524_v43 = vpack.c.bf16 %v772_v39, %v770_v36  ;;  %v774_v44 = vld [vmem:[#allocation9 + $0x248] sm:$0xff]  ;;  %v776_v45 = vld [vmem:[#allocation9 + $0x258] sm:$0xff]  ;;  %4515 = vmatpush1.bf16.msra.mxu0 %v4514_v22  ;;  %s445_s22 = scalar_lea.vmem [#allocation16], %s444_s12  ;;  %vm4302_vm12 = vcmask 40960   ;;  %s7167_s11 = scalar_lea.hbm %s7219_s10, %s4465_s24 }
  0xde   : > { %4521 = vmatprep.subr.bf16.mxu1 %v4520_v33  ;;  %v4526_v47 = vpack.c.bf16 %v771_v41, %v769_v40  ;;  %4517 = vmatprep.subr.bf16.mxu0 %v4516_v31  ;;  %v4528_v48 = vpack.c.bf16 %v776_v45, %v774_v44  ;;  %v773_v49 = vld [vmem:[#allocation9 + $0x240] sm:$0xff]  ;;  %v775_v50 = vld [vmem:[#allocation9 + $0x250] sm:$0xff]  ;;  %v778_v51 = vld [vmem:[#allocation9 + $0x268] sm:$0xff]  ;;  %s4305_s20 = scalar_lea.sflag [#allocation6], %s444_s12  ;;  %p7249_p7 = scmp.ne.s32.totalorder %s7232_s23, 0 }
  0xdf   : > { %4523 = vmatpush1.bf16.msra.mxu1 %v4522_v38  ;;  %625 = vperm.xlu0 %5946, %v618_v37   ;;  %v780_v52 = vld [vmem:[#allocation9 + $0x278] sm:$0xff]  ;;  %v4530_v54 = vpack.c.bf16 %v775_v50, %v773_v49  ;;  %v777_v56 = vld [vmem:[#allocation9 + $0x260] sm:$0xff]  ;;  %v779_v57 = vld [vmem:[#allocation9 + $0x270] sm:$0xff]  ;;  %s6238_s17 = smov [#allocation16]  }
  0xe0   : > { %4525 = vmatprep.subr.bf16.mxu1 %v4524_v43  ;;  %v471_v53 = vld [vmem:[%s6573_s21] sm:$0xff]  ;;  %v4532_v55 = vpack.c.bf16 %v780_v52, %v778_v51  ;;  %v782_v58 = vld [vmem:[#allocation9 + $0x288] sm:$0xff]  ;;  %v4534_v61 = vpack.c.bf16 %v779_v57, %v777_v56  ;;  %v783_v1 = vld [vmem:[#allocation9 + $0x290] sm:$0xff]  ;;  %s6151_s30 = sshll.u32 %s6238_s17, 4  ;;  %s6152_s30 = int_to_ptr.vmem [resolvable:$false] %s6151_s30 }
  0xe1   : > { %631 = vperm.xlu1 %5947, %v620_v42   ;;  %4519 = vmatpush1.bf16.msra.mxu0 %v4518_v46  ;;  %v784_v59 = vld [vmem:[#allocation9 + $0x298] sm:$0xff]  ;;  %v472_v60 = vld [vmem:[%s6573_s21 + $0x8] sm:$0xff]  ;;  %v473_v4 = vld [vmem:[%s6573_s21 + $0x10] sm:$0xff]  ;;  %s6153_s28 = scalar_lea.vmem %s6152_s30, 32 }
  0xe2   : > { %v4536_v62 = vpack.c.bf16 %v784_v59, %v782_v58  ;;  %v781_v63 = vld [vmem:[#allocation9 + $0x280] sm:$0xff]  ;;  %v786_v2 = vld [vmem:[#allocation9 + $0x2a8] sm:$0xff]  ;;  %v788_v3 = vld [vmem:[#allocation9 + $0x2b8] sm:$0xff] }
  0xe3   : > { %4527 = vmatpush1.bf16.msra.mxu1 %v4526_v47  ;;  %v4538_v5 = vpack.c.bf16 %v783_v1, %v781_v63  ;;  %v4540_v6 = vpack.c.bf16 %v788_v3, %v786_v2  ;;  %v785_v7 = vld [vmem:[#allocation9 + $0x2a0] sm:$0xff]  ;;  %v787_v8 = vld [vmem:[#allocation9 + $0x2b0] sm:$0xff]  ;;  %v790_v9 = vld [vmem:[#allocation9 + $0x2c8] sm:$0xff] }
  0xe4   : > { %4529 = vmatprep.subr.bf16.mxu1 %v4528_v48  ;;  %4461 = vmatmul.mubr.msk.f32.vlgmr.msra.gmra.mrb[0].mxu0 %vm503_vm4, %v471_v53  ;;  %v792_v10 = vld [vmem:[#allocation9 + $0x2d8] sm:$0xff]  ;;  %v4542_v12 = vpack.c.bf16 %v787_v8, %v785_v7  ;;  %v789_v14 = vld [vmem:[#allocation9 + $0x2c0] sm:$0xff]  ;;  %v791_v15 = vld [vmem:[#allocation9 + $0x2d0] sm:$0xff] }
  0xe5   : > { %586 = vmatprep.mubr.f32.mxu0 %v6236_v0  ;;  %v474_v11 = vld [vmem:[%s6573_s21 + $0x18] sm:$0xff]  ;;  %v4544_v13 = vpack.c.bf16 %v792_v10, %v790_v9  ;;  %v794_v16 = vld [vmem:[#allocation9 + $0x2e8] sm:$0xff]  ;;  %v4546_v18 = vpack.c.bf16 %v791_v15, %v789_v14  ;;  %v793_v20 = vld [vmem:[#allocation9 + $0x2e0] sm:$0xff]  ;;  %s4317_s21 = sshll.u32 %s445_s22, 4  ;;  %s7169_s21 = int_to_ptr.vmem [resolvable:$true] %s4317_s21 }
  0xe6   : > { %v796_v17 = vld [vmem:[#allocation9 + $0x2f8] sm:$0xff]  ;;  %v795_v21 = vld [vmem:[#allocation9 + $0x2f0] sm:$0xff]  ;;  %v798_v22 = vld [vmem:[#allocation9 + $0x308] sm:$0xff]  ;;  %s6147_s25 = scalar_lea.vmem %s7169_s21, 16  ;;  %p6154_p13 = scmp.lt.s32.totalorder %s7169_s21, %s6152_s30 }
  0xe7   : > { %4531 = vmatpush1.bf16.msra.mxu1 %v4530_v54  ;;  %v4548_v19 = vpack.c.bf16 %v796_v17, %v794_v16  ;;  %v800_v23 = vld [vmem:[#allocation9 + $0x318] sm:$0xff]  ;;  %v4550_v24 = vpack.c.bf16 %v795_v21, %v793_v20  ;;  %v797_v26 = vld [vmem:[#allocation9 + $0x300] sm:$0xff]  ;;  %v799_v27 = vld [vmem:[#allocation9 + $0x310] sm:$0xff]  ;;  %p6148_p4 = scmp.ne.s32.totalorder %s7169_s21, %s6147_s25  ;;  %p6155_p1 = scmp.lt.s32.totalorder %s6153_s28, %s6147_s25 }
  0xe8   : > { %4533 = vmatprep.subr.bf16.mxu1 %v4532_v55  ;;  %4462 = vmatmul.mubr.msk.f32.gmra.mrb[2].mxu0 %vm503_vm4, %v472_v60  ;;  %v4552_v25 = vpack.c.bf16 %v800_v23, %v798_v22  ;;  %v802_v28 = vld [vmem:[#allocation9 + $0x328] sm:$0xff]  ;;  %v804_v29 = vld [vmem:[#allocation9 + $0x338] sm:$0xff]  ;;  %v4554_v30 = vpack.c.bf16 %v799_v27, %v797_v26  ;;  %v801_v32 = vld [vmem:[#allocation9 + $0x320] sm:$0xff] }
  0xe9   : > { %592 = vmatprep.mubr.f32.mxu0 %v6236_v0  ;;  %v4556_v31 = vpack.c.bf16 %v804_v29, %v802_v28  ;;  %v803_v33 = vld [vmem:[#allocation9 + $0x330] sm:$0xff]  ;;  %v806_v34 = vld [vmem:[#allocation9 + $0x348] sm:$0xff]  ;;  %v808_v35 = vld [vmem:[#allocation9 + $0x358] sm:$0xff]  ;;  %p6149_p8 = pnand %p6148_p4, %p7249_p7  ;;  %p6156_p0 = por %p6155_p1, %p6154_p13 }
  0xea   : > { %v4558_v36 = vpack.c.bf16 %v803_v33, %v801_v32  ;;  %v4560_v37 = vpack.c.bf16 %v808_v35, %v806_v34  ;;  %v805_v38 = vld [vmem:[#allocation9 + $0x340] sm:$0xff]  ;;  %v807_v39 = vld [vmem:[#allocation9 + $0x350] sm:$0xff]  ;;  %v810_v41 = vld [vmem:[#allocation9 + $0x368] sm:$0xff] }
  0xeb   : > { %4535 = vmatpush1.bf16.msra.mxu1 %v4534_v61  ;;  %v4562_v40 = vpack.c.bf16 %v807_v39, %v805_v38  ;;  %v812_v42 = vld [vmem:[#allocation9 + $0x378] sm:$0xff]  ;;  %v809_v44 = vld [vmem:[#allocation9 + $0x360] sm:$0xff]  ;;  %v811_v45 = vld [vmem:[#allocation9 + $0x370] sm:$0xff]  ;;  %p6150_p11 = pneg %p6149_p8 }
  0xec   : > { %4537 = vmatprep.subr.bf16.mxu1 %v4536_v62  ;;  %4463 = vmatmul.mubr.msk.f32.gmra.mrb[4].mxu0 %vm503_vm4, %v473_v4  ;;  %v4564_v43 = vpack.c.bf16 %v812_v42, %v810_v41  ;;  %v4566_v46 = vpack.c.bf16 %v811_v45, %v809_v44  ;;  %v814_v47 = vld [vmem:[#allocation9 + $0x388] sm:$0xff]  ;;  %v816_v48 = vld [vmem:[#allocation9 + $0x398] sm:$0xff]  ;;  %v813_v50 = vld [vmem:[#allocation9 + $0x380] sm:$0xff] }
  0xed   : > { %598 = vmatprep.mubr.f32.mxu0 %v6236_v0  ;;  %v4568_v49 = vpack.c.bf16 %v816_v48, %v814_v47  ;;  %v815_v51 = vld [vmem:[#allocation9 + $0x390] sm:$0xff]  ;;  %v818_v53 = vld [vmem:[#allocation9 + $0x3a8] sm:$0xff]  ;;  %v820_v54 = vld [vmem:[#allocation9 + $0x3b8] sm:$0xff]  ;;  %p6157_p6 = pnand %p6156_p0, %p6150_p11 }
  0xee   : > { %v4570_v52 = vpack.c.bf16 %v815_v51, %v813_v50  ;;  %v4572_v55 = vpack.c.bf16 %v820_v54, %v818_v53  ;;  %v817_v56 = vld [vmem:[#allocation9 + $0x3a0] sm:$0xff]  ;;  %v819_v57 = vld [vmem:[#allocation9 + $0x3b0] sm:$0xff]  ;;  %v822_v59 = vld [vmem:[#allocation9 + $0x3c8] sm:$0xff] }
  0xef   : > { %4539 = vmatpush1.bf16.msra.mxu1 %v4538_v5  ;;  %v4574_v58 = vpack.c.bf16 %v819_v57, %v817_v56  ;;  %v824_v60 = vld [vmem:[#allocation9 + $0x3d8] sm:$0xff]  ;;  %v821_v62 = vld [vmem:[#allocation9 + $0x3c0] sm:$0xff]  ;;  %v823_v63 = vld [vmem:[#allocation9 + $0x3d0] sm:$0xff] }
  0xf0   : > { %4541 = vmatprep.subr.bf16.mxu1 %v4540_v6  ;;  %4464 = vmatmul.mubr.msk.f32.gmra.mrb[6].mxu0 %vm503_vm4, %v474_v11  ;;  %v4576_v61 = vpack.c.bf16 %v824_v60, %v822_v59  ;;  %v4578_v1 = vpack.c.bf16 %v823_v63, %v821_v62  ;;  %v826_v2 = vld [vmem:[#allocation9 + $0x3e8] sm:$0xff]  ;;  %v828_v3 = vld [vmem:[#allocation9 + $0x3f8] sm:$0xff]  ;;  %v825_v5 = vld [vmem:[#allocation9 + $0x3e0] sm:$0xff]  ;;  %v493_v11 = vlaneseq }
  0xf1   : > { %v4580_v4 = vpack.c.bf16 %v828_v3, %v826_v2  ;;  %v827_v6 = vld [vmem:[#allocation9 + $0x3f0] sm:$0xff]  ;;  %v697_v8 = vld [vmem:[#allocation9 + $0x8] sm:$0xff]  ;;  %v699_v9 = vld [vmem:[#allocation9 + $0x18] sm:$0xff] }
  0xf2   : > { %v4582_v7 = vpack.c.bf16 %v827_v6, %v825_v5  ;;  %v4584_v10 = vpack.c.bf16 %v699_v9, %v697_v8  ;;  %v491_v14 = vld [vmem:[#allocation7] sm:$0x3]  ;;  %v761_v51 = vld [vmem:[#allocation2 + $0x8] sm:$0xfe]  ;;  %v698_v2 = vld [vmem:[#allocation9 + $0x10] sm:$0xff] }
  0xf3   : > { %4543 = vmatpush1.bf16.msra.mxu1 %v4542_v12  ;;  %v494_v12 = vshrl.u32 %v493_v11, 7  ;;  %v760_v44 = vld [vmem:[#allocation2] sm:$0xfe]  ;;  %v843_v62 = vrot.slane %v761_v51, 1  ;;  %v713_v51 = vld [vmem:[#allocation9 + $0x88] sm:$0xff] }
  0xf4   : > { %4545 = vmatprep.subr.bf16.mxu1 %v4544_v13  ;;  %v840_v56 = vrot.slane %v760_v44, 1  ;;  %v703_v8 = vld [vmem:[#allocation9 + $0x38] sm:$0xff] }
  0xf5   : > { %v6586_v13 = vsub.s32 0, %v494_v12  ;;  %v6588_v15 = vsub.s32 1, %v494_v12 }
  0xf7   : > { %4547 = vmatpush1.bf16.msra.mxu1 %v4546_v18  ;;  %v496_v16 = vrot.slane %v491_v14, %v6586_v13  ;;  %v500_v17 = vrot.slane %v491_v14, %v6588_v15 }
  0xf8   : > { %4549 = vmatprep.subr.bf16.mxu1 %v4548_v19 }
  0xfb   : > { %4551 = vmatpush1.bf16.msra.mxu1 %v4550_v24 }
  0xfc   : > { %4553 = vmatprep.subr.bf16.mxu1 %v4552_v25 }
  0xff   : > { %4555 = vmatpush1.bf16.msra.mxu1 %v4554_v30 }
 0x100   : > { %4557 = vmatprep.subr.bf16.mxu1 %v4556_v31 }
 0x103   : > { %4559 = vmatpush1.bf16.msra.mxu1 %v4558_v36 }
 0x104   : > { %4561 = vmatprep.subr.bf16.mxu1 %v4560_v37 }
 0x107   : > { %4563 = vmatpush1.bf16.msra.mxu1 %v4562_v40 }
 0x108   : > { %4565 = vmatprep.subr.bf16.mxu1 %v4564_v43 }
 0x10b   : > { %4567 = vmatpush1.bf16.msra.mxu1 %v4566_v46 }
 0x10c   : > { %4569 = vmatprep.subr.bf16.mxu1 %v4568_v49 }
 0x10f   : > { %4571 = vmatpush1.bf16.msra.mxu1 %v4570_v52 }
 0x110   : > { %4573 = vmatprep.subr.bf16.mxu1 %v4572_v55 }
 0x113   : > { %4575 = vmatpush1.bf16.msra.mxu1 %v4574_v58 }
 0x114   : > { %4577 = vmatprep.subr.bf16.mxu1 %v4576_v61 }
 0x117   : > { %4579 = vmatpush1.bf16.msra.mxu1 %v4578_v1  ;;  %v696_v1 = vld [vmem:[#allocation9] sm:$0xff] }
 0x118   : > { %4581 = vmatprep.subr.bf16.mxu1 %v4580_v4 }
 0x11b   : > { %4583 = vmatpush1.bf16.msra.mxu1 %v4582_v7  ;;  %v701_v7 = vld [vmem:[#allocation9 + $0x28] sm:$0xff] }
 0x11c   : > { %4585 = vmatprep.subr.bf16.mxu1 %v4584_v10 }
 0x15a   : > { %v6592_v18 = vpop.permute.xlu0 %622 }
 0x15b   : > { %vm633_vm5 = vcmp.eq.s32.totalorder %v6592_v18, 1 }
 0x15c   : > { %v6595_v26 = vpop.permute.xlu1 %628 }
 0x15d   : > { %vm635_vm8 = vcmp.eq.s32.totalorder %v6595_v26, 1 }
 0x15e   : > { %v6599_v29 = vpop.permute.xlu0 %625 }
 0x15f   : > { %vm634_vm6 = vcmp.eq.s32.totalorder %v6599_v29, 1 }
 0x160   : > { %v6609_v47 = vpop.permute.xlu1 %631 }
 0x161   : > { %vm636_vm9 = vcmp.eq.s32.totalorder %v6609_v47, 1 }
 0x1b7   : > { %v582_v19 = vpop.f32.mrb[0].mxu0 }
 0x1b8   : > { %v583_v20 = vadd.f32 %v582_v19, %v496_v16  ;;  %v584_v21 = vpop.f32.mrb[1].mxu0 }
 0x1b9   : > { %v585_v22 = vadd.f32 %v584_v21, %v500_v17 }
 0x1ba   : > { %v605_v23 = vmax.f32 %v583_v20, 0.0  ;;  %v4588_v20 = vpack.c.bf16 %v703_v8, %v701_v7  ;;  %v716_v7 = vld [vmem:[#allocation9 + $0xa0] sm:$0xff]  ;;  %v718_v8 = vld [vmem:[#allocation9 + $0xb0] sm:$0xff] }
 0x1bb   : > { %v606_v24 = vmax.f32 %v585_v22, 0.0  ;;  %v588_v25 = vpop.f32.mrb[2].mxu0  ;;  %v700_v22 = vld [vmem:[#allocation9 + $0x20] sm:$0xff] }
 0x1bc   : > { %v637_v27 = vsel %vm633_vm5, %v605_v23, 0.0  ;;  %v589_v28 = vadd.f32 %v588_v25, %v496_v16  ;;  %v590_v30 = vpop.f32.mrb[3].mxu0  ;;  %v702_v23 = vld [vmem:[#allocation9 + $0x30] sm:$0xff] }
 0x1bd   : > { %v654_v31 = vrot.slane %v637_v27, 7  ;;  %v638_v32 = vsel %vm633_vm5, %v606_v24, 0.0  ;;  %v591_v33 = vadd.f32 %v590_v30, %v500_v17  ;;  %v705_v27 = vld [vmem:[#allocation9 + $0x48] sm:$0xff] }
 0x1be   : > { %v655_v34 = vrot.slane %v638_v32, 7  ;;  %v607_v35 = vmax.f32 %v589_v28, 0.0  ;;  %v707_v28 = vld [vmem:[#allocation9 + $0x58] sm:$0xff] }
 0x1bf   : > { %678 = vst [vmem:[#allocation2 + $0x10] sm:$0xfe] %v654_v31  ;;  %v608_v36 = vmax.f32 %v591_v33, 0.0  ;;  %v594_v37 = vpop.f32.mrb[4].mxu0  ;;  %v4590_v33 = vpack.c.bf16 %v702_v23, %v700_v22  ;;  %v724_v23 = vld [vmem:[#allocation9 + $0xe0] sm:$0xff] }
 0x1c0   : > { %679 = vst [vmem:[#allocation2 + $0x18] sm:$0xfe] %v655_v34  ;;  %v639_v38 = vsel %vm634_vm6, %v607_v35, 0.0  ;;  %v595_v39 = vadd.f32 %v594_v37, %v496_v16  ;;  %v596_v40 = vpop.f32.mrb[5].mxu0  ;;  %v4592_v35 = vpack.c.bf16 %v707_v28, %v705_v27  ;;  %v706_v37 = vld [vmem:[#allocation9 + $0x50] sm:$0xff]  ;;  %v729_v27 = vld [vmem:[#allocation9 + $0x108] sm:$0xff] }
 0x1c1   : > { %v656_v41 = vrot.slane %v639_v38, 7  ;;  %v640_v42 = vsel %vm634_vm6, %v608_v36, 0.0  ;;  %v597_v43 = vadd.f32 %v596_v40, %v500_v17  ;;  %v704_v36 = vld [vmem:[#allocation9 + $0x40] sm:$0xff]  ;;  %v709_v40 = vld [vmem:[#allocation9 + $0x68] sm:$0xff]  ;;  %v731_v28 = vld [vmem:[#allocation9 + $0x118] sm:$0xff] }
 0x1c2   : > { %v658_v45 = vrot.slane %v640_v42, 7  ;;  %v609_v46 = vmax.f32 %v595_v39, 0.0 }
 0x1c3   : > { %v6612_v48 = vsel %vm653_vm7, %v654_v31, %v656_v41  ;;  %v610_v49 = vmax.f32 %v597_v43, 0.0  ;;  %v600_v50 = vpop.f32.mrb[6].mxu0  ;;  %v4594_v43 = vpack.c.bf16 %v706_v37, %v704_v36  ;;  %v735_v36 = vld [vmem:[#allocation9 + $0x138] sm:$0xff] }
 0x1c4   : > { %680 = vst [vmem:[#allocation2 + $0x20] sm:$0xff] %v6612_v48  ;;  %v6616_v52 = vsel %vm653_vm7, %v655_v34, %v658_v45  ;;  %v641_v53 = vsel %vm635_vm8, %v609_v46, 0.0  ;;  %v601_v54 = vadd.f32 %v600_v50, %v496_v16  ;;  %v602_v55 = vpop.f32.mrb[7].mxu0  ;;  %v4586_v16 = vpack.c.bf16 %v698_v2, %v696_v1  ;;  %v710_v46 = vld [vmem:[#allocation9 + $0x70] sm:$0xff]  ;;  %v719_v1 = vld [vmem:[#allocation9 + $0xb8] sm:$0xff] }
 0x1c5   : > { %681 = vst [vmem:[#allocation2 + $0x28] sm:$0xff] %v6616_v52  ;;  %v642_v57 = vsel %vm635_vm8, %v610_v49, 0.0  ;;  %v660_v58 = vrot.slane %v641_v53, 7  ;;  %v603_v59 = vadd.f32 %v602_v55, %v500_v17  ;;  %v848_v21 = vrot.slane %v6616_v52, 1  ;;  %v715_v53 = vld [vmem:[#allocation9 + $0x98] sm:$0xff] }
 0x1c6   : > { %v662_v60 = vrot.slane %v642_v57, 7  ;;  %v611_v61 = vmax.f32 %v601_v54, 0.0  ;;  %v6624_v63 = vld [vmem:[#allocation2 + $0x10] sm:$0xff]  ;;  %v846_v34 = vrot.slane %v6612_v48, 1 }
 0x1c7   : > { %v6627_v3 = vsel %vm653_vm7, %v656_v41, %v660_v58  ;;  %v612_v4 = vmax.f32 %v603_v59, 0.0  ;;  %v6629_v5 = vld [vmem:[#allocation2 + $0x18] sm:$0xff]  ;;  %v841_v6 = vrot.slane %v6624_v63, 1  ;;  %v712_v59 = vld [vmem:[#allocation9 + $0x80] sm:$0xff] }
 0x1c8   : > { %v6633_v9 = vsel %vm653_vm7, %v658_v45, %v662_v60  ;;  %682 = vst [vmem:[#allocation2 + $0x30] sm:$0xff] %v6627_v3  ;;  %v643_v10 = vsel %vm636_vm9, %v611_v61, 0.0  ;;  %v844_v11 = vrot.slane %v6629_v5, 1  ;;  %v850_v39 = vrot.slane %v6627_v3, 1  ;;  %v711_v41 = vld [vmem:[#allocation9 + $0x78] sm:$0xff]  ;;  %v708_v45 = vld [vmem:[#allocation9 + $0x60] sm:$0xff] }
 0x1c9   : > { %683 = vst [vmem:[#allocation2 + $0x38] sm:$0xff] %v6633_v9  ;;  %v644_v12 = vsel %vm636_vm9, %v612_v4, 0.0  ;;  %v664_v14 = vrot.slane %v643_v10, 7  ;;  %v842_v25 = vsel %vm839_vm10, %v840_v56, %v841_v6  ;;  %v852_v32 = vrot.slane %v6633_v9, 1  ;;  %v721_v10 = vld [vmem:[#allocation9 + $0xc8] sm:$0xff] }
 0x1ca   : > { %v666_v17 = vrot.slane %v644_v12, 7  ;;  %v845_v19 = vsel %vm839_vm10, %v843_v62, %v844_v11  ;;  %v849_v31 = vsel %vm839_vm10, %v844_v11, %v848_v21  ;;  %v847_v38 = vsel %vm839_vm10, %v841_v6, %v846_v34  ;;  %v717_v62 = vld [vmem:[#allocation9 + $0xa8] sm:$0xff]  ;;  %v723_v11 = vld [vmem:[#allocation9 + $0xd8] sm:$0xff] }
 0x1cb   : > { %v6645_v24 = vsel %vm653_vm7, %v660_v58, %v664_v14  ;;  %686 = vst [vmem:[#allocation2 + $0x50] sm:$0x1] %v664_v14  ;;  %930 = vmatprep.mubr.f32.mxu1 %v845_v19  ;;  %v853_v42 = vsel %vm839_vm10, %v848_v21, %v852_v32  ;;  %v4596_v44 = vpack.c.bf16 %v711_v41, %v709_v40  ;;  %v725_v19 = vld [vmem:[#allocation9 + $0xe8] sm:$0xff]  ;;  %v734_v40 = vld [vmem:[#allocation9 + $0x130] sm:$0xff] }
 0x1cc   : > { %v6649_v30 = vsel %vm653_vm7, %v662_v60, %v666_v17  ;;  %684 = vst [vmem:[#allocation2 + $0x40] sm:$0xff] %v6645_v24  ;;  %687 = vst [vmem:[#allocation2 + $0x58] sm:$0x1] %v666_v17  ;;  %931 = vmatmul.mubr.f32.vlgmr.msra.gmra.mrb[0].mxu1 %v842_v25  ;;  %v851_v49 = vsel %vm839_vm10, %v846_v34, %v850_v39  ;;  %v4598_v56 = vpack.c.bf16 %v710_v46, %v708_v45  ;;  %v714_v60 = vld [vmem:[#allocation9 + $0x90] sm:$0xff]  ;;  %v737_v41 = vld [vmem:[#allocation9 + $0x148] sm:$0xff] }
 0x1cd   : > { %685 = vst [vmem:[#allocation2 + $0x48] sm:$0xff] %v6649_v30  ;;  %4587 = vmatpush1.bf16.msra.mxu1 %v4586_v16  ;;  %936 = vmatprep.mubr.f32.mxu1 %v849_v31  ;;  %v4600_v58 = vpack.c.bf16 %v715_v53, %v713_v51  ;;  %v4602_v4 = vpack.c.bf16 %v714_v60, %v712_v59  ;;  %v720_v16 = vld [vmem:[#allocation9 + $0xc0] sm:$0xff]  ;;  %v722_v17 = vld [vmem:[#allocation9 + $0xd0] sm:$0xff] }
 0x1ce   : > { %4589 = vmatprep.subr.bf16.mxu1 %v4588_v20  ;;  %v4604_v6 = vpack.c.bf16 %v719_v1, %v717_v62  ;;  %v4606_v12 = vpack.c.bf16 %v718_v8, %v716_v7  ;;  %v4608_v14 = vpack.c.bf16 %v723_v11, %v721_v10  ;;  %v727_v20 = vld [vmem:[#allocation9 + $0xf8] sm:$0xff]  ;;  %v4610_v21 = vpack.c.bf16 %v722_v17, %v720_v16  ;;  %v726_v25 = vld [vmem:[#allocation9 + $0xf0] sm:$0xff]  ;;  %v736_v45 = vld [vmem:[#allocation9 + $0x140] sm:$0xff] }
 0x1cf   : > { %v4612_v22 = vpack.c.bf16 %v727_v20, %v725_v19  ;;  %v4614_v31 = vpack.c.bf16 %v726_v25, %v724_v23  ;;  %v730_v34 = vld [vmem:[#allocation9 + $0x110] sm:$0xff]  ;;  %v744_v60 = vld [vmem:[#allocation9 + $0x180] sm:$0xff]  ;;  %v749_v62 = vld [vmem:[#allocation9 + $0x1a8] sm:$0xff] }
 0x1d0   : > { %937 = vmatmul.mubr.f32.gmra.mrb[2].mxu1 %v847_v38  ;;  %v738_v46 = vld [vmem:[#allocation9 + $0x150] sm:$0xff]  ;;  %v751_v1 = vld [vmem:[#allocation9 + $0x1b8] sm:$0xff]  ;;  %v753_v8 = vld [vmem:[#allocation9 + $0x1c8] sm:$0xff] }
 0x1d1   : > { %4591 = vmatpush1.bf16.msra.mxu1 %v4590_v33  ;;  %942 = vmatprep.mubr.f32.mxu1 %v853_v42  ;;  %v728_v33 = vld [vmem:[#allocation9 + $0x100] sm:$0xff]  ;;  %v739_v42 = vld [vmem:[#allocation9 + $0x158] sm:$0xff]  ;;  %v4626_v51 = vpack.c.bf16 %v738_v46, %v736_v45  ;;  %v750_v7 = vld [vmem:[#allocation9 + $0x1b0] sm:$0xff] }
 0x1d2   : > { %4593 = vmatprep.subr.bf16.mxu1 %v4592_v35  ;;  %v733_v35 = vld [vmem:[#allocation9 + $0x128] sm:$0xff]  ;;  %v4618_v37 = vpack.c.bf16 %v730_v34, %v728_v33  ;;  %v755_v10 = vld [vmem:[#allocation9 + $0x1d8] sm:$0xff]  ;;  %v754_v16 = vld [vmem:[#allocation9 + $0x1d0] sm:$0xff] }
 0x1d3   : > { %v762_v50 = vld [vmem:[#allocation2 + $0x40] sm:$0x1]  ;;  %v4620_v38 = vpack.c.bf16 %v735_v36, %v733_v35  ;;  %v757_v17 = vld [vmem:[#allocation9 + $0x1e8] sm:$0xff]  ;;  %v758_v23 = vld [vmem:[#allocation9 + $0x1f0] sm:$0xff] }
 0x1d4   : > { %943 = vmatmul.mubr.f32.gmra.mrb[4].mxu1 %v851_v49  ;;  %v763_v54 = vld [vmem:[#allocation2 + $0x48] sm:$0x1]  ;;  %v854_v57 = vrot.slane %v762_v50, 1  ;;  %v741_v49 = vld [vmem:[#allocation9 + $0x168] sm:$0xff]  ;;  %v743_v50 = vld [vmem:[#allocation9 + $0x178] sm:$0xff] }
 0x1d5   : > { %4595 = vmatpush1.bf16.msra.mxu1 %v4594_v43  ;;  %v856_v55 = vrot.slane %v763_v54, 1  ;;  %v4628_v53 = vpack.c.bf16 %v743_v50, %v741_v49  ;;  %v740_v54 = vld [vmem:[#allocation9 + $0x160] sm:$0xff]  ;;  %v759_v19 = vld [vmem:[#allocation9 + $0x1f8] sm:$0xff]  ;;  %v1050_v25 = vld [vmem:[#allocation9 + $0x408] sm:$0xff] }
 0x1d6   : > { %4597 = vmatprep.subr.bf16.mxu1 %v4596_v44  ;;  %v855_v2 = vsel %vm839_vm10, %v850_v39, %v854_v57  ;;  %v732_v39 = vld [vmem:[#allocation9 + $0x120] sm:$0xff]  ;;  %v4624_v44 = vpack.c.bf16 %v739_v42, %v737_v41  ;;  %v747_v57 = vld [vmem:[#allocation9 + $0x198] sm:$0xff]  ;;  %v1051_v33 = vld [vmem:[#allocation9 + $0x410] sm:$0xff] }
 0x1d7   : > { %v857_v61 = vsel %vm839_vm10, %v852_v32, %v856_v55  ;;  %v4616_v32 = vpack.c.bf16 %v731_v28, %v729_v27  ;;  %v4622_v43 = vpack.c.bf16 %v734_v40, %v732_v39  ;;  %v742_v55 = vld [vmem:[#allocation9 + $0x170] sm:$0xff]  ;;  %v1052_v27 = vld [vmem:[#allocation9 + $0x418] sm:$0xff]  ;;  %v1054_v34 = vld [vmem:[#allocation9 + $0x428] sm:$0xff] }
 0x1d8   : > { %948 = vmatprep.mubr.f32.mxu1 %v857_v61  ;;  %v746_v61 = vld [vmem:[#allocation9 + $0x190] sm:$0xff]  ;;  %v1056_v35 = vld [vmem:[#allocation9 + $0x438] sm:$0xff]  ;;  %v1058_v40 = vld [vmem:[#allocation9 + $0x448] sm:$0xff] }
 0x1d9   : > { %4599 = vmatpush1.bf16.msra.mxu1 %v4598_v56  ;;  %v745_v56 = vld [vmem:[#allocation9 + $0x188] sm:$0xff]  ;;  %v1055_v39 = vld [vmem:[#allocation9 + $0x430] sm:$0xff]  ;;  %v1060_v41 = vld [vmem:[#allocation9 + $0x458] sm:$0xff] }
 0x1da   : > { %949 = vmatmul.mubr.f32.gmra.mrb[6].mxu1 %v855_v2  ;;  %4601 = vmatprep.subr.bf16.mxu1 %v4600_v58  ;;  %v4630_v58 = vpack.c.bf16 %v742_v55, %v740_v54  ;;  %v4632_v59 = vpack.c.bf16 %v747_v57, %v745_v56  ;;  %v4634_v2 = vpack.c.bf16 %v746_v61, %v744_v60  ;;  %v1059_v45 = vld [vmem:[#allocation9 + $0x450] sm:$0xff]  ;;  %v1062_v46 = vld [vmem:[#allocation9 + $0x468] sm:$0xff]  ;;  %v1064_v49 = vld [vmem:[#allocation9 + $0x478] sm:$0xff] }
 0x1db   : > { %1019 = vmatprep.mubr.f32.mxu1 %v6236_v0  ;;  %v1063_v54 = vld [vmem:[#allocation9 + $0x470] sm:$0xff]  ;;  %v1066_v55 = vld [vmem:[#allocation9 + $0x488] sm:$0xff]  ;;  %v1068_v56 = vld [vmem:[#allocation9 + $0x498] sm:$0xff] }
 0x1dc   : > { %v4664_v60 = vpack.c.bf16 %v1068_v56, %v1066_v55  ;;  %v1065_v61 = vld [vmem:[#allocation9 + $0x480] sm:$0xff]  ;;  %v1095_v55 = vld [vmem:[#allocation9 + $0x570] sm:$0xff]  ;;  %v1098_v56 = vld [vmem:[#allocation9 + $0x588] sm:$0xff] }
 0x1dd   : > { %4603 = vmatpush1.bf16.msra.mxu1 %v4602_v4  ;;  %v4636_v4 = vpack.c.bf16 %v751_v1, %v749_v62  ;;  %v1067_v62 = vld [vmem:[#allocation9 + $0x490] sm:$0xff]  ;;  %v1070_v1 = vld [vmem:[#allocation9 + $0x4a8] sm:$0xff] }
 0x1de   : > { %4605 = vmatprep.subr.bf16.mxu1 %v4604_v6  ;;  %v748_v6 = vld [vmem:[#allocation9 + $0x1a0] sm:$0xff] }
 0x1df   : > { %v4638_v11 = vpack.c.bf16 %v750_v7, %v748_v6  ;;  %v4666_v6 = vpack.c.bf16 %v1067_v62, %v1065_v61  ;;  %v1097_v61 = vld [vmem:[#allocation9 + $0x580] sm:$0xff]  ;;  %v1099_v62 = vld [vmem:[#allocation9 + $0x590] sm:$0xff] }
 0x1e1   : > { %4607 = vmatpush1.bf16.msra.mxu1 %v4606_v12  ;;  %v4640_v12 = vpack.c.bf16 %v755_v10, %v753_v8  ;;  %v1069_v8 = vld [vmem:[#allocation9 + $0x4a0] sm:$0xff]  ;;  %v1071_v10 = vld [vmem:[#allocation9 + $0x4b0] sm:$0xff] }
 0x1e2   : > { %4609 = vmatprep.subr.bf16.mxu1 %v4608_v14  ;;  %v752_v14 = vld [vmem:[#allocation9 + $0x1c0] sm:$0xff] }
 0x1e3   : > { %v4642_v20 = vpack.c.bf16 %v754_v16, %v752_v14  ;;  %v4670_v14 = vpack.c.bf16 %v1071_v10, %v1069_v8  ;;  %v1103_v8 = vld [vmem:[#allocation9 + $0x5b0] sm:$0xff]  ;;  %v1106_v10 = vld [vmem:[#allocation9 + $0x5c8] sm:$0xff] }
 0x1e5   : > { %4611 = vmatpush1.bf16.msra.mxu1 %v4610_v21  ;;  %v4644_v21 = vpack.c.bf16 %v759_v19, %v757_v17  ;;  %v1073_v17 = vld [vmem:[#allocation9 + $0x4c0] sm:$0xff]  ;;  %v1075_v19 = vld [vmem:[#allocation9 + $0x4d0] sm:$0xff] }
 0x1e6   : > { %4613 = vmatprep.subr.bf16.mxu1 %v4612_v22  ;;  %v756_v22 = vld [vmem:[#allocation9 + $0x1e0] sm:$0xff] }
 0x1e7   : > { %v4646_v28 = vpack.c.bf16 %v758_v23, %v756_v22  ;;  %v4674_v22 = vpack.c.bf16 %v1075_v19, %v1073_v17  ;;  %v1107_v17 = vld [vmem:[#allocation9 + $0x5d0] sm:$0xff]  ;;  %v1110_v19 = vld [vmem:[#allocation9 + $0x5e8] sm:$0xff] }
 0x1e9   : > { %4615 = vmatpush1.bf16.msra.mxu1 %v4614_v31  ;;  %v4648_v31 = vpack.c.bf16 %v1052_v27, %v1050_v25  ;;  %v1077_v25 = vld [vmem:[#allocation9 + $0x4e0] sm:$0xff]  ;;  %v1079_v27 = vld [vmem:[#allocation9 + $0x4f0] sm:$0xff] }
 0x1ea   : > { %4617 = vmatprep.subr.bf16.mxu1 %v4616_v32  ;;  %v1049_v32 = vld [vmem:[#allocation9 + $0x400] sm:$0xff] }
 0x1eb   : > { %v4650_v36 = vpack.c.bf16 %v1051_v33, %v1049_v32  ;;  %v4678_v32 = vpack.c.bf16 %v1079_v27, %v1077_v25  ;;  %v1111_v25 = vld [vmem:[#allocation9 + $0x5f0] sm:$0xff]  ;;  %v1245_v27 = vld [vmem:[#allocation9 + $0x608] sm:$0xff] }
 0x1ed   : > { %4619 = vmatpush1.bf16.msra.mxu1 %v4618_v37  ;;  %v4652_v37 = vpack.c.bf16 %v1056_v35, %v1054_v34  ;;  %v1081_v34 = vld [vmem:[#allocation9 + $0x500] sm:$0xff]  ;;  %v1083_v35 = vld [vmem:[#allocation9 + $0x510] sm:$0xff] }
 0x1ee   : > { %4621 = vmatprep.subr.bf16.mxu1 %v4620_v38  ;;  %v1053_v38 = vld [vmem:[#allocation9 + $0x420] sm:$0xff] }
 0x1ef   : > { %v4654_v42 = vpack.c.bf16 %v1055_v39, %v1053_v38  ;;  %v4682_v38 = vpack.c.bf16 %v1083_v35, %v1081_v34  ;;  %v1244_v34 = vld [vmem:[#allocation9 + $0x600] sm:$0xff]  ;;  %v1246_v35 = vld [vmem:[#allocation9 + $0x610] sm:$0xff] }
 0x1f1   : > { %4623 = vmatpush1.bf16.msra.mxu1 %v4622_v43  ;;  %v4656_v43 = vpack.c.bf16 %v1060_v41, %v1058_v40  ;;  %v1085_v40 = vld [vmem:[#allocation9 + $0x520] sm:$0xff]  ;;  %v1087_v41 = vld [vmem:[#allocation9 + $0x530] sm:$0xff] }
 0x1f2   : > { %4625 = vmatprep.subr.bf16.mxu1 %v4624_v44  ;;  %v1057_v44 = vld [vmem:[#allocation9 + $0x440] sm:$0xff] }
 0x1f3   : > { %v4658_v50 = vpack.c.bf16 %v1059_v45, %v1057_v44  ;;  %v4686_v44 = vpack.c.bf16 %v1087_v41, %v1085_v40  ;;  %v4714_v40 = vpack.c.bf16 %v1246_v35, %v1244_v34  ;;  %v1126_v41 = vrot.slane %v6616_v52, 2  ;;  %v1271_v34 = vld [vmem:[#allocation9 + $0x6d8] sm:$0xff] }
 0x1f5   : > { %4627 = vmatpush1.bf16.msra.mxu1 %v4626_v51  ;;  %v1045_v51 = vld [vmem:[#allocation2 + $0x8] sm:$0xfc] }
 0x1f6   : > { %4629 = vmatprep.subr.bf16.mxu1 %v4628_v53  ;;  %v4660_v53 = vpack.c.bf16 %v1064_v49, %v1062_v46  ;;  %v1121_v57 = vrot.slane %v1045_v51, 2  ;;  %v1089_v46 = vld [vmem:[#allocation9 + $0x540] sm:$0xff]  ;;  %v1091_v49 = vld [vmem:[#allocation9 + $0x550] sm:$0xff]  ;;  %v1096_v51 = vld [vmem:[#allocation9 + $0x578] sm:$0xff] }
 0x1f9   : > { %4631 = vmatpush1.bf16.msra.mxu1 %v4630_v58  ;;  %v1122_v58 = vrot.slane %v6629_v5, 2 }
 0x1fa   : > { %4633 = vmatprep.subr.bf16.mxu1 %v4632_v59 }
 0x1fd   : > { %4635 = vmatpush1.bf16.msra.mxu1 %v4634_v2  ;;  %v1072_v2 = vld [vmem:[#allocation9 + $0x4b8] sm:$0xff] }
 0x1fe   : > { %4637 = vmatprep.subr.bf16.mxu1 %v4636_v4  ;;  %v1123_v4 = vsel %vm1117_vm11, %v1121_v57, %v1122_v58  ;;  %v4668_v7 = vpack.c.bf16 %v1072_v2, %v1070_v1  ;;  %v1100_v57 = vld [vmem:[#allocation9 + $0x598] sm:$0xff]  ;;  %v1102_v1 = vld [vmem:[#allocation9 + $0x5a8] sm:$0xff] }
 0x1ff   : > { %v1104_v2 = vld [vmem:[#allocation9 + $0x5b8] sm:$0xff] }
 0x201   : > { %4639 = vmatpush1.bf16.msra.mxu1 %v4638_v11  ;;  %v1074_v11 = vld [vmem:[#allocation9 + $0x4c8] sm:$0xff] }
 0x202   : > { %4641 = vmatprep.subr.bf16.mxu1 %v4640_v12  ;;  %v1076_v12 = vld [vmem:[#allocation9 + $0x4d8] sm:$0xff] }
 0x203   : > { %v4672_v16 = vpack.c.bf16 %v1076_v12, %v1074_v11  ;;  %v1108_v11 = vld [vmem:[#allocation9 + $0x5d8] sm:$0xff] }
 0x205   : > { %4643 = vmatpush1.bf16.msra.mxu1 %v4642_v20  ;;  %v1078_v20 = vld [vmem:[#allocation9 + $0x4e8] sm:$0xff] }
 0x206   : > { %4645 = vmatprep.subr.bf16.mxu1 %v4644_v21  ;;  %v1080_v21 = vld [vmem:[#allocation9 + $0x4f8] sm:$0xff] }
 0x207   : > { %v4676_v23 = vpack.c.bf16 %v1080_v21, %v1078_v20  ;;  %v1112_v20 = vld [vmem:[#allocation9 + $0x5f8] sm:$0xff] }
 0x209   : > { %4647 = vmatpush1.bf16.msra.mxu1 %v4646_v28  ;;  %v1082_v28 = vld [vmem:[#allocation9 + $0x508] sm:$0xff] }
 0x20a   : > { %4649 = vmatprep.subr.bf16.mxu1 %v4648_v31  ;;  %v1084_v31 = vld [vmem:[#allocation9 + $0x518] sm:$0xff] }
 0x20b   : > { %v4680_v33 = vpack.c.bf16 %v1084_v31, %v1082_v28  ;;  %v1247_v28 = vld [vmem:[#allocation9 + $0x618] sm:$0xff]  ;;  %v1044_v31 = vld [vmem:[#allocation2] sm:$0xfc] }
 0x20c   : > { %1020 = vmatmul.mubr.f32.vlgmr.msra.gmra.mrb[0].mxu1 %v6236_v0  ;;  %v1061_v0 = vld [vmem:[#allocation9 + $0x460] sm:$0xff] }
 0x20d   : > { %1025 = vmatprep.mubr.f32.mxu1 %v6629_v5  ;;  %4651 = vmatpush1.bf16.msra.mxu1 %v4650_v36  ;;  %v4662_v59 = vpack.c.bf16 %v1063_v54, %v1061_v0  ;;  %v1086_v36 = vld [vmem:[#allocation9 + $0x528] sm:$0xff]  ;;  %v1093_v54 = vld [vmem:[#allocation9 + $0x560] sm:$0xff] }
 0x20e   : > { %4653 = vmatprep.subr.bf16.mxu1 %v4652_v37  ;;  %v1088_v37 = vld [vmem:[#allocation9 + $0x538] sm:$0xff] }
 0x20f   : > { %v4684_v39 = vpack.c.bf16 %v1088_v37, %v1086_v36  ;;  %v1118_v36 = vrot.slane %v1044_v31, 2  ;;  %v1119_v37 = vrot.slane %v6624_v63, 2  ;;  %v1264_v31 = vld [vmem:[#allocation9 + $0x6a0] sm:$0xff] }
 0x210   : > { %1026 = vmatmul.mubr.f32.gmra.mrb[2].mxu1 %v6624_v63 }
 0x211   : > { %1031 = vmatprep.mubr.f32.mxu1 %v6616_v52  ;;  %4655 = vmatpush1.bf16.msra.mxu1 %v4654_v42  ;;  %v1090_v42 = vld [vmem:[#allocation9 + $0x548] sm:$0xff] }
 0x212   : > { %4657 = vmatprep.subr.bf16.mxu1 %v4656_v43  ;;  %v1092_v43 = vld [vmem:[#allocation9 + $0x558] sm:$0xff] }
 0x213   : > { %v4688_v45 = vpack.c.bf16 %v1092_v43, %v1090_v42  ;;  %v1248_v43 = vld [vmem:[#allocation9 + $0x620] sm:$0xff] }
 0x214   : > { %1032 = vmatmul.mubr.f32.gmra.mrb[4].mxu1 %v6612_v48 }
 0x215   : > { %1037 = vmatprep.mubr.f32.mxu1 %v6633_v9  ;;  %4659 = vmatpush1.bf16.msra.mxu1 %v4658_v50  ;;  %v1094_v50 = vld [vmem:[#allocation9 + $0x568] sm:$0xff] }
 0x216   : > { %4661 = vmatprep.subr.bf16.mxu1 %v4660_v53  ;;  %v4690_v53 = vpack.c.bf16 %v1091_v49, %v1089_v46  ;;  %v4692_v0 = vpack.c.bf16 %v1096_v51, %v1094_v50  ;;  %v1253_v46 = vld [vmem:[#allocation9 + $0x648] sm:$0xff]  ;;  %v1255_v49 = vld [vmem:[#allocation9 + $0x658] sm:$0xff]  ;;  %v1127_v50 = vsel %vm1117_vm11, %v1122_v58, %v1126_v41  ;;  %v1130_v51 = vrot.slane %v6633_v9, 2 }
 0x218   : > { %1038 = vmatmul.mubr.f32.gmra.mrb[6].mxu1 %v6627_v3  ;;  %v1131_v58 = vsel %vm1117_vm11, %v1126_v41, %v1130_v51 }
 0x219   : > { %4663 = vmatpush1.bf16.msra.mxu1 %v4662_v59  ;;  %1208 = vmatprep.mubr.f32.mxu1 %v1123_v4  ;;  %v4694_v59 = vpack.c.bf16 %v1095_v55, %v1093_v54  ;;  %v4698_v4 = vpack.c.bf16 %v1099_v62, %v1097_v61  ;;  %v1047_v54 = vld [vmem:[#allocation2 + $0x48] sm:$0x3]  ;;  %v4720_v55 = vpack.c.bf16 %v1255_v49, %v1253_v46  ;;  %v1257_v61 = vld [vmem:[#allocation9 + $0x668] sm:$0xff]  ;;  %v1259_v62 = vld [vmem:[#allocation9 + $0x678] sm:$0xff] }
 0x21a   : > { %4665 = vmatprep.subr.bf16.mxu1 %v4664_v60  ;;  %v4696_v60 = vpack.c.bf16 %v1100_v57, %v1098_v56  ;;  %v1252_v56 = vld [vmem:[#allocation9 + $0x640] sm:$0xff]  ;;  %v1254_v57 = vld [vmem:[#allocation9 + $0x650] sm:$0xff] }
 0x21d   : > { %4667 = vmatpush1.bf16.msra.mxu1 %v4666_v6  ;;  %v4700_v6 = vpack.c.bf16 %v1104_v2, %v1102_v1  ;;  %v1134_v1 = vrot.slane %v1047_v54, 2  ;;  %v1046_v2 = vld [vmem:[#allocation2 + $0x40] sm:$0x3] }
 0x21e   : > { %4669 = vmatprep.subr.bf16.mxu1 %v4668_v7  ;;  %v1101_v7 = vld [vmem:[#allocation9 + $0x5a0] sm:$0xff] }
 0x21f   : > { %v4702_v12 = vpack.c.bf16 %v1103_v8, %v1101_v7  ;;  %v1256_v7 = vld [vmem:[#allocation9 + $0x660] sm:$0xff]  ;;  %v1258_v8 = vld [vmem:[#allocation9 + $0x670] sm:$0xff] }
 0x221   : > { %4671 = vmatpush1.bf16.msra.mxu1 %v4670_v14  ;;  %v4704_v14 = vpack.c.bf16 %v1108_v11, %v1106_v10  ;;  %v1132_v11 = vrot.slane %v1046_v2, 2  ;;  %v1289_v2 = vld [vmem:[#allocation9 + $0x768] sm:$0xff] }
 0x222   : > { %4673 = vmatprep.subr.bf16.mxu1 %v4672_v16  ;;  %v1105_v16 = vld [vmem:[#allocation9 + $0x5c0] sm:$0xff] }
 0x223   : > { %v4706_v21 = vpack.c.bf16 %v1107_v17, %v1105_v16  ;;  %v1135_v16 = vsel %vm1117_vm11, %v1130_v51, %v1134_v1  ;;  %v4726_v17 = vpack.c.bf16 %v1258_v8, %v1256_v7  ;;  %v1278_v51 = vld [vmem:[#allocation9 + $0x710] sm:$0xff]  ;;  %v1288_v8 = vld [vmem:[#allocation9 + $0x760] sm:$0xff] }
 0x224   : > { %v1286_v1 = vld [vmem:[#allocation9 + $0x750] sm:$0xff] }
 0x225   : > { %4675 = vmatpush1.bf16.msra.mxu1 %v4674_v22  ;;  %v4708_v22 = vpack.c.bf16 %v1112_v20, %v1110_v19  ;;  %v1260_v20 = vld [vmem:[#allocation9 + $0x680] sm:$0xff] }
 0x226   : > { %4677 = vmatprep.subr.bf16.mxu1 %v4676_v23  ;;  %v1109_v23 = vld [vmem:[#allocation9 + $0x5e0] sm:$0xff] }
 0x229   : > { %4679 = vmatpush1.bf16.msra.mxu1 %v4678_v32  ;;  %v4710_v32 = vpack.c.bf16 %v1111_v25, %v1109_v23  ;;  %v1265_v23 = vld [vmem:[#allocation9 + $0x6a8] sm:$0xff]  ;;  %v1267_v25 = vld [vmem:[#allocation9 + $0x6b8] sm:$0xff] }
 0x22a   : > { %4681 = vmatprep.subr.bf16.mxu1 %v4680_v33  ;;  %v4712_v33 = vpack.c.bf16 %v1247_v28, %v1245_v27  ;;  %v4732_v28 = vpack.c.bf16 %v1267_v25, %v1265_v23  ;;  %v1296_v25 = vld [vmem:[#allocation9 + $0x7a0] sm:$0xff] }
 0x22d   : > { %4683 = vmatpush1.bf16.msra.mxu1 %v4682_v38  ;;  %v1249_v38 = vld [vmem:[#allocation9 + $0x628] sm:$0xff] }
 0x22e   : > { %4685 = vmatprep.subr.bf16.mxu1 %v4684_v39  ;;  %v1251_v39 = vld [vmem:[#allocation9 + $0x638] sm:$0xff] }
 0x22f   : > { %v4716_v42 = vpack.c.bf16 %v1251_v39, %v1249_v38  ;;  %v1270_v38 = vld [vmem:[#allocation9 + $0x6d0] sm:$0xff]  ;;  %v1273_v39 = vld [vmem:[#allocation9 + $0x6e8] sm:$0xff] }
 0x231   : > { %4687 = vmatpush1.bf16.msra.mxu1 %v4686_v44  ;;  %v1250_v44 = vld [vmem:[#allocation9 + $0x630] sm:$0xff] }
 0x232   : > { %4689 = vmatprep.subr.bf16.mxu1 %v4688_v45  ;;  %v1120_v45 = vsel %vm1117_vm11, %v1118_v36, %v1119_v37 }
 0x235   : > { %4691 = vmatpush1.bf16.msra.mxu1 %v4690_v53  ;;  %v1124_v53 = vrot.slane %v6612_v48, 2 }
 0x236   : > { %4693 = vmatprep.subr.bf16.mxu1 %v4692_v0  ;;  %v4718_v0 = vpack.c.bf16 %v1250_v44, %v1248_v43  ;;  %v1274_v43 = vld [vmem:[#allocation9 + $0x6f0] sm:$0xff]  ;;  %v1277_v44 = vld [vmem:[#allocation9 + $0x708] sm:$0xff] }
 0x239   : > { %4695 = vmatpush1.bf16.msra.mxu1 %v4694_v59  ;;  %v1125_v59 = vsel %vm1117_vm11, %v1119_v37, %v1124_v53  ;;  %v1268_v37 = vld [vmem:[#allocation9 + $0x6c0] sm:$0xff] }
 0x23a   : > { %4697 = vmatprep.subr.bf16.mxu1 %v4696_v60  ;;  %v1128_v60 = vrot.slane %v6627_v3, 2  ;;  %v4738_v41 = vpack.c.bf16 %v1270_v38, %v1268_v37  ;;  %v1307_v37 = vld [vmem:[#allocation9 + $0x7f8] sm:$0xff] }
 0x23c   : > { %v1129_v10 = vsel %vm1117_vm11, %v1124_v53, %v1128_v60  ;;  %v1281_v53 = vld [vmem:[#allocation9 + $0x728] sm:$0xff] }
 0x23d   : > { %4699 = vmatpush1.bf16.msra.mxu1 %v4698_v4  ;;  %v4722_v4 = vpack.c.bf16 %v1254_v57, %v1252_v56  ;;  %v1280_v56 = vld [vmem:[#allocation9 + $0x720] sm:$0xff]  ;;  %v1282_v57 = vld [vmem:[#allocation9 + $0x730] sm:$0xff] }
 0x23e   : > { %4701 = vmatprep.subr.bf16.mxu1 %v4700_v6  ;;  %v4724_v6 = vpack.c.bf16 %v1259_v62, %v1257_v61  ;;  %v4750_v61 = vpack.c.bf16 %v1282_v57, %v1280_v56  ;;  %v1427_v56 = vld [vmem:[#allocation9 + $0x858] sm:$0xff] }
 0x241   : > { %4703 = vmatpush1.bf16.msra.mxu1 %v4702_v12  ;;  %v1261_v12 = vld [vmem:[#allocation9 + $0x688] sm:$0xff] }
 0x242   : > { %4705 = vmatprep.subr.bf16.mxu1 %v4704_v14  ;;  %v1263_v14 = vld [vmem:[#allocation9 + $0x698] sm:$0xff] }
 0x243   : > { %v4728_v19 = vpack.c.bf16 %v1263_v14, %v1261_v12  ;;  %v1295_v12 = vld [vmem:[#allocation9 + $0x798] sm:$0xff] }
 0x245   : > { %4707 = vmatpush1.bf16.msra.mxu1 %v4706_v21  ;;  %v1262_v21 = vld [vmem:[#allocation9 + $0x690] sm:$0xff] }
 0x246   : > { %4709 = vmatprep.subr.bf16.mxu1 %v4708_v22  ;;  %v1133_v22 = vsel %vm1117_vm11, %v1128_v60, %v1132_v11  ;;  %v4730_v27 = vpack.c.bf16 %v1262_v21, %v1260_v20  ;;  %v1287_v60 = vld [vmem:[#allocation9 + $0x758] sm:$0xff]  ;;  %v1293_v11 = vld [vmem:[#allocation9 + $0x788] sm:$0xff] }
 0x247   : > { %v1297_v20 = vld [vmem:[#allocation9 + $0x7a8] sm:$0xff]  ;;  %v1299_v21 = vld [vmem:[#allocation9 + $0x7b8] sm:$0xff] }
 0x248   : > { %v4764_v23 = vpack.c.bf16 %v1299_v21, %v1297_v20  ;;  %v1436_v20 = vld [vmem:[#allocation9 + $0x8a0] sm:$0xff]  ;;  %v1438_v21 = vld [vmem:[#allocation9 + $0x8b0] sm:$0xff] }
 0x249   : > { %4711 = vmatpush1.bf16.msra.mxu1 %v4710_v32  ;;  %v1266_v32 = vld [vmem:[#allocation9 + $0x6b0] sm:$0xff] }
 0x24a   : > { %4713 = vmatprep.subr.bf16.mxu1 %v4712_v33  ;;  %v1269_v33 = vld [vmem:[#allocation9 + $0x6c8] sm:$0xff]  ;;  %v4734_v35 = vpack.c.bf16 %v1266_v32, %v1264_v31  ;;  %v1303_v31 = vld [vmem:[#allocation9 + $0x7d8] sm:$0xff] }
 0x24b   : > { %v4736_v36 = vpack.c.bf16 %v1271_v34, %v1269_v33  ;;  %v1300_v34 = vld [vmem:[#allocation9 + $0x7c0] sm:$0xff] }
 0x24c   : > { %1209 = vmatmul.mubr.f32.vlgmr.msra.gmra.mrb[0].mxu1 %v1120_v45  ;;  %v1279_v45 = vld [vmem:[#allocation9 + $0x718] sm:$0xff] }
 0x24d   : > { %1214 = vmatprep.mubr.f32.mxu1 %v1127_v50  ;;  %4715 = vmatpush1.bf16.msra.mxu1 %v4714_v40  ;;  %v1275_v40 = vld [vmem:[#allocation9 + $0x6f8] sm:$0xff]  ;;  %v4744_v49 = vpack.c.bf16 %v1279_v45, %v1277_v44  ;;  %v1276_v50 = vld [vmem:[#allocation9 + $0x700] sm:$0xff] }
 0x24e   : > { %4717 = vmatprep.subr.bf16.mxu1 %v4716_v42  ;;  %v4740_v42 = vpack.c.bf16 %v1275_v40, %v1273_v39  ;;  %v4746_v54 = vpack.c.bf16 %v1278_v51, %v1276_v50  ;;  %v1304_v40 = vld [vmem:[#allocation9 + $0x7e0] sm:$0xff]  ;;  %v1423_v50 = vld [vmem:[#allocation9 + $0x838] sm:$0xff] }
 0x24f   : > { %v1416_v45 = vld [vmem:[#allocation9 + $0x800] sm:$0xff] }
 0x250   : > { %1215 = vmatmul.mubr.f32.gmra.mrb[2].mxu1 %v1125_v59  ;;  %v1285_v59 = vld [vmem:[#allocation9 + $0x748] sm:$0xff] }
 0x251   : > { %1220 = vmatprep.mubr.f32.mxu1 %v1131_v58  ;;  %4719 = vmatpush1.bf16.msra.mxu1 %v4718_v0  ;;  %v1283_v0 = vld [vmem:[#allocation9 + $0x738] sm:$0xff]  ;;  %v4752_v62 = vpack.c.bf16 %v1287_v60, %v1285_v59  ;;  %v1284_v58 = vld [vmem:[#allocation9 + $0x740] sm:$0xff] }
 0x252   : > { %4721 = vmatprep.subr.bf16.mxu1 %v4720_v55  ;;  %v4748_v55 = vpack.c.bf16 %v1283_v0, %v1281_v53  ;;  %v1420_v0 = vld [vmem:[#allocation9 + $0x820] sm:$0xff] }
 0x253   : > { %v1424_v60 = vld [vmem:[#allocation9 + $0x840] sm:$0xff] }
 0x254   : > { %1221 = vmatmul.mubr.f32.gmra.mrb[4].mxu1 %v1129_v10  ;;  %v1290_v10 = vld [vmem:[#allocation9 + $0x770] sm:$0xff] }
 0x255   : > { %1226 = vmatprep.mubr.f32.mxu1 %v1135_v16  ;;  %4723 = vmatpush1.bf16.msra.mxu1 %v4722_v4  ;;  %v1291_v4 = vld [vmem:[#allocation9 + $0x778] sm:$0xff]  ;;  %v4758_v14 = vpack.c.bf16 %v1290_v10, %v1288_v8  ;;  %v4760_v16 = vpack.c.bf16 %v1295_v12, %v1293_v11  ;;  %v1432_v12 = vld [vmem:[#allocation9 + $0x880] sm:$0xff] }
 0x256   : > { %4725 = vmatprep.subr.bf16.mxu1 %v4724_v6  ;;  %v4754_v6 = vpack.c.bf16 %v1286_v1, %v1284_v58  ;;  %v4756_v7 = vpack.c.bf16 %v1291_v4, %v1289_v2  ;;  %v1431_v58 = vld [vmem:[#allocation9 + $0x878] sm:$0xff]  ;;  %v6693_v2 = vld [vmem:[#allocation2 + $0x28] sm:$0xff] }
 0x257   : > { %v1428_v4 = vld [vmem:[#allocation9 + $0x860] sm:$0xff]  ;;  %v1435_v8 = vld [vmem:[#allocation9 + $0x898] sm:$0xff]  ;;  %v1494_v10 = vrot.slane %v6693_v2, 1 }
 0x258   : > { %1227 = vmatmul.mubr.f32.gmra.mrb[6].mxu1 %v1133_v22 }
 0x259   : > { %4727 = vmatpush1.bf16.msra.mxu1 %v4726_v17  ;;  %1372 = vmatprep.mubr.f32.mxu1 %v6629_v5  ;;  %v1272_v5 = vld [vmem:[#allocation9 + $0x6e0] sm:$0xff] }
 0x25a   : > { %4729 = vmatprep.subr.bf16.mxu1 %v4728_v19  ;;  %v4742_v46 = vpack.c.bf16 %v1274_v43, %v1272_v5  ;;  %v1292_v17 = vld [vmem:[#allocation9 + $0x780] sm:$0xff]  ;;  %v1294_v19 = vld [vmem:[#allocation9 + $0x790] sm:$0xff]  ;;  %v1419_v5 = vld [vmem:[#allocation9 + $0x818] sm:$0xff] }
 0x25b   : > { %v4762_v22 = vpack.c.bf16 %v1294_v19, %v1292_v17  ;;  %v1439_v17 = vld [vmem:[#allocation9 + $0x8b8] sm:$0xff] }
 0x25d   : > { %4731 = vmatpush1.bf16.msra.mxu1 %v4730_v27  ;;  %v1298_v27 = vld [vmem:[#allocation9 + $0x7b0] sm:$0xff] }
 0x25e   : > { %4733 = vmatprep.subr.bf16.mxu1 %v4732_v28  ;;  %v1301_v28 = vld [vmem:[#allocation9 + $0x7c8] sm:$0xff]  ;;  %v4766_v32 = vpack.c.bf16 %v1298_v27, %v1296_v25  ;;  %v4798_v25 = vpack.c.bf16 %v1438_v21, %v1436_v20  ;;  %v1479_v21 = vld [vmem:[#allocation9 + $0x9f8] sm:$0xff] }
 0x25f   : > { %v4768_v33 = vpack.c.bf16 %v1303_v31, %v1301_v28  ;;  %v1440_v28 = vld [vmem:[#allocation9 + $0x8c0] sm:$0xff]  ;;  %v1442_v31 = vld [vmem:[#allocation9 + $0x8d0] sm:$0xff]  ;;  %v1477_v20 = vld [vmem:[#allocation9 + $0x9e8] sm:$0xff] }
 0x261   : > { %4735 = vmatpush1.bf16.msra.mxu1 %v4734_v35  ;;  %v1302_v35 = vld [vmem:[#allocation9 + $0x7d0] sm:$0xff] }
 0x262   : > { %4737 = vmatprep.subr.bf16.mxu1 %v4736_v36  ;;  %v1305_v36 = vld [vmem:[#allocation9 + $0x7e8] sm:$0xff]  ;;  %v4770_v38 = vpack.c.bf16 %v1302_v35, %v1300_v34  ;;  %v1444_v35 = vld [vmem:[#allocation9 + $0x8e0] sm:$0xff] }
 0x263   : > { %v4772_v39 = vpack.c.bf16 %v1307_v37, %v1305_v36  ;;  %v1446_v36 = vld [vmem:[#allocation9 + $0x8f0] sm:$0xff]  ;;  %v1449_v37 = vld [vmem:[#allocation9 + $0x908] sm:$0xff] }
 0x265   : > { %4739 = vmatpush1.bf16.msra.mxu1 %v4738_v41  ;;  %v1306_v41 = vld [vmem:[#allocation9 + $0x7f0] sm:$0xff] }
 0x266   : > { %4741 = vmatprep.subr.bf16.mxu1 %v4740_v42  ;;  %v1417_v42 = vld [vmem:[#allocation9 + $0x808] sm:$0xff]  ;;  %v4774_v43 = vpack.c.bf16 %v1306_v41, %v1304_v40  ;;  %v1448_v41 = vld [vmem:[#allocation9 + $0x900] sm:$0xff] }
 0x267   : > { %v4776_v44 = vpack.c.bf16 %v1419_v5, %v1417_v42  ;;  %v1450_v42 = vld [vmem:[#allocation9 + $0x910] sm:$0xff]  ;;  %v1453_v5 = vld [vmem:[#allocation9 + $0x928] sm:$0xff] }
 0x269   : > { %4743 = vmatpush1.bf16.msra.mxu1 %v4742_v46  ;;  %v1418_v46 = vld [vmem:[#allocation9 + $0x810] sm:$0xff] }
 0x26a   : > { %4745 = vmatprep.subr.bf16.mxu1 %v4744_v49  ;;  %v1421_v49 = vld [vmem:[#allocation9 + $0x828] sm:$0xff]  ;;  %v4778_v51 = vpack.c.bf16 %v1418_v46, %v1416_v45  ;;  %v1452_v46 = vld [vmem:[#allocation9 + $0x920] sm:$0xff] }
 0x26b   : > { %v4780_v53 = vpack.c.bf16 %v1423_v50, %v1421_v49  ;;  %v1454_v49 = vld [vmem:[#allocation9 + $0x930] sm:$0xff]  ;;  %v1457_v50 = vld [vmem:[#allocation9 + $0x948] sm:$0xff] }
 0x26d   : > { %4747 = vmatpush1.bf16.msra.mxu1 %v4746_v54  ;;  %v1422_v54 = vld [vmem:[#allocation9 + $0x830] sm:$0xff] }
 0x26e   : > { %4749 = vmatprep.subr.bf16.mxu1 %v4748_v55  ;;  %v1425_v55 = vld [vmem:[#allocation9 + $0x848] sm:$0xff]  ;;  %v4782_v57 = vpack.c.bf16 %v1422_v54, %v1420_v0  ;;  %v1456_v54 = vld [vmem:[#allocation9 + $0x940] sm:$0xff] }
 0x26f   : > { %v4784_v59 = vpack.c.bf16 %v1427_v56, %v1425_v55  ;;  %v1458_v55 = vld [vmem:[#allocation9 + $0x950] sm:$0xff]  ;;  %v1461_v56 = vld [vmem:[#allocation9 + $0x968] sm:$0xff] }
 0x271   : > { %4751 = vmatpush1.bf16.msra.mxu1 %v4750_v61  ;;  %v1426_v61 = vld [vmem:[#allocation9 + $0x850] sm:$0xff] }
 0x272   : > { %4753 = vmatprep.subr.bf16.mxu1 %v4752_v62  ;;  %v1429_v62 = vld [vmem:[#allocation9 + $0x868] sm:$0xff]  ;;  %v4786_v1 = vpack.c.bf16 %v1426_v61, %v1424_v60  ;;  %v1460_v61 = vld [vmem:[#allocation9 + $0x960] sm:$0xff] }
 0x275   : > { %4755 = vmatpush1.bf16.msra.mxu1 %v4754_v6  ;;  %v1406_v6 = vld [vmem:[#allocation2 + $0x18] sm:$0xfe] }
 0x276   : > { %4757 = vmatprep.subr.bf16.mxu1 %v4756_v7  ;;  %v1433_v7 = vld [vmem:[#allocation9 + $0x888] sm:$0xff] }
 0x277   : > { %v4792_v11 = vpack.c.bf16 %v1435_v8, %v1433_v7  ;;  %v1469_v7 = vld [vmem:[#allocation9 + $0x9a8] sm:$0xff]  ;;  %v1471_v8 = vld [vmem:[#allocation9 + $0x9b8] sm:$0xff] }
 0x279   : > { %4759 = vmatpush1.bf16.msra.mxu1 %v4758_v14  ;;  %v1434_v14 = vld [vmem:[#allocation9 + $0x890] sm:$0xff] }
 0x27a   : > { %4761 = vmatprep.subr.bf16.mxu1 %v4760_v16  ;;  %v1437_v16 = vld [vmem:[#allocation9 + $0x8a8] sm:$0xff] }
 0x27d   : > { %4763 = vmatpush1.bf16.msra.mxu1 %v4762_v22  ;;  %v1441_v22 = vld [vmem:[#allocation9 + $0x8c8] sm:$0xff] }
 0x27e   : > { %4765 = vmatprep.subr.bf16.mxu1 %v4764_v23  ;;  %v1443_v23 = vld [vmem:[#allocation9 + $0x8d8] sm:$0xff] }
 0x27f   : > { %v4800_v27 = vpack.c.bf16 %v1443_v23, %v1441_v22  ;;  %v4836_v23 = vpack.c.bf16 %v1479_v21, %v1477_v20 }
 0x281   : > { %4767 = vmatpush1.bf16.msra.mxu1 %v4766_v32  ;;  %v1447_v32 = vld [vmem:[#allocation9 + $0x8f8] sm:$0xff] }
 0x282   : > { %4769 = vmatprep.subr.bf16.mxu1 %v4768_v33  ;;  %v4802_v33 = vpack.c.bf16 %v1442_v31, %v1440_v28  ;;  %v1619_v28 = vld [vmem:[#allocation9 + $0xa08] sm:$0xff]  ;;  %v1621_v31 = vld [vmem:[#allocation9 + $0xa18] sm:$0xff] }
 0x285   : > { %4771 = vmatpush1.bf16.msra.mxu1 %v4770_v38  ;;  %v1451_v38 = vld [vmem:[#allocation9 + $0x918] sm:$0xff] }
 0x286   : > { %4773 = vmatprep.subr.bf16.mxu1 %v4772_v39  ;;  %v4806_v39 = vpack.c.bf16 %v1446_v36, %v1444_v35  ;;  %v4808_v40 = vpack.c.bf16 %v1451_v38, %v1449_v37  ;;  %v4840_v35 = vpack.c.bf16 %v1621_v31, %v1619_v28  ;;  %v1618_v36 = vld [vmem:[#allocation9 + $0xa00] sm:$0xff]  ;;  %v1620_v37 = vld [vmem:[#allocation9 + $0xa10] sm:$0xff]  ;;  %v1641_v28 = vld [vmem:[#allocation9 + $0xab8] sm:$0xff] }
 0x289   : > { %4775 = vmatpush1.bf16.msra.mxu1 %v4774_v43  ;;  %v1455_v43 = vld [vmem:[#allocation9 + $0x938] sm:$0xff] }
 0x28a   : > { %4777 = vmatprep.subr.bf16.mxu1 %v4776_v44  ;;  %v4810_v44 = vpack.c.bf16 %v1450_v42, %v1448_v41  ;;  %v4812_v45 = vpack.c.bf16 %v1455_v43, %v1453_v5  ;;  %v6710_v42 = vld [vmem:[#allocation2 + $0x30] sm:$0xff]  ;;  %v4842_v43 = vpack.c.bf16 %v1620_v37, %v1618_v36 }
 0x28b   : > { %v1640_v36 = vld [vmem:[#allocation9 + $0xab0] sm:$0xff]  ;;  %v1643_v37 = vld [vmem:[#allocation9 + $0xac8] sm:$0xff] }
 0x28c   : > { %1373 = vmatmul.mubr.f32.vlgmr.msra.gmra.mrb[0].mxu1 %v6624_v63  ;;  %v4788_v63 = vpack.c.bf16 %v1431_v58, %v1429_v62  ;;  %v1462_v62 = vld [vmem:[#allocation9 + $0x970] sm:$0xff]  ;;  %v1465_v58 = vld [vmem:[#allocation9 + $0x988] sm:$0xff] }
 0x28d   : > { %1378 = vmatprep.mubr.f32.mxu1 %v6616_v52  ;;  %4779 = vmatpush1.bf16.msra.mxu1 %v4778_v51  ;;  %v1430_v52 = vld [vmem:[#allocation9 + $0x870] sm:$0xff]  ;;  %v1459_v51 = vld [vmem:[#allocation9 + $0x958] sm:$0xff] }
 0x28e   : > { %4781 = vmatprep.subr.bf16.mxu1 %v4780_v53  ;;  %v4814_v53 = vpack.c.bf16 %v1454_v49, %v1452_v46  ;;  %v4816_v0 = vpack.c.bf16 %v1459_v51, %v1457_v50  ;;  %v1622_v46 = vld [vmem:[#allocation9 + $0xa20] sm:$0xff]  ;;  %v1624_v49 = vld [vmem:[#allocation9 + $0xa30] sm:$0xff]  ;;  %v6716_v51 = vrot.slane %v6710_v42, 1 }
 0x290   : > { %1379 = vmatmul.mubr.f32.gmra.mrb[2].mxu1 %v6612_v48  ;;  %v4790_v48 = vpack.c.bf16 %v1430_v52, %v1428_v4  ;;  %v1464_v52 = vld [vmem:[#allocation9 + $0x980] sm:$0xff] }
 0x291   : > { %1384 = vmatprep.mubr.f32.mxu1 %v6633_v9  ;;  %4783 = vmatpush1.bf16.msra.mxu1 %v4782_v57  ;;  %v1493_v9 = vrot.slane %v1406_v6, 1  ;;  %v1463_v57 = vld [vmem:[#allocation9 + $0x978] sm:$0xff]  ;;  %v1466_v6 = vld [vmem:[#allocation9 + $0x990] sm:$0xff] }
 0x292   : > { %4785 = vmatprep.subr.bf16.mxu1 %v4784_v59  ;;  %v4818_v59 = vpack.c.bf16 %v1458_v55, %v1456_v54  ;;  %v4820_v60 = vpack.c.bf16 %v1463_v57, %v1461_v56  ;;  %v6725_v56 = vld [vmem:[#allocation2 + $0x40] sm:$0xff]  ;;  %v4846_v57 = vpack.c.bf16 %v1624_v49, %v1622_v46 }
 0x293   : > { %v1495_v19 = vsel %vm839_vm10, %v1493_v9, %v1494_v10  ;;  %v4828_v9 = vpack.c.bf16 %v1471_v8, %v1469_v7  ;;  %v1649_v46 = vld [vmem:[#allocation9 + $0xaf8] sm:$0xff] }
 0x294   : > { %1385 = vmatmul.mubr.f32.gmra.mrb[4].mxu1 %v6627_v3  ;;  %v4794_v3 = vpack.c.bf16 %v1434_v14, %v1432_v12  ;;  %v1470_v12 = vld [vmem:[#allocation9 + $0x9b0] sm:$0xff]  ;;  %v1473_v14 = vld [vmem:[#allocation9 + $0x9c8] sm:$0xff] }
 0x295   : > { %1390 = vmatprep.mubr.f32.mxu1 %v6649_v30  ;;  %4787 = vmatpush1.bf16.msra.mxu1 %v4786_v1  ;;  %v4796_v30 = vpack.c.bf16 %v1439_v17, %v1437_v16  ;;  %v1467_v1 = vld [vmem:[#allocation9 + $0x998] sm:$0xff] }
 0x296   : > { %4789 = vmatprep.subr.bf16.mxu1 %v4788_v63  ;;  %v4822_v63 = vpack.c.bf16 %v1462_v62, %v1460_v61  ;;  %v4824_v4 = vpack.c.bf16 %v1467_v1, %v1465_v58  ;;  %v1475_v16 = vld [vmem:[#allocation9 + $0x9d8] sm:$0xff]  ;;  %v1626_v61 = vld [vmem:[#allocation9 + $0xa40] sm:$0xff]  ;;  %v1628_v62 = vld [vmem:[#allocation9 + $0xa50] sm:$0xff]  ;;  %v6730_v1 = vrot.slane %v6725_v56, 1 }
 0x297   : > { %v4850_v7 = vpack.c.bf16 %v1628_v62, %v1626_v61  ;;  %v1650_v61 = vld [vmem:[#allocation9 + $0xb00] sm:$0xff]  ;;  %v1652_v62 = vld [vmem:[#allocation9 + $0xb10] sm:$0xff] }
 0x298   : > { %1391 = vmatmul.mubr.f32.gmra.mrb[6].mxu1 %v6645_v24  ;;  %v1445_v24 = vld [vmem:[#allocation9 + $0x8e8] sm:$0xff] }
 0x299   : > { %4791 = vmatpush1.bf16.msra.mxu1 %v4790_v48  ;;  %1580 = vmatprep.mubr.f32.mxu1 %v1495_v19  ;;  %v4804_v34 = vpack.c.bf16 %v1447_v32, %v1445_v24  ;;  %v4826_v48 = vpack.c.bf16 %v1466_v6, %v1464_v52  ;;  %v4832_v19 = vpack.c.bf16 %v1475_v16, %v1473_v14  ;;  %v6702_v24 = vld [vmem:[#allocation2 + $0x20] sm:$0xff]  ;;  %v1413_v6 = vld [vmem:[#allocation2 + $0x50] sm:$0x1]  ;;  %v1614_v14 = vld [vmem:[#allocation2 + $0x18] sm:$0xfc] }
 0x29a   : > { %4793 = vmatprep.subr.bf16.mxu1 %v4792_v11  ;;  %v1468_v11 = vld [vmem:[#allocation9 + $0x9a0] sm:$0xff]  ;;  %v1491_v38 = vrot.slane %v6702_v24, 1  ;;  %v1635_v16 = vld [vmem:[#allocation9 + $0xa88] sm:$0xff]  ;;  %v1689_v20 = vrot.slane %v1614_v14, 2 }
 0x29b   : > { %v4830_v17 = vpack.c.bf16 %v1470_v12, %v1468_v11  ;;  %v6741_v11 = vsel %vm839_vm10, %v6716_v51, %v6730_v1  ;;  %v1504_v12 = vrot.slane %v1413_v6, 1  ;;  %v1654_v6 = vld [vmem:[#allocation9 + $0xb20] sm:$0xff] }
 0x29c   : > { %v1497_v58 = vsel %vm839_vm10, %v1491_v38, %v6716_v51  ;;  %v1658_v14 = vld [vmem:[#allocation9 + $0xb40] sm:$0xff] }
 0x29d   : > { %4795 = vmatpush1.bf16.msra.mxu1 %v4794_v3  ;;  %v1472_v3 = vld [vmem:[#allocation9 + $0x9c0] sm:$0xff] }
 0x29e   : > { %4797 = vmatprep.subr.bf16.mxu1 %v4796_v30  ;;  %v1474_v30 = vld [vmem:[#allocation9 + $0x9d0] sm:$0xff] }
 0x29f   : > { %v4834_v22 = vpack.c.bf16 %v1474_v30, %v1472_v3  ;;  %v1690_v3 = vrot.slane %v6693_v2, 2 }
 0x2a1   : > { %4799 = vmatpush1.bf16.msra.mxu1 %v4798_v25  ;;  %v1476_v25 = vld [vmem:[#allocation9 + $0x9e0] sm:$0xff]  ;;  %v1691_v31 = vsel %vm1117_vm11, %v1689_v20, %v1690_v3 }
 0x2a2   : > { %4801 = vmatprep.subr.bf16.mxu1 %v4800_v27  ;;  %v1478_v27 = vld [vmem:[#allocation9 + $0x9f0] sm:$0xff] }
 0x2a3   : > { %v4838_v32 = vpack.c.bf16 %v1478_v27, %v1476_v25  ;;  %v1505_v25 = vsel %vm839_vm10, %v6730_v1, %v1504_v12  ;;  %v1639_v27 = vld [vmem:[#allocation9 + $0xaa8] sm:$0xff] }
 0x2a5   : > { %4803 = vmatpush1.bf16.msra.mxu1 %v4802_v33  ;;  %v6704_v33 = vld [vmem:[#allocation2 + $0x38] sm:$0xff] }
 0x2a6   : > { %4805 = vmatprep.subr.bf16.mxu1 %v4804_v34  ;;  %v1405_v34 = vld [vmem:[#allocation2 + $0x10] sm:$0xfe]  ;;  %v6708_v41 = vrot.slane %v6704_v33, 1 }
 0x2a7   : > { %v1490_v5 = vrot.slane %v1405_v34, 1  ;;  %v4860_v34 = vpack.c.bf16 %v1641_v28, %v1639_v27 }
 0x2a8   : > { %v1499_v54 = vsel %vm839_vm10, %v1494_v10, %v6708_v41  ;;  %v1631_v10 = vld [vmem:[#allocation9 + $0xa68] sm:$0xff] }
 0x2a9   : > { %4807 = vmatpush1.bf16.msra.mxu1 %v4806_v39  ;;  %v1623_v39 = vld [vmem:[#allocation9 + $0xa28] sm:$0xff]  ;;  %v1492_v50 = vsel %vm839_vm10, %v1490_v5, %v1491_v38  ;;  %v1645_v38 = vld [vmem:[#allocation9 + $0xad8] sm:$0xff]  ;;  %v1642_v5 = vld [vmem:[#allocation9 + $0xac0] sm:$0xff] }
 0x2aa   : > { %4809 = vmatprep.subr.bf16.mxu1 %v4808_v40  ;;  %v1625_v40 = vld [vmem:[#allocation9 + $0xa38] sm:$0xff] }
 0x2ad   : > { %4811 = vmatpush1.bf16.msra.mxu1 %v4810_v44  ;;  %v6712_v44 = vld [vmem:[#allocation2 + $0x48] sm:$0xff] }
 0x2ae   : > { %4813 = vmatprep.subr.bf16.mxu1 %v4812_v45  ;;  %v4844_v45 = vpack.c.bf16 %v1625_v40, %v1623_v39  ;;  %v6723_v55 = vrot.slane %v6712_v44, 1  ;;  %v4864_v40 = vpack.c.bf16 %v1645_v38, %v1643_v37  ;;  %v1670_v38 = vld [vmem:[#allocation9 + $0xba0] sm:$0xff] }
 0x2b1   : > { %4815 = vmatpush1.bf16.msra.mxu1 %v4814_v53  ;;  %v1627_v53 = vld [vmem:[#allocation9 + $0xa48] sm:$0xff] }
 0x2b2   : > { %4817 = vmatprep.subr.bf16.mxu1 %v4816_v0  ;;  %v1629_v0 = vld [vmem:[#allocation9 + $0xa58] sm:$0xff] }
 0x2b5   : > { %4819 = vmatpush1.bf16.msra.mxu1 %v4818_v59  ;;  %v1414_v59 = vld [vmem:[#allocation2 + $0x58] sm:$0x1] }
 0x2b6   : > { %4821 = vmatprep.subr.bf16.mxu1 %v4820_v60  ;;  %v4848_v60 = vpack.c.bf16 %v1629_v0, %v1627_v53  ;;  %v1506_v52 = vrot.slane %v1414_v59, 1  ;;  %v1646_v53 = vld [vmem:[#allocation9 + $0xae0] sm:$0xff]  ;;  %v1648_v0 = vld [vmem:[#allocation9 + $0xaf0] sm:$0xff] }
 0x2b7   : > { %v4870_v59 = vpack.c.bf16 %v1648_v0, %v1646_v53  ;;  %v1681_v53 = vld [vmem:[#allocation9 + $0xbf8] sm:$0xff] }
 0x2b9   : > { %4823 = vmatpush1.bf16.msra.mxu1 %v4822_v63  ;;  %v1633_v63 = vld [vmem:[#allocation9 + $0xa78] sm:$0xff] }
 0x2ba   : > { %4825 = vmatprep.subr.bf16.mxu1 %v4824_v4  ;;  %v6735_v4 = vsel %vm839_vm10, %v6708_v41, %v6723_v55  ;;  %v4852_v8 = vpack.c.bf16 %v1633_v63, %v1631_v10  ;;  %v1657_v10 = vld [vmem:[#allocation9 + $0xb38] sm:$0xff]  ;;  %v4874_v63 = vpack.c.bf16 %v1652_v62, %v1650_v61 }
 0x2bb   : > { %v1815_v61 = vld [vmem:[#allocation9 + $0xc18] sm:$0xff] }
 0x2bd   : > { %4827 = vmatpush1.bf16.msra.mxu1 %v4826_v48  ;;  %v1630_v48 = vld [vmem:[#allocation9 + $0xa60] sm:$0xff] }
 0x2be   : > { %4829 = vmatprep.subr.bf16.mxu1 %v4828_v9  ;;  %v1632_v9 = vld [vmem:[#allocation9 + $0xa70] sm:$0xff] }
 0x2bf   : > { %v4854_v30 = vpack.c.bf16 %v1632_v9, %v1630_v48  ;;  %v1661_v48 = vld [vmem:[#allocation9 + $0xb58] sm:$0xff] }
 0x2c1   : > { %4831 = vmatpush1.bf16.msra.mxu1 %v4830_v17  ;;  %v1637_v17 = vld [vmem:[#allocation9 + $0xa98] sm:$0xff] }
 0x2c2   : > { %4833 = vmatprep.subr.bf16.mxu1 %v4832_v19  ;;  %v1507_v19 = vsel %vm839_vm10, %v6723_v55, %v1506_v52  ;;  %v4856_v21 = vpack.c.bf16 %v1637_v17, %v1635_v16  ;;  %v1660_v16 = vld [vmem:[#allocation9 + $0xb50] sm:$0xff]  ;;  %v1663_v17 = vld [vmem:[#allocation9 + $0xb68] sm:$0xff] }
 0x2c5   : > { %4835 = vmatpush1.bf16.msra.mxu1 %v4834_v22  ;;  %v1634_v22 = vld [vmem:[#allocation9 + $0xa80] sm:$0xff] }
 0x2c6   : > { %4837 = vmatprep.subr.bf16.mxu1 %v4836_v23  ;;  %v1636_v23 = vld [vmem:[#allocation9 + $0xa90] sm:$0xff] }
 0x2c9   : > { %4839 = vmatpush1.bf16.msra.mxu1 %v4838_v32  ;;  %v4858_v32 = vpack.c.bf16 %v1636_v23, %v1634_v22  ;;  %v1664_v22 = vld [vmem:[#allocation9 + $0xb70] sm:$0xff]  ;;  %v1667_v23 = vld [vmem:[#allocation9 + $0xb88] sm:$0xff] }
 0x2ca   : > { %4841 = vmatprep.subr.bf16.mxu1 %v4840_v35  ;;  %v1638_v35 = vld [vmem:[#allocation9 + $0xaa0] sm:$0xff] }
 0x2cb   : > { %v4862_v39 = vpack.c.bf16 %v1640_v36, %v1638_v35  ;;  %v1673_v35 = vld [vmem:[#allocation9 + $0xbb8] sm:$0xff] }
 0x2cc   : > { %1581 = vmatmul.mubr.f32.vlgmr.msra.gmra.mrb[0].mxu1 %v1492_v50 }
 0x2cd   : > { %1586 = vmatprep.mubr.f32.mxu1 %v1499_v54  ;;  %4843 = vmatpush1.bf16.msra.mxu1 %v4842_v43  ;;  %v1644_v43 = vld [vmem:[#allocation9 + $0xad0] sm:$0xff]  ;;  %v1651_v54 = vld [vmem:[#allocation9 + $0xb08] sm:$0xff] }
 0x2ce   : > { %4845 = vmatprep.subr.bf16.mxu1 %v4844_v45  ;;  %v1647_v45 = vld [vmem:[#allocation9 + $0xae8] sm:$0xff]  ;;  %v4866_v49 = vpack.c.bf16 %v1644_v43, %v1642_v5  ;;  %v1677_v5 = vld [vmem:[#allocation9 + $0xbd8] sm:$0xff] }
 0x2cf   : > { %v4868_v50 = vpack.c.bf16 %v1649_v46, %v1647_v45  ;;  %v1674_v46 = vld [vmem:[#allocation9 + $0xbc0] sm:$0xff] }
 0x2d0   : > { %1587 = vmatmul.mubr.f32.gmra.mrb[2].mxu1 %v1497_v58  ;;  %v1655_v58 = vld [vmem:[#allocation9 + $0xb28] sm:$0xff] }
 0x2d1   : > { %1592 = vmatprep.mubr.f32.mxu1 %v6735_v4  ;;  %4847 = vmatpush1.bf16.msra.mxu1 %v4846_v57  ;;  %v1653_v57 = vld [vmem:[#allocation9 + $0xb18] sm:$0xff]  ;;  %v4876_v52 = vpack.c.bf16 %v1657_v10, %v1655_v58  ;;  %v1613_v58 = vld [vmem:[#allocation2 + $0x10] sm:$0xfc] }
 0x2d2   : > { %4849 = vmatprep.subr.bf16.mxu1 %v4848_v60  ;;  %v4872_v60 = vpack.c.bf16 %v1653_v57, %v1651_v54  ;;  %v1678_v57 = vld [vmem:[#allocation9 + $0xbe0] sm:$0xff] }
 0x2d4   : > { %1593 = vmatmul.mubr.f32.gmra.mrb[4].mxu1 %v6741_v11 }
 0x2d5   : > { %1598 = vmatprep.mubr.f32.mxu1 %v1507_v19  ;;  %4851 = vmatpush1.bf16.msra.mxu1 %v4850_v7  ;;  %v1656_v7 = vld [vmem:[#allocation9 + $0xb30] sm:$0xff]  ;;  %v1665_v19 = vld [vmem:[#allocation9 + $0xb78] sm:$0xff] }
 0x2d6   : > { %4853 = vmatprep.subr.bf16.mxu1 %v4852_v8  ;;  %v1659_v8 = vld [vmem:[#allocation9 + $0xb48] sm:$0xff]  ;;  %v4878_v9 = vpack.c.bf16 %v1656_v7, %v1654_v6  ;;  %v4884_v20 = vpack.c.bf16 %v1665_v19, %v1663_v17  ;;  %v1687_v6 = vrot.slane %v6702_v24, 2  ;;  %v1818_v17 = vld [vmem:[#allocation9 + $0xc30] sm:$0xff] }
 0x2d7   : > { %v4880_v12 = vpack.c.bf16 %v1661_v48, %v1659_v8  ;;  %v1817_v7 = vld [vmem:[#allocation9 + $0xc28] sm:$0xff]  ;;  %v1819_v8 = vld [vmem:[#allocation9 + $0xc38] sm:$0xff]  ;;  %v6754_v48 = vrot.slane %v6704_v33, 2 }
 0x2d8   : > { %1599 = vmatmul.mubr.f32.gmra.mrb[6].mxu1 %v1505_v25  ;;  %v1669_v25 = vld [vmem:[#allocation9 + $0xb98] sm:$0xff] }
 0x2d9   : > { %4855 = vmatpush1.bf16.msra.mxu1 %v4854_v30  ;;  %1776 = vmatprep.mubr.f32.mxu1 %v1691_v31  ;;  %v4882_v30 = vpack.c.bf16 %v1660_v16, %v1658_v14  ;;  %v4888_v28 = vpack.c.bf16 %v1669_v25, %v1667_v23  ;;  %v1666_v31 = vld [vmem:[#allocation9 + $0xb80] sm:$0xff]  ;;  %v4908_v14 = vpack.c.bf16 %v1819_v8, %v1817_v7  ;;  %v6765_v23 = vrot.slane %v6712_v44, 2  ;;  %v1837_v7 = vld [vmem:[#allocation9 + $0xcc8] sm:$0xff]  ;;  %v1839_v8 = vld [vmem:[#allocation9 + $0xcd8] sm:$0xff] }
 0x2da   : > { %4857 = vmatprep.subr.bf16.mxu1 %v4856_v21  ;;  %v1662_v21 = vld [vmem:[#allocation9 + $0xb60] sm:$0xff] }
 0x2db   : > { %v4886_v27 = vpack.c.bf16 %v1664_v22, %v1662_v21  ;;  %v1816_v16 = vld [vmem:[#allocation9 + $0xc20] sm:$0xff]  ;;  %v1823_v21 = vld [vmem:[#allocation9 + $0xc58] sm:$0xff]  ;;  %v1695_v22 = vsel %vm1117_vm11, %v1690_v3, %v6754_v48  ;;  %v6775_v3 = vsel %vm1117_vm11, %v6754_v48, %v6765_v23 }
 0x2dc   : > { %v4910_v25 = vpack.c.bf16 %v1818_v17, %v1816_v16  ;;  %v1838_v16 = vld [vmem:[#allocation9 + $0xcd0] sm:$0xff]  ;;  %v1841_v17 = vld [vmem:[#allocation9 + $0xce8] sm:$0xff] }
 0x2dd   : > { %4859 = vmatpush1.bf16.msra.mxu1 %v4858_v32  ;;  %v1668_v32 = vld [vmem:[#allocation9 + $0xb90] sm:$0xff] }
 0x2de   : > { %4861 = vmatprep.subr.bf16.mxu1 %v4860_v34  ;;  %v1671_v34 = vld [vmem:[#allocation9 + $0xba8] sm:$0xff]  ;;  %v4890_v36 = vpack.c.bf16 %v1668_v32, %v1666_v31  ;;  %v1820_v31 = vld [vmem:[#allocation9 + $0xc40] sm:$0xff]  ;;  %v1822_v32 = vld [vmem:[#allocation9 + $0xc50] sm:$0xff] }
 0x2df   : > { %v4892_v37 = vpack.c.bf16 %v1673_v35, %v1671_v34  ;;  %v6770_v35 = vrot.slane %v6725_v56, 2 }
 0x2e1   : > { %4863 = vmatpush1.bf16.msra.mxu1 %v4862_v39  ;;  %v1672_v39 = vld [vmem:[#allocation9 + $0xbb0] sm:$0xff] }
 0x2e2   : > { %4865 = vmatprep.subr.bf16.mxu1 %v4864_v40  ;;  %v1675_v40 = vld [vmem:[#allocation9 + $0xbc8] sm:$0xff]  ;;  %v4894_v43 = vpack.c.bf16 %v1672_v39, %v1670_v38 }
 0x2e3   : > { %v4896_v45 = vpack.c.bf16 %v1677_v5, %v1675_v40  ;;  %v1615_v39 = vld [vmem:[#allocation2 + $0x50] sm:$0x3]  ;;  %v4914_v40 = vpack.c.bf16 %v1822_v32, %v1820_v31  ;;  %v1844_v32 = vld [vmem:[#allocation9 + $0xd00] sm:$0xff] }
 0x2e5   : > { %4867 = vmatpush1.bf16.msra.mxu1 %v4866_v49  ;;  %v1676_v49 = vld [vmem:[#allocation9 + $0xbd0] sm:$0xff] }
 0x2e6   : > { %4869 = vmatprep.subr.bf16.mxu1 %v4868_v50  ;;  %v1679_v50 = vld [vmem:[#allocation9 + $0xbe8] sm:$0xff]  ;;  %v4898_v0 = vpack.c.bf16 %v1676_v49, %v1674_v46  ;;  %v1700_v49 = vrot.slane %v1615_v39, 2 }
 0x2e7   : > { %v4900_v54 = vpack.c.bf16 %v1681_v53, %v1679_v50  ;;  %v1829_v50 = vld [vmem:[#allocation9 + $0xc88] sm:$0xff]  ;;  %v1831_v53 = vld [vmem:[#allocation9 + $0xc98] sm:$0xff] }
 0x2e9   : > { %4871 = vmatpush1.bf16.msra.mxu1 %v4870_v59  ;;  %v1680_v59 = vld [vmem:[#allocation9 + $0xbf0] sm:$0xff] }
 0x2ea   : > { %4873 = vmatprep.subr.bf16.mxu1 %v4872_v60  ;;  %v1813_v60 = vld [vmem:[#allocation9 + $0xc08] sm:$0xff]  ;;  %v4902_v62 = vpack.c.bf16 %v1680_v59, %v1678_v57  ;;  %v4920_v57 = vpack.c.bf16 %v1831_v53, %v1829_v50  ;;  %v1828_v59 = vld [vmem:[#allocation9 + $0xc80] sm:$0xff] }
 0x2eb   : > { %v4904_v10 = vpack.c.bf16 %v1815_v61, %v1813_v60  ;;  %v1830_v60 = vld [vmem:[#allocation9 + $0xc90] sm:$0xff]  ;;  %v1701_v61 = vsel %vm1117_vm11, %v6770_v35, %v1700_v49  ;;  %v1852_v53 = vld [vmem:[#allocation9 + $0xd40] sm:$0xff] }
 0x2ed   : > { %4875 = vmatpush1.bf16.msra.mxu1 %v4874_v63  ;;  %v1812_v63 = vld [vmem:[#allocation9 + $0xc00] sm:$0xff] }
 0x2ee   : > { %4877 = vmatprep.subr.bf16.mxu1 %v4876_v52  ;;  %v1814_v52 = vld [vmem:[#allocation9 + $0xc10] sm:$0xff] }
 0x2f1   : > { %4879 = vmatpush1.bf16.msra.mxu1 %v4878_v9  ;;  %v1686_v9 = vrot.slane %v1613_v58, 2  ;;  %v1835_v58 = vld [vmem:[#allocation9 + $0xcb8] sm:$0xff] }
 0x2f2   : > { %4881 = vmatprep.subr.bf16.mxu1 %v4880_v12  ;;  %v4906_v12 = vpack.c.bf16 %v1814_v52, %v1812_v63  ;;  %v1832_v52 = vld [vmem:[#allocation9 + $0xca0] sm:$0xff] }
 0x2f3   : > { %v1688_v19 = vsel %vm1117_vm11, %v1686_v9, %v1687_v6 }
 0x2f5   : > { %4883 = vmatpush1.bf16.msra.mxu1 %v4882_v30  ;;  %v6758_v30 = vrot.slane %v6710_v42, 2 }
 0x2f6   : > { %4885 = vmatprep.subr.bf16.mxu1 %v4884_v20  ;;  %v1821_v20 = vld [vmem:[#allocation9 + $0xc48] sm:$0xff] }
 0x2f7   : > { %v1693_v34 = vsel %vm1117_vm11, %v1687_v6, %v6758_v30  ;;  %v6781_v46 = vsel %vm1117_vm11, %v6758_v30, %v6770_v35  ;;  %v1834_v6 = vld [vmem:[#allocation9 + $0xcb0] sm:$0xff] }
 0x2f8   : > { %v4926_v9 = vpack.c.bf16 %v1834_v6, %v1832_v52  ;;  %v1860_v6 = vld [vmem:[#allocation9 + $0xd80] sm:$0xff] }
 0x2f9   : > { %4887 = vmatpush1.bf16.msra.mxu1 %v4886_v27  ;;  %v1616_v27 = vld [vmem:[#allocation2 + $0x58] sm:$0x3] }
 0x2fa   : > { %4889 = vmatprep.subr.bf16.mxu1 %v4888_v28  ;;  %v4912_v28 = vpack.c.bf16 %v1823_v21, %v1821_v20  ;;  %v1702_v38 = vrot.slane %v1616_v27, 2  ;;  %v1847_v27 = vld [vmem:[#allocation9 + $0xd18] sm:$0xff] }
 0x2fd   : > { %4891 = vmatpush1.bf16.msra.mxu1 %v4890_v36  ;;  %v1825_v36 = vld [vmem:[#allocation9 + $0xc68] sm:$0xff] }
 0x2fe   : > { %4893 = vmatprep.subr.bf16.mxu1 %v4892_v37  ;;  %v1827_v37 = vld [vmem:[#allocation9 + $0xc78] sm:$0xff] }
 0x2ff   : > { %v4916_v5 = vpack.c.bf16 %v1827_v37, %v1825_v36  ;;  %v1849_v36 = vld [vmem:[#allocation9 + $0xd28] sm:$0xff]  ;;  %v1851_v37 = vld [vmem:[#allocation9 + $0xd38] sm:$0xff] }
 0x300   : > { %v4940_v39 = vpack.c.bf16 %v1851_v37, %v1849_v36  ;;  %v1874_v36 = vld [vmem:[#allocation9 + $0xdf0] sm:$0xff]  ;;  %v1985_v37 = vld [vmem:[#allocation9 + $0xe08] sm:$0xff] }
 0x301   : > { %4895 = vmatpush1.bf16.msra.mxu1 %v4894_v43  ;;  %v1824_v43 = vld [vmem:[#allocation9 + $0xc60] sm:$0xff] }
 0x302   : > { %4897 = vmatprep.subr.bf16.mxu1 %v4896_v45  ;;  %v1826_v45 = vld [vmem:[#allocation9 + $0xc70] sm:$0xff] }
 0x305   : > { %4899 = vmatpush1.bf16.msra.mxu1 %v4898_v0  ;;  %v1703_v0 = vsel %vm1117_vm11, %v6765_v23, %v1702_v38 }
 0x306   : > { %4901 = vmatprep.subr.bf16.mxu1 %v4900_v54  ;;  %v4918_v54 = vpack.c.bf16 %v1826_v45, %v1824_v43  ;;  %v1853_v43 = vld [vmem:[#allocation9 + $0xd48] sm:$0xff]  ;;  %v1855_v45 = vld [vmem:[#allocation9 + $0xd58] sm:$0xff] }
 0x307   : > { %v4944_v50 = vpack.c.bf16 %v1855_v45, %v1853_v43  ;;  %v1986_v43 = vld [vmem:[#allocation9 + $0xe10] sm:$0xff]  ;;  %v1989_v45 = vld [vmem:[#allocation9 + $0xe28] sm:$0xff] }
 0x309   : > { %4903 = vmatpush1.bf16.msra.mxu1 %v4902_v62  ;;  %v1833_v62 = vld [vmem:[#allocation9 + $0xca8] sm:$0xff] }
 0x30a   : > { %4905 = vmatprep.subr.bf16.mxu1 %v4904_v10  ;;  %v4922_v10 = vpack.c.bf16 %v1830_v60, %v1828_v59  ;;  %v4924_v63 = vpack.c.bf16 %v1835_v58, %v1833_v62  ;;  %v1858_v62 = vld [vmem:[#allocation9 + $0xd70] sm:$0xff]  ;;  %v1861_v58 = vld [vmem:[#allocation9 + $0xd88] sm:$0xff] }
 0x30c   : > { %1777 = vmatmul.mubr.f32.vlgmr.msra.gmra.mrb[0].mxu1 %v1688_v19  ;;  %v1843_v19 = vld [vmem:[#allocation9 + $0xcf8] sm:$0xff] }
 0x30d   : > { %1782 = vmatprep.mubr.f32.mxu1 %v1695_v22  ;;  %4907 = vmatpush1.bf16.msra.mxu1 %v4906_v12  ;;  %v4928_v12 = vpack.c.bf16 %v1839_v8, %v1837_v7  ;;  %v4932_v21 = vpack.c.bf16 %v1843_v19, %v1841_v17  ;;  %v1842_v22 = vld [vmem:[#allocation9 + $0xcf0] sm:$0xff]  ;;  %v1865_v8 = vld [vmem:[#allocation9 + $0xda8] sm:$0xff] }
 0x30e   : > { %4909 = vmatprep.subr.bf16.mxu1 %v4908_v14  ;;  %v1836_v14 = vld [vmem:[#allocation9 + $0xcc0] sm:$0xff]  ;;  %v1862_v7 = vld [vmem:[#allocation9 + $0xd90] sm:$0xff]  ;;  %v1869_v19 = vld [vmem:[#allocation9 + $0xdc8] sm:$0xff] }
 0x30f   : > { %v4930_v20 = vpack.c.bf16 %v1838_v16, %v1836_v14  ;;  %v1864_v16 = vld [vmem:[#allocation9 + $0xda0] sm:$0xff]  ;;  %v1866_v17 = vld [vmem:[#allocation9 + $0xdb0] sm:$0xff] }
 0x310   : > { %1783 = vmatmul.mubr.f32.gmra.mrb[2].mxu1 %v1693_v34  ;;  %v1846_v34 = vld [vmem:[#allocation9 + $0xd10] sm:$0xff] }
 0x311   : > { %1788 = vmatprep.mubr.f32.mxu1 %v6775_v3  ;;  %4911 = vmatpush1.bf16.msra.mxu1 %v4910_v25  ;;  %v1845_v25 = vld [vmem:[#allocation9 + $0xd08] sm:$0xff]  ;;  %v4938_v38 = vpack.c.bf16 %v1846_v34, %v1844_v32  ;;  %v1872_v34 = vld [vmem:[#allocation9 + $0xde0] sm:$0xff] }
 0x312   : > { %4913 = vmatprep.subr.bf16.mxu1 %v4912_v28  ;;  %v4936_v31 = vpack.c.bf16 %v1847_v27, %v1845_v25  ;;  %v1870_v25 = vld [vmem:[#allocation9 + $0xdd0] sm:$0xff]  ;;  %v1873_v27 = vld [vmem:[#allocation9 + $0xde8] sm:$0xff] }
 0x314   : > { %1789 = vmatmul.mubr.f32.gmra.mrb[4].mxu1 %v6781_v46 }
 0x315   : > { %1794 = vmatprep.mubr.f32.mxu1 %v1703_v0  ;;  %4915 = vmatpush1.bf16.msra.mxu1 %v4914_v40  ;;  %v1848_v40 = vld [vmem:[#allocation9 + $0xd20] sm:$0xff]  ;;  %v1854_v0 = vld [vmem:[#allocation9 + $0xd50] sm:$0xff] }
 0x316   : > { %4917 = vmatprep.subr.bf16.mxu1 %v4916_v5  ;;  %v1850_v5 = vld [vmem:[#allocation9 + $0xd30] sm:$0xff]  ;;  %v4946_v59 = vpack.c.bf16 %v1854_v0, %v1852_v53  ;;  %v1988_v0 = vld [vmem:[#allocation9 + $0xe20] sm:$0xff] }
 0x317   : > { %v4942_v49 = vpack.c.bf16 %v1850_v5, %v1848_v40  ;;  %v1984_v5 = vld [vmem:[#allocation9 + $0xe00] sm:$0xff] }
 0x318   : > { %1795 = vmatmul.mubr.f32.gmra.mrb[6].mxu1 %v1701_v61  ;;  %v1856_v61 = vld [vmem:[#allocation9 + $0xd60] sm:$0xff] }
 0x319   : > { %4919 = vmatpush1.bf16.msra.mxu1 %v4918_v54  ;;  %1940 = vmatprep.mubr.f32.mxu1 %v6693_v2  ;;  %v1840_v2 = vld [vmem:[#allocation9 + $0xce0] sm:$0xff]  ;;  %v1857_v54 = vld [vmem:[#allocation9 + $0xd68] sm:$0xff] }
 0x31a   : > { %4921 = vmatprep.subr.bf16.mxu1 %v4920_v57  ;;  %v4934_v28 = vpack.c.bf16 %v1842_v22, %v1840_v2  ;;  %v1859_v57 = vld [vmem:[#allocation9 + $0xd78] sm:$0xff]  ;;  %v1868_v22 = vld [vmem:[#allocation9 + $0xdc0] sm:$0xff] }
 0x31b   : > { %v4948_v60 = vpack.c.bf16 %v1859_v57, %v1857_v54  ;;  %v1990_v54 = vld [vmem:[#allocation9 + $0xe30] sm:$0xff]  ;;  %v1993_v57 = vld [vmem:[#allocation9 + $0xe48] sm:$0xff] }
 0x31d   : > { %4923 = vmatpush1.bf16.msra.mxu1 %v4922_v10  ;;  %v1863_v10 = vld [vmem:[#allocation9 + $0xd98] sm:$0xff] }
 0x31e   : > { %4925 = vmatprep.subr.bf16.mxu1 %v4924_v63  ;;  %v4950_v63 = vpack.c.bf16 %v1858_v62, %v1856_v61  ;;  %v4952_v52 = vpack.c.bf16 %v1863_v10, %v1861_v58  ;;  %v1992_v62 = vld [vmem:[#allocation9 + $0xe40] sm:$0xff]  ;;  %v1994_v58 = vld [vmem:[#allocation9 + $0xe50] sm:$0xff]  ;;  %v1997_v10 = vld [vmem:[#allocation9 + $0xe68] sm:$0xff] }
 0x321   : > { %4927 = vmatpush1.bf16.msra.mxu1 %v4926_v9  ;;  %v1867_v9 = vld [vmem:[#allocation9 + $0xdb8] sm:$0xff] }
 0x322   : > { %4929 = vmatprep.subr.bf16.mxu1 %v4928_v12  ;;  %v4954_v12 = vpack.c.bf16 %v1862_v7, %v1860_v6  ;;  %v4956_v14 = vpack.c.bf16 %v1867_v9, %v1865_v8  ;;  %v1996_v7 = vld [vmem:[#allocation9 + $0xe60] sm:$0xff]  ;;  %v2003_v9 = vld [vmem:[#allocation9 + $0xe98] sm:$0xff] }
 0x323   : > { %v1974_v8 = vld [vmem:[#allocation2 + $0x28] sm:$0xfe] }
 0x325   : > { %4931 = vmatpush1.bf16.msra.mxu1 %v4930_v20  ;;  %v1871_v20 = vld [vmem:[#allocation9 + $0xdd8] sm:$0xff] }
 0x326   : > { %4933 = vmatprep.subr.bf16.mxu1 %v4932_v21  ;;  %v4958_v21 = vpack.c.bf16 %v1866_v17, %v1864_v16  ;;  %v4960_v2 = vpack.c.bf16 %v1871_v20, %v1869_v19  ;;  %v2000_v16 = vld [vmem:[#allocation9 + $0xe80] sm:$0xff]  ;;  %v2002_v17 = vld [vmem:[#allocation9 + $0xe90] sm:$0xff]  ;;  %v2005_v20 = vld [vmem:[#allocation9 + $0xea8] sm:$0xff] }
 0x327   : > { %v6797_v19 = vld [vmem:[#allocation2 + $0x50] sm:$0xff] }
 0x329   : > { %4935 = vmatpush1.bf16.msra.mxu1 %v4934_v28  ;;  %v1875_v28 = vld [vmem:[#allocation9 + $0xdf8] sm:$0xff] }
 0x32a   : > { %4937 = vmatprep.subr.bf16.mxu1 %v4936_v31  ;;  %v4962_v31 = vpack.c.bf16 %v1870_v25, %v1868_v22  ;;  %v4964_v32 = vpack.c.bf16 %v1875_v28, %v1873_v27  ;;  %v2006_v22 = vld [vmem:[#allocation9 + $0xeb0] sm:$0xff]  ;;  %v2535_v27 = vld [vmem:[#allocation12 + $0x218] sm:$0xff]  ;;  %v2532_v28 = vld [vmem:[#allocation12 + $0x200] sm:$0xff] }
 0x32b   : > { %v2533_v25 = vld [vmem:[#allocation12 + $0x208] sm:$0xff] }
 0x32d   : > { %4939 = vmatpush1.bf16.msra.mxu1 %v4938_v38  ;;  %v1987_v38 = vld [vmem:[#allocation9 + $0xe18] sm:$0xff] }
 0x32e   : > { %4941 = vmatprep.subr.bf16.mxu1 %v4940_v39  ;;  %v4966_v39 = vpack.c.bf16 %v1874_v36, %v1872_v34  ;;  %v4968_v40 = vpack.c.bf16 %v1987_v38, %v1985_v37  ;;  %v2534_v34 = vld [vmem:[#allocation12 + $0x210] sm:$0xff]  ;;  %v2537_v36 = vld [vmem:[#allocation12 + $0x228] sm:$0xff]  ;;  %v2539_v37 = vld [vmem:[#allocation12 + $0x238] sm:$0xff] }
 0x331   : > { %4943 = vmatpush1.bf16.msra.mxu1 %v4942_v49  ;;  %v1991_v49 = vld [vmem:[#allocation9 + $0xe38] sm:$0xff] }
 0x332   : > { %4945 = vmatprep.subr.bf16.mxu1 %v4944_v50  ;;  %v4970_v50 = vpack.c.bf16 %v1986_v43, %v1984_v5  ;;  %v4972_v53 = vpack.c.bf16 %v1991_v49, %v1989_v45  ;;  %v2536_v5 = vld [vmem:[#allocation12 + $0x220] sm:$0xff]  ;;  %v2538_v43 = vld [vmem:[#allocation12 + $0x230] sm:$0xff]  ;;  %v2541_v45 = vld [vmem:[#allocation12 + $0x248] sm:$0xff] }
 0x333   : > { %v2011_v49 = vld [vmem:[#allocation9 + $0xed8] sm:$0xff] }
 0x335   : > { %4947 = vmatpush1.bf16.msra.mxu1 %v4946_v59  ;;  %v1995_v59 = vld [vmem:[#allocation9 + $0xe58] sm:$0xff] }
 0x336   : > { %4949 = vmatprep.subr.bf16.mxu1 %v4948_v60  ;;  %v4974_v60 = vpack.c.bf16 %v1990_v54, %v1988_v0  ;;  %v4976_v61 = vpack.c.bf16 %v1995_v59, %v1993_v57  ;;  %v2008_v54 = vld [vmem:[#allocation9 + $0xec0] sm:$0xff] }
 0x337   : > { %v2540_v59 = vld [vmem:[#allocation12 + $0x240] sm:$0xff] }
 0x339   : > { %4951 = vmatpush1.bf16.msra.mxu1 %v4950_v63  ;;  %v1999_v63 = vld [vmem:[#allocation9 + $0xe78] sm:$0xff] }
 0x33a   : > { %4953 = vmatprep.subr.bf16.mxu1 %v4952_v52  ;;  %v4978_v52 = vpack.c.bf16 %v1994_v58, %v1992_v62  ;;  %v4980_v6 = vpack.c.bf16 %v1999_v63, %v1997_v10  ;;  %v2010_v62 = vld [vmem:[#allocation9 + $0xed0] sm:$0xff]  ;;  %v2547_v10 = vld [vmem:[#allocation12 + $0x278] sm:$0xff]  ;;  %v2013_v63 = vld [vmem:[#allocation9 + $0xee8] sm:$0xff] }
 0x33b   : > { %v2545_v58 = vld [vmem:[#allocation12 + $0x268] sm:$0xff] }
 0x33d   : > { %4955 = vmatpush1.bf16.msra.mxu1 %v4954_v12  ;;  %v6794_v12 = vld [vmem:[#allocation2 + $0x58] sm:$0xff] }
 0x33e   : > { %4957 = vmatprep.subr.bf16.mxu1 %v4956_v14 }
 0x341   : > { %4959 = vmatpush1.bf16.msra.mxu1 %v4958_v21  ;;  %v2007_v21 = vld [vmem:[#allocation9 + $0xeb8] sm:$0xff] }
 0x342   : > { %4961 = vmatprep.subr.bf16.mxu1 %v4960_v2  ;;  %v2004_v2 = vld [vmem:[#allocation9 + $0xea0] sm:$0xff]  ;;  %v4988_v38 = vpack.c.bf16 %v2007_v21, %v2005_v20  ;;  %v2019_v20 = vld [vmem:[#allocation9 + $0xf18] sm:$0xff] }
 0x343   : > { %v4990_v0 = vpack.c.bf16 %v2006_v22, %v2004_v2  ;;  %v2016_v2 = vld [vmem:[#allocation9 + $0xf00] sm:$0xff] }
 0x345   : > { %4963 = vmatpush1.bf16.msra.mxu1 %v4962_v31  ;;  %v4986_v31 = vpack.c.bf16 %v2002_v17, %v2000_v16  ;;  %v2551_v16 = vld [vmem:[#allocation12 + $0x298] sm:$0xff]  ;;  %v2017_v17 = vld [vmem:[#allocation9 + $0xf08] sm:$0xff] }
 0x346   : > { %4965 = vmatprep.subr.bf16.mxu1 %v4964_v32  ;;  %v5096_v32 = vpack.c.bf16 %v2535_v27, %v2533_v25  ;;  %v2548_v25 = vld [vmem:[#allocation12 + $0x280] sm:$0xff]  ;;  %v2550_v27 = vld [vmem:[#allocation12 + $0x290] sm:$0xff] }
 0x348   : > { %5097 = vmatprep.subr.bf16.mxu0 %v5096_v32  ;;  %v2553_v32 = vld [vmem:[#allocation12 + $0x2a8] sm:$0xff] }
 0x349   : > { %4967 = vmatpush1.bf16.msra.mxu1 %v4966_v39  ;;  %v5098_v39 = vpack.c.bf16 %v2534_v34, %v2532_v28  ;;  %v5000_v28 = vpack.c.bf16 %v2019_v20, %v2017_v17  ;;  %v2555_v34 = vld [vmem:[#allocation12 + $0x2b8] sm:$0xff]  ;;  %v2030_v17 = vld [vmem:[#allocation9 + $0xf70] sm:$0xff] }
 0x34a   : > { %4969 = vmatprep.subr.bf16.mxu1 %v4968_v40  ;;  %v5100_v40 = vpack.c.bf16 %v2539_v37, %v2537_v36  ;;  %v2021_v36 = vld [vmem:[#allocation9 + $0xf28] sm:$0xff]  ;;  %v2023_v37 = vld [vmem:[#allocation9 + $0xf38] sm:$0xff] }
 0x34b   : > { %5099 = vmatpush1.bf16.msra.mxu0 %v5098_v39  ;;  %v2565_v20 = vld [vmem:[#allocation12 + $0x308] sm:$0xff] }
 0x34c   : > { %1941 = vmatmul.mubr.f32.vlgmr.msra.gmra.mrb[0].mxu1 %v6702_v24  ;;  %v1998_v24 = vld [vmem:[#allocation9 + $0xe70] sm:$0xff]  ;;  %5101 = vmatprep.subr.bf16.mxu0 %v5100_v40  ;;  %v2020_v40 = vld [vmem:[#allocation9 + $0xf20] sm:$0xff] }
 0x34d   : > { %1946 = vmatprep.mubr.f32.mxu1 %v6704_v33  ;;  %4971 = vmatpush1.bf16.msra.mxu1 %v4970_v50  ;;  %v2001_v33 = vld [vmem:[#allocation9 + $0xe88] sm:$0xff]  ;;  %v4982_v14 = vpack.c.bf16 %v1998_v24, %v1996_v7  ;;  %v2543_v50 = vld [vmem:[#allocation12 + $0x258] sm:$0xff]  ;;  %v4994_v7 = vpack.c.bf16 %v2010_v62, %v2008_v54 }
 0x34e   : > { %4973 = vmatprep.subr.bf16.mxu1 %v4972_v53  ;;  %v5102_v53 = vpack.c.bf16 %v2538_v43, %v2536_v5  ;;  %v5104_v57 = vpack.c.bf16 %v2543_v50, %v2541_v45  ;;  %v2012_v24 = vld [vmem:[#allocation9 + $0xee0] sm:$0xff]  ;;  %v5116_v5 = vpack.c.bf16 %v2555_v34, %v2553_v32  ;;  %v2554_v45 = vld [vmem:[#allocation12 + $0x2b0] sm:$0xff]  ;;  %v2557_v50 = vld [vmem:[#allocation12 + $0x2c8] sm:$0xff] }
 0x34f   : > { %v2552_v43 = vld [vmem:[#allocation12 + $0x2a0] sm:$0xff]  ;;  %v2027_v54 = vld [vmem:[#allocation9 + $0xf58] sm:$0xff] }
 0x350   : > { %1947 = vmatmul.mubr.f32.gmra.mrb[2].mxu1 %v6710_v42  ;;  %v2061_v42 = vrot.slane %v1974_v8, 1  ;;  %5103 = vmatpush1.bf16.msra.mxu0 %v5102_v53  ;;  %v5108_v8 = vpack.c.bf16 %v2547_v10, %v2545_v58  ;;  %v2559_v53 = vld [vmem:[#allocation12 + $0x2d8] sm:$0xff]  ;;  %v2556_v62 = vld [vmem:[#allocation12 + $0x2c0] sm:$0xff]  ;;  %v2558_v58 = vld [vmem:[#allocation12 + $0x2d0] sm:$0xff] }
 0x351   : > { %1952 = vmatprep.mubr.f32.mxu1 %v6712_v44  ;;  %4975 = vmatpush1.bf16.msra.mxu1 %v4974_v60  ;;  %v4984_v44 = vpack.c.bf16 %v2003_v9, %v2001_v33  ;;  %v2542_v60 = vld [vmem:[#allocation12 + $0x250] sm:$0xff]  ;;  %v2544_v33 = vld [vmem:[#allocation12 + $0x260] sm:$0xff] }
 0x352   : > { %4977 = vmatprep.subr.bf16.mxu1 %v4976_v61  ;;  %5105 = vmatprep.subr.bf16.mxu0 %v5104_v57  ;;  %v2546_v9 = vld [vmem:[#allocation12 + $0x270] sm:$0xff]  ;;  %v5118_v57 = vpack.c.bf16 %v2554_v45, %v2552_v43  ;;  %v2036_v45 = vld [vmem:[#allocation9 + $0xfa0] sm:$0xff] }
 0x353   : > { %v5110_v21 = vpack.c.bf16 %v2546_v9, %v2544_v33  ;;  %v2028_v9 = vld [vmem:[#allocation9 + $0xf60] sm:$0xff]  ;;  %v2566_v32 = vld [vmem:[#allocation12 + $0x310] sm:$0xff] }
 0x354   : > { %1953 = vmatmul.mubr.f32.gmra.mrb[4].mxu1 %v6725_v56  ;;  %v2063_v56 = vsel %vm839_vm10, %v2061_v42, %v6708_v41  ;;  %v2009_v41 = vld [vmem:[#allocation9 + $0xec8] sm:$0xff]  ;;  %v2014_v42 = vld [vmem:[#allocation9 + $0xef0] sm:$0xff] }
 0x355   : > { %1958 = vmatprep.mubr.f32.mxu1 %v6794_v12  ;;  %4979 = vmatpush1.bf16.msra.mxu1 %v4978_v52  ;;  %v4992_v61 = vpack.c.bf16 %v2011_v49, %v2009_v41  ;;  %v2015_v52 = vld [vmem:[#allocation9 + $0xef8] sm:$0xff]  ;;  %v5004_v41 = vpack.c.bf16 %v2023_v37, %v2021_v36  ;;  %v2022_v49 = vld [vmem:[#allocation9 + $0xf30] sm:$0xff] }
 0x356   : > { %4981 = vmatprep.subr.bf16.mxu1 %v4980_v6  ;;  %v5106_v6 = vpack.c.bf16 %v2542_v60, %v2540_v59  ;;  %v5006_v59 = vpack.c.bf16 %v2022_v49, %v2020_v40  ;;  %v2024_v60 = vld [vmem:[#allocation9 + $0xf40] sm:$0xff]  ;;  %v2034_v36 = vld [vmem:[#allocation9 + $0xf90] sm:$0xff]  ;;  %v2039_v40 = vld [vmem:[#allocation9 + $0xfb8] sm:$0xff] }
 0x357   : > { %v2569_v37 = vld [vmem:[#allocation12 + $0x328] sm:$0xff]  ;;  %v2568_v49 = vld [vmem:[#allocation12 + $0x320] sm:$0xff] }
 0x358   : > { %1959 = vmatmul.mubr.f32.gmra.mrb[6].mxu1 %v6797_v19  ;;  %5107 = vmatpush1.bf16.msra.mxu0 %v5106_v6  ;;  %v2563_v6 = vld [vmem:[#allocation12 + $0x2f8] sm:$0xff] }
 0x359   : > { %4983 = vmatpush1.bf16.msra.mxu1 %v4982_v14  ;;  %2148 = vmatprep.mubr.f32.mxu1 %v2063_v56  ;;  %v4996_v14 = vpack.c.bf16 %v2015_v52, %v2013_v63  ;;  %v4998_v56 = vpack.c.bf16 %v2014_v42, %v2012_v24  ;;  %v2026_v63 = vld [vmem:[#allocation9 + $0xf50] sm:$0xff]  ;;  %v2031_v24 = vld [vmem:[#allocation9 + $0xf78] sm:$0xff]  ;;  %v2560_v42 = vld [vmem:[#allocation12 + $0x2e0] sm:$0xff] }
 0x35a   : > { %4985 = vmatprep.subr.bf16.mxu1 %v4984_v44  ;;  %v2549_v44 = vld [vmem:[#allocation12 + $0x288] sm:$0xff]  ;;  %5109 = vmatprep.subr.bf16.mxu0 %v5108_v8  ;;  %v5122_v8 = vpack.c.bf16 %v2558_v58, %v2556_v62  ;;  %v5010_v33 = vpack.c.bf16 %v2026_v63, %v2024_v60  ;;  %v2043_v60 = vld [vmem:[#allocation9 + $0xfd8] sm:$0xff] }
 0x35b   : > { %v5112_v22 = vpack.c.bf16 %v2551_v16, %v2549_v44  ;;  %v2561_v52 = vld [vmem:[#allocation12 + $0x2e8] sm:$0xff]  ;;  %v2562_v44 = vld [vmem:[#allocation12 + $0x2f0] sm:$0xff] }
 0x35c   : > { %5111 = vmatpush1.bf16.msra.mxu0 %v5110_v21  ;;  %v2567_v21 = vld [vmem:[#allocation12 + $0x318] sm:$0xff]  ;;  %v2574_v63 = vld [vmem:[#allocation12 + $0x350] sm:$0xff] }
 0x35d   : > { %4987 = vmatpush1.bf16.msra.mxu1 %v4986_v31  ;;  %v2018_v31 = vld [vmem:[#allocation9 + $0xf10] sm:$0xff]  ;;  %5113 = vmatprep.subr.bf16.mxu0 %v5112_v22  ;;  %v5126_v22 = vpack.c.bf16 %v2562_v44, %v2560_v42  ;;  %v2044_v42 = vld [vmem:[#allocation9 + $0xfe0] sm:$0xff] }
 0x35e   : > { %4989 = vmatprep.subr.bf16.mxu1 %v4988_v38  ;;  %v5114_v38 = vpack.c.bf16 %v2550_v27, %v2548_v25  ;;  %v5002_v39 = vpack.c.bf16 %v2018_v31, %v2016_v2  ;;  %v2035_v2 = vld [vmem:[#allocation9 + $0xf98] sm:$0xff]  ;;  %v5014_v25 = vpack.c.bf16 %v2030_v17, %v2028_v9  ;;  %v2032_v27 = vld [vmem:[#allocation9 + $0xf80] sm:$0xff]  ;;  %v2046_v44 = vld [vmem:[#allocation9 + $0xff0] sm:$0xff] }
 0x35f   : > { %v2564_v31 = vld [vmem:[#allocation12 + $0x300] sm:$0xff]  ;;  %v5018_v43 = vpack.c.bf16 %v2034_v36, %v2032_v27  ;;  %v2189_v17 = vld [vmem:[#allocation9 + $0x1018] sm:$0xff]  ;;  %v2192_v36 = vld [vmem:[#allocation9 + $0x1030] sm:$0xff] }
 0x360   : > { %5115 = vmatpush1.bf16.msra.mxu0 %v5114_v38  ;;  %v2571_v38 = vld [vmem:[#allocation12 + $0x338] sm:$0xff] }
 0x361   : > { %4991 = vmatpush1.bf16.msra.mxu1 %v4990_v0  ;;  %v2025_v0 = vld [vmem:[#allocation9 + $0xf48] sm:$0xff]  ;;  %5117 = vmatprep.subr.bf16.mxu0 %v5116_v5  ;;  %v5130_v5 = vpack.c.bf16 %v2566_v32, %v2564_v31  ;;  %v2193_v27 = vld [vmem:[#allocation9 + $0x1038] sm:$0xff] }
 0x362   : > { %4993 = vmatprep.subr.bf16.mxu1 %v4992_v61  ;;  %v5120_v61 = vpack.c.bf16 %v2559_v53, %v2557_v50  ;;  %v5008_v10 = vpack.c.bf16 %v2027_v54, %v2025_v0  ;;  %v2570_v50 = vld [vmem:[#allocation12 + $0x330] sm:$0xff]  ;;  %v2573_v54 = vld [vmem:[#allocation12 + $0x348] sm:$0xff] }
 0x363   : > { %v2038_v0 = vld [vmem:[#allocation9 + $0xfb0] sm:$0xff] }
 0x364   : > { %5119 = vmatpush1.bf16.msra.mxu0 %v5118_v57  ;;  %v2575_v57 = vld [vmem:[#allocation12 + $0x358] sm:$0xff]  ;;  %v5022_v62 = vpack.c.bf16 %v2038_v0, %v2036_v45 }
 0x365   : > { %4995 = vmatpush1.bf16.msra.mxu1 %v4994_v7  ;;  %v2029_v7 = vld [vmem:[#allocation9 + $0xf68] sm:$0xff]  ;;  %5121 = vmatprep.subr.bf16.mxu0 %v5120_v61  ;;  %v5134_v61 = vpack.c.bf16 %v2570_v50, %v2568_v49  ;;  %v5136_v58 = vpack.c.bf16 %v2575_v57, %v2573_v54  ;;  %v2196_v49 = vld [vmem:[#allocation9 + $0x1050] sm:$0xff]  ;;  %v2068_v50 = vrot.slane %v6797_v19, 1  ;;  %v2201_v0 = vld [vmem:[#allocation9 + $0x1078] sm:$0xff] }
 0x366   : > { %4997 = vmatprep.subr.bf16.mxu1 %v4996_v14  ;;  %v5124_v14 = vpack.c.bf16 %v2563_v6, %v2561_v52  ;;  %v5012_v16 = vpack.c.bf16 %v2031_v24, %v2029_v7  ;;  %v2040_v6 = vld [vmem:[#allocation9 + $0xfc0] sm:$0xff]  ;;  %v2042_v7 = vld [vmem:[#allocation9 + $0xfd0] sm:$0xff]  ;;  %v2045_v24 = vld [vmem:[#allocation9 + $0xfe8] sm:$0xff] }
 0x367   : > { %v5026_v9 = vpack.c.bf16 %v2042_v7, %v2040_v6  ;;  %v1981_v57 = vld [vmem:[#allocation2 + $0x60] sm:$0x1] }
 0x368   : > { %5123 = vmatpush1.bf16.msra.mxu0 %v5122_v8  ;;  %v2047_v8 = vld [vmem:[#allocation9 + $0xff8] sm:$0xff] }
 0x369   : > { %4999 = vmatpush1.bf16.msra.mxu1 %v4998_v56  ;;  %v2033_v56 = vld [vmem:[#allocation9 + $0xf88] sm:$0xff]  ;;  %5125 = vmatprep.subr.bf16.mxu0 %v5124_v14  ;;  %v5028_v14 = vpack.c.bf16 %v2047_v8, %v2045_v24  ;;  %v2202_v24 = vld [vmem:[#allocation9 + $0x1080] sm:$0xff]  ;;  %v2204_v8 = vld [vmem:[#allocation9 + $0x1090] sm:$0xff] }
 0x36a   : > { %5001 = vmatprep.subr.bf16.mxu1 %v5000_v28  ;;  %v5128_v28 = vpack.c.bf16 %v2567_v21, %v2565_v20  ;;  %v5016_v34 = vpack.c.bf16 %v2035_v2, %v2033_v56  ;;  %v5030_v20 = vpack.c.bf16 %v2046_v44, %v2044_v42  ;;  %v1973_v21 = vld [vmem:[#allocation2 + $0x20] sm:$0xfe]  ;;  %v5050_v42 = vpack.c.bf16 %v2204_v8, %v2202_v24  ;;  %v2236_v24 = vld [vmem:[#allocation9 + $0x1190] sm:$0xff]  ;;  %v2239_v8 = vld [vmem:[#allocation9 + $0x11a8] sm:$0xff] }
 0x36b   : > { %v2186_v2 = vld [vmem:[#allocation9 + $0x1000] sm:$0xff] }
 0x36c   : > { %5127 = vmatpush1.bf16.msra.mxu0 %v5126_v22  ;;  %v2188_v22 = vld [vmem:[#allocation9 + $0x1010] sm:$0xff] }
 0x36d   : > { %5003 = vmatpush1.bf16.msra.mxu1 %v5002_v39  ;;  %v2037_v39 = vld [vmem:[#allocation9 + $0xfa8] sm:$0xff]  ;;  %5129 = vmatprep.subr.bf16.mxu0 %v5128_v28  ;;  %v2058_v28 = vrot.slane %v1973_v21, 1  ;;  %v5034_v31 = vpack.c.bf16 %v2188_v22, %v2186_v2  ;;  %v2213_v21 = vld [vmem:[#allocation9 + $0x10d8] sm:$0xff]  ;;  %v2210_v22 = vld [vmem:[#allocation9 + $0x10c0] sm:$0xff] }
 0x36e   : > { %5005 = vmatprep.subr.bf16.mxu1 %v5004_v41  ;;  %v5132_v41 = vpack.c.bf16 %v2571_v38, %v2569_v37  ;;  %v5020_v53 = vpack.c.bf16 %v2039_v40, %v2037_v39  ;;  %v2195_v38 = vld [vmem:[#allocation9 + $0x1048] sm:$0xff]  ;;  %v2197_v39 = vld [vmem:[#allocation9 + $0x1058] sm:$0xff]  ;;  %v2070_v40 = vrot.slane %v6794_v12, 1 }
 0x36f   : > { %v2060_v37 = vsel %vm839_vm10, %v2058_v28, %v6716_v51  ;;  %v5040_v45 = vpack.c.bf16 %v2197_v39, %v2195_v38  ;;  %v2217_v28 = vld [vmem:[#allocation9 + $0x10f8] sm:$0xff] }
 0x370   : > { %5131 = vmatpush1.bf16.msra.mxu0 %v5130_v5  ;;  %v2071_v51 = vsel %vm839_vm10, %v6723_v55, %v2070_v40 }
 0x371   : > { %5007 = vmatpush1.bf16.msra.mxu1 %v5006_v59  ;;  %v2041_v59 = vld [vmem:[#allocation9 + $0xfc8] sm:$0xff]  ;;  %5133 = vmatprep.subr.bf16.mxu0 %v5132_v41  ;;  %v2194_v41 = vld [vmem:[#allocation9 + $0x1040] sm:$0xff] }
 0x372   : > { %5009 = vmatprep.subr.bf16.mxu1 %v5008_v10  ;;  %v2572_v10 = vld [vmem:[#allocation12 + $0x340] sm:$0xff]  ;;  %v5024_v52 = vpack.c.bf16 %v2043_v60, %v2041_v59 }
 0x373   : > { %v2198_v60 = vld [vmem:[#allocation9 + $0x1060] sm:$0xff] }
 0x374   : > { %5135 = vmatpush1.bf16.msra.mxu0 %v5134_v61  ;;  %v2200_v61 = vld [vmem:[#allocation9 + $0x1070] sm:$0xff] }
 0x375   : > { %5011 = vmatpush1.bf16.msra.mxu1 %v5010_v33  ;;  %v5138_v33 = vpack.c.bf16 %v2574_v63, %v2572_v10  ;;  %5137 = vmatprep.subr.bf16.mxu0 %v5136_v58  ;;  %v2072_v58 = vrot.slane %v1981_v57, 1  ;;  %v2182_v10 = vld [vmem:[#allocation2 + $0x28] sm:$0xfc]  ;;  %v5046_v55 = vpack.c.bf16 %v2200_v61, %v2198_v60  ;;  %v2233_v61 = vld [vmem:[#allocation9 + $0x1178] sm:$0xff] }
 0x376   : > { %5013 = vmatprep.subr.bf16.mxu1 %v5012_v16  ;;  %v2187_v16 = vld [vmem:[#allocation9 + $0x1008] sm:$0xff]  ;;  %v2257_v6 = vrot.slane %v2182_v10, 2  ;;  %v2230_v10 = vld [vmem:[#allocation9 + $0x1160] sm:$0xff] }
 0x377   : > { %v5032_v56 = vpack.c.bf16 %v2189_v17, %v2187_v16  ;;  %v2203_v63 = vld [vmem:[#allocation9 + $0x1088] sm:$0xff]  ;;  %v2206_v16 = vld [vmem:[#allocation9 + $0x10a0] sm:$0xff]  ;;  %v2208_v17 = vld [vmem:[#allocation9 + $0x10b0] sm:$0xff] }
 0x378   : > { %5139 = vmatpush1.bf16.msra.mxu0 %v5138_v33  ;;  %v2073_v33 = vsel %vm839_vm10, %v2068_v50, %v2072_v58  ;;  %v2231_v60 = vld [vmem:[#allocation9 + $0x1168] sm:$0xff] }
 0x379   : > { %5015 = vmatpush1.bf16.msra.mxu1 %v5014_v25  ;;  %v2191_v25 = vld [vmem:[#allocation9 + $0x1028] sm:$0xff]  ;;  %v5076_v58 = vpack.c.bf16 %v2233_v61, %v2231_v60 }
 0x37a   : > { %5017 = vmatprep.subr.bf16.mxu1 %v5016_v34  ;;  %v5036_v32 = vpack.c.bf16 %v2193_v27, %v2191_v25  ;;  %v2190_v34 = vld [vmem:[#allocation9 + $0x1020] sm:$0xff]  ;;  %v2212_v25 = vld [vmem:[#allocation9 + $0x10d0] sm:$0xff]  ;;  %v2215_v27 = vld [vmem:[#allocation9 + $0x10e8] sm:$0xff] }
 0x37b   : > { %v5038_v5 = vpack.c.bf16 %v2192_v36, %v2190_v34  ;;  %v2216_v34 = vld [vmem:[#allocation9 + $0x10f0] sm:$0xff]  ;;  %v2219_v36 = vld [vmem:[#allocation9 + $0x1108] sm:$0xff] }
 0x37c   : > { %v2584_v61 = vld [vmem:[#allocation12 + $0x3a0] sm:$0xff] }
 0x37d   : > { %5019 = vmatpush1.bf16.msra.mxu1 %v5018_v43  ;;  %v1982_v43 = vld [vmem:[#allocation2 + $0x68] sm:$0x1] }
 0x37e   : > { %5021 = vmatprep.subr.bf16.mxu1 %v5020_v53  ;;  %v2199_v53 = vld [vmem:[#allocation9 + $0x1068] sm:$0xff]  ;;  %v2074_v54 = vrot.slane %v1982_v43, 1 }
 0x37f   : > { %v5044_v59 = vpack.c.bf16 %v2201_v0, %v2199_v53  ;;  %v2223_v43 = vld [vmem:[#allocation9 + $0x1128] sm:$0xff]  ;;  %v2224_v53 = vld [vmem:[#allocation9 + $0x1130] sm:$0xff] }
 0x380   : > { %v2227_v0 = vld [vmem:[#allocation9 + $0x1148] sm:$0xff] }
 0x381   : > { %5023 = vmatpush1.bf16.msra.mxu1 %v5022_v62  ;;  %v2069_v62 = vsel %vm839_vm10, %v6730_v1, %v2068_v50  ;;  %v2259_v1 = vsel %vm1117_vm11, %v2257_v6, %v6754_v48  ;;  %v5060_v48 = vpack.c.bf16 %v2217_v28, %v2215_v27  ;;  %v2222_v50 = vld [vmem:[#allocation9 + $0x1120] sm:$0xff] }
 0x382   : > { %5025 = vmatprep.subr.bf16.mxu1 %v5024_v52  ;;  %v2205_v52 = vld [vmem:[#allocation9 + $0x1098] sm:$0xff]  ;;  %v2246_v28 = vld [vmem:[#allocation9 + $0x11e0] sm:$0xff] }
 0x383   : > { %v5048_v7 = vpack.c.bf16 %v2205_v52, %v2203_v63  ;;  %v2232_v63 = vld [vmem:[#allocation9 + $0x1170] sm:$0xff]  ;;  %v2235_v52 = vld [vmem:[#allocation9 + $0x1188] sm:$0xff] }
 0x385   : > { %5027 = vmatpush1.bf16.msra.mxu1 %v5026_v9  ;;  %v2207_v9 = vld [vmem:[#allocation9 + $0x10a8] sm:$0xff] }
 0x386   : > { %5029 = vmatprep.subr.bf16.mxu1 %v5028_v14  ;;  %v2209_v14 = vld [vmem:[#allocation9 + $0x10b8] sm:$0xff] }
 0x387   : > { %v5052_v44 = vpack.c.bf16 %v2209_v14, %v2207_v9 }
 0x389   : > { %5031 = vmatpush1.bf16.msra.mxu1 %v5030_v20  ;;  %v2211_v20 = vld [vmem:[#allocation9 + $0x10c8] sm:$0xff] }
 0x38a   : > { %5033 = vmatprep.subr.bf16.mxu1 %v5032_v56  ;;  %v5054_v56 = vpack.c.bf16 %v2208_v17, %v2206_v16  ;;  %v5056_v2 = vpack.c.bf16 %v2213_v21, %v2211_v20  ;;  %v2245_v16 = vld [vmem:[#allocation9 + $0x11d8] sm:$0xff]  ;;  %v2242_v21 = vld [vmem:[#allocation9 + $0x11c0] sm:$0xff] }
 0x38c   : > { %2149 = vmatmul.mubr.f32.vlgmr.msra.gmra.mrb[0].mxu1 %v2060_v37  ;;  %v2221_v37 = vld [vmem:[#allocation9 + $0x1118] sm:$0xff] }
 0x38d   : > { %2154 = vmatprep.mubr.f32.mxu1 %v6735_v4  ;;  %5035 = vmatpush1.bf16.msra.mxu1 %v5034_v31  ;;  %v5042_v4 = vpack.c.bf16 %v2196_v49, %v2194_v41  ;;  %v5058_v31 = vpack.c.bf16 %v2212_v25, %v2210_v22  ;;  %v5064_v39 = vpack.c.bf16 %v2221_v37, %v2219_v36  ;;  %v2249_v22 = vld [vmem:[#allocation9 + $0x11f8] sm:$0xff]  ;;  %v2266_v37 = vrot.slane %v6794_v12, 2 }
 0x38e   : > { %5037 = vmatprep.subr.bf16.mxu1 %v5036_v32  ;;  %v2214_v32 = vld [vmem:[#allocation9 + $0x10e0] sm:$0xff] }
 0x38f   : > { %v5062_v38 = vpack.c.bf16 %v2216_v34, %v2214_v32  ;;  %v2181_v32 = vld [vmem:[#allocation2 + $0x20] sm:$0xfc] }
 0x390   : > { %2155 = vmatmul.mubr.f32.gmra.mrb[2].mxu1 %v6741_v11  ;;  %v2075_v11 = vsel %vm839_vm10, %v2070_v40, %v2074_v54  ;;  %v2218_v40 = vld [vmem:[#allocation9 + $0x1100] sm:$0xff]  ;;  %v5070_v54 = vpack.c.bf16 %v2224_v53, %v2222_v50  ;;  %v2254_v34 = vrot.slane %v2181_v32, 2  ;;  %v2578_v50 = vld [vmem:[#allocation12 + $0x370] sm:$0xff]  ;;  %v2581_v53 = vld [vmem:[#allocation12 + $0x388] sm:$0xff] }
 0x391   : > { %2160 = vmatprep.mubr.f32.mxu1 %v2071_v51  ;;  %5039 = vmatpush1.bf16.msra.mxu1 %v5038_v5  ;;  %v2220_v5 = vld [vmem:[#allocation9 + $0x1110] sm:$0xff]  ;;  %v2229_v51 = vld [vmem:[#allocation9 + $0x1158] sm:$0xff] }
 0x392   : > { %5041 = vmatprep.subr.bf16.mxu1 %v5040_v45  ;;  %v2225_v45 = vld [vmem:[#allocation9 + $0x1138] sm:$0xff]  ;;  %v5066_v41 = vpack.c.bf16 %v2220_v5, %v2218_v40  ;;  %v5072_v57 = vpack.c.bf16 %v2229_v51, %v2227_v0  ;;  %v2256_v36 = vsel %vm1117_vm11, %v2254_v34, %v6758_v30  ;;  %v2267_v40 = vsel %vm1117_vm11, %v6765_v23, %v2266_v37 }
 0x393   : > { %v5068_v49 = vpack.c.bf16 %v2225_v45, %v2223_v43  ;;  %v2183_v43 = vld [vmem:[#allocation2 + $0x60] sm:$0x3] }
 0x394   : > { %2161 = vmatmul.mubr.f32.gmra.mrb[4].mxu1 %v2069_v62  ;;  %v2268_v30 = vrot.slane %v2183_v43, 2  ;;  %v2583_v0 = vld [vmem:[#allocation12 + $0x398] sm:$0xff] }
 0x395   : > { %2166 = vmatprep.mubr.f32.mxu1 %v2075_v11  ;;  %5043 = vmatpush1.bf16.msra.mxu1 %v5042_v4  ;;  %v2226_v4 = vld [vmem:[#allocation9 + $0x1140] sm:$0xff]  ;;  %v2237_v11 = vld [vmem:[#allocation9 + $0x1198] sm:$0xff]  ;;  %v5144_v51 = vpack.c.bf16 %v2583_v0, %v2581_v53 }
 0x396   : > { %5045 = vmatprep.subr.bf16.mxu1 %v5044_v59  ;;  %v2228_v59 = vld [vmem:[#allocation9 + $0x1150] sm:$0xff]  ;;  %v5080_v6 = vpack.c.bf16 %v2237_v11, %v2235_v52  ;;  %v2588_v11 = vld [vmem:[#allocation12 + $0x3c0] sm:$0xff] }
 0x397   : > { %v5074_v62 = vpack.c.bf16 %v2228_v59, %v2226_v4  ;;  %v2585_v4 = vld [vmem:[#allocation12 + $0x3a8] sm:$0xff]  ;;  %v2587_v59 = vld [vmem:[#allocation12 + $0x3b8] sm:$0xff] }
 0x398   : > { %2167 = vmatmul.mubr.f32.gmra.mrb[6].mxu1 %v2073_v33  ;;  %v2241_v33 = vld [vmem:[#allocation9 + $0x11b8] sm:$0xff]  ;;  %v5148_v60 = vpack.c.bf16 %v2587_v59, %v2585_v4 }
 0x399   : > { %5047 = vmatpush1.bf16.msra.mxu1 %v5046_v55  ;;  %2344 = vmatprep.mubr.f32.mxu1 %v2259_v1  ;;  %v5078_v55 = vpack.c.bf16 %v2232_v63, %v2230_v10  ;;  %v5084_v14 = vpack.c.bf16 %v2241_v33, %v2239_v8  ;;  %v2238_v1 = vld [vmem:[#allocation9 + $0x11a0] sm:$0xff]  ;;  %v2589_v10 = vld [vmem:[#allocation12 + $0x3c8] sm:$0xff]  ;;  %v2594_v33 = vld [vmem:[#allocation12 + $0x3f0] sm:$0xff] }
 0x39a   : > { %5049 = vmatprep.subr.bf16.mxu1 %v5048_v7  ;;  %v2234_v7 = vld [vmem:[#allocation9 + $0x1180] sm:$0xff]  ;;  %v2528_v53 = vld [vmem:[#allocation3 + $0x8] sm:$0xfe] }
 0x39b   : > { %v5082_v9 = vpack.c.bf16 %v2236_v24, %v2234_v7  ;;  %v2591_v63 = vld [vmem:[#allocation12 + $0x3d8] sm:$0xff]  ;;  %v2592_v8 = vld [vmem:[#allocation12 + $0x3e0] sm:$0xff] }
 0x39c   : > { %v5152_v52 = vpack.c.bf16 %v2591_v63, %v2589_v10  ;;  %v2595_v24 = vld [vmem:[#allocation12 + $0x3f8] sm:$0xff]  ;;  %v2463_v63 = vld [vmem:[#allocation12] sm:$0xff] }
 0x39d   : > { %5051 = vmatpush1.bf16.msra.mxu1 %v5050_v42  ;;  %v2240_v42 = vld [vmem:[#allocation9 + $0x11b0] sm:$0xff] }
 0x39e   : > { %5053 = vmatprep.subr.bf16.mxu1 %v5052_v44  ;;  %v2243_v44 = vld [vmem:[#allocation9 + $0x11c8] sm:$0xff]  ;;  %v5086_v17 = vpack.c.bf16 %v2240_v42, %v2238_v1  ;;  %v2466_v1 = vld [vmem:[#allocation12 + $0x18] sm:$0xff]  ;;  %v5158_v42 = vpack.c.bf16 %v2594_v33, %v2592_v8 }
 0x39f   : > { %v5088_v20 = vpack.c.bf16 %v2245_v16, %v2243_v44  ;;  %v2377_v16 = vld [vmem:[#allocation10] sm:$0x3]  ;;  %v2468_v8 = vld [vmem:[#allocation12 + $0x28] sm:$0xff] }
 0x3a0   : > { %v2470_v33 = vld [vmem:[#allocation12 + $0x38] sm:$0xff] }
 0x3a1   : > { %5055 = vmatpush1.bf16.msra.mxu1 %v5054_v56  ;;  %v2244_v56 = vld [vmem:[#allocation9 + $0x11d0] sm:$0xff] }
 0x3a2   : > { %5057 = vmatprep.subr.bf16.mxu1 %v5056_v2  ;;  %v2247_v2 = vld [vmem:[#allocation9 + $0x11e8] sm:$0xff]  ;;  %v5090_v25 = vpack.c.bf16 %v2244_v56, %v2242_v21 }
 0x3a3   : > { %v5092_v27 = vpack.c.bf16 %v2249_v22, %v2247_v2 }
 0x3a5   : > { %5059 = vmatpush1.bf16.msra.mxu1 %v5058_v31  ;;  %v2248_v31 = vld [vmem:[#allocation9 + $0x11f0] sm:$0xff] }
 0x3a6   : > { %5061 = vmatprep.subr.bf16.mxu1 %v5060_v48  ;;  %v5094_v48 = vpack.c.bf16 %v2248_v31, %v2246_v28 }
 0x3a9   : > { %5063 = vmatpush1.bf16.msra.mxu1 %v5062_v38  ;;  %v2184_v38 = vld [vmem:[#allocation2 + $0x68] sm:$0x3] }
 0x3aa   : > { %5065 = vmatprep.subr.bf16.mxu1 %v5064_v39  ;;  %v2264_v39 = vrot.slane %v6797_v19, 2  ;;  %v2270_v5 = vrot.slane %v2184_v38, 2  ;;  %v2577_v19 = vld [vmem:[#allocation12 + $0x368] sm:$0xff] }
 0x3ac   : > { %v2265_v45 = vsel %vm1117_vm11, %v6770_v35, %v2264_v39  ;;  %v2271_v12 = vsel %vm1117_vm11, %v2266_v37, %v2270_v5  ;;  %v2580_v35 = vld [vmem:[#allocation12 + $0x380] sm:$0xff] }
 0x3ad   : > { %5067 = vmatpush1.bf16.msra.mxu1 %v5066_v41  ;;  %v2579_v41 = vld [vmem:[#allocation12 + $0x378] sm:$0xff] }
 0x3ae   : > { %5069 = vmatprep.subr.bf16.mxu1 %v5068_v49  ;;  %v2576_v49 = vld [vmem:[#allocation12 + $0x360] sm:$0xff] }
 0x3af   : > { %v5142_v23 = vpack.c.bf16 %v2578_v50, %v2576_v49 }
 0x3b1   : > { %5071 = vmatpush1.bf16.msra.mxu1 %v5070_v54  ;;  %v2582_v54 = vld [vmem:[#allocation12 + $0x390] sm:$0xff] }
 0x3b2   : > { %5073 = vmatprep.subr.bf16.mxu1 %v5072_v57  ;;  %v5146_v57 = vpack.c.bf16 %v2582_v54, %v2580_v35 }
 0x3b5   : > { %5075 = vmatpush1.bf16.msra.mxu1 %v5074_v62  ;;  %v2586_v62 = vld [vmem:[#allocation12 + $0x3b0] sm:$0xff] }
 0x3b6   : > { %5077 = vmatprep.subr.bf16.mxu1 %v5076_v58  ;;  %v5150_v58 = vpack.c.bf16 %v2586_v62, %v2584_v61 }
 0x3b9   : > { %5079 = vmatpush1.bf16.msra.mxu1 %v5078_v55  ;;  %v2590_v55 = vld [vmem:[#allocation12 + $0x3d0] sm:$0xff] }
 0x3ba   : > { %5081 = vmatprep.subr.bf16.mxu1 %v5080_v6  ;;  %v2593_v6 = vld [vmem:[#allocation12 + $0x3e8] sm:$0xff]  ;;  %v5154_v7 = vpack.c.bf16 %v2590_v55, %v2588_v11 }
 0x3bd   : > { %5083 = vmatpush1.bf16.msra.mxu1 %v5082_v9  ;;  %v5156_v9 = vpack.c.bf16 %v2595_v24, %v2593_v6 }
 0x3be   : > { %5085 = vmatprep.subr.bf16.mxu1 %v5084_v14  ;;  %v2464_v14 = vld [vmem:[#allocation12 + $0x8] sm:$0xff] }
 0x3bf   : > { %v5160_v44 = vpack.c.bf16 %v2466_v1, %v2464_v14 }
 0x3c1   : > { %5087 = vmatpush1.bf16.msra.mxu1 %v5086_v17  ;;  %v2382_v17 = vrot.slane %v2377_v16, %v6586_v13 }
 0x3c2   : > { %5089 = vmatprep.subr.bf16.mxu1 %v5088_v20  ;;  %v2386_v20 = vrot.slane %v2377_v16, %v6588_v15 }
 0x3c5   : > { %5091 = vmatpush1.bf16.msra.mxu1 %v5090_v25 }
 0x3c6   : > { %5093 = vmatprep.subr.bf16.mxu1 %v5092_v27 }
 0x3c9   : > { %5095 = vmatpush1.bf16.msra.mxu1 %v5094_v48 }
 0x3cc   : > { %2345 = vmatmul.mubr.f32.vlgmr.msra.gmra.mrb[0].mxu1 %v2256_v36 }
 0x3cd   : > { %2350 = vmatprep.mubr.f32.mxu1 %v6775_v3  ;;  %v2269_v3 = vsel %vm1117_vm11, %v2264_v39, %v2268_v30 }
 0x3d0   : > { %2351 = vmatmul.mubr.f32.gmra.mrb[2].mxu1 %v6781_v46  ;;  %v5140_v46 = vpack.c.bf16 %v2579_v41, %v2577_v19 }
 0x3d1   : > { %2356 = vmatprep.mubr.f32.mxu1 %v2267_v40 }
 0x3d2   : > { %5141 = vmatprep.subr.bf16.mxu0 %v5140_v46 }
 0x3d3   : > { %5143 = vmatpush1.bf16.msra.mxu0 %v5142_v23 }
 0x3d4   : > { %2357 = vmatmul.mubr.f32.gmra.mrb[4].mxu1 %v2265_v45  ;;  %5145 = vmatprep.subr.bf16.mxu0 %v5144_v51 }
 0x3d5   : > { %2362 = vmatprep.mubr.f32.mxu1 %v2271_v12 }
 0x3d7   : > { %5147 = vmatpush1.bf16.msra.mxu0 %v5146_v57  ;;  %v2527_v57 = vld [vmem:[#allocation3] sm:$0xfe] }
 0x3d8   : > { %2363 = vmatmul.mubr.f32.gmra.mrb[6].mxu1 %v2269_v3  ;;  %5149 = vmatprep.subr.bf16.mxu0 %v5148_v60 }
 0x3db   : > { %5151 = vmatpush1.bf16.msra.mxu0 %v5150_v58  ;;  %v2609_v58 = vrot.slane %v2528_v53, 1  ;;  %v2480_v53 = vld [vmem:[#allocation12 + $0x88] sm:$0xff] }
 0x3dc   : > { %5153 = vmatprep.subr.bf16.mxu0 %v5152_v52  ;;  %v2465_v52 = vld [vmem:[#allocation12 + $0x10] sm:$0xff] }
 0x3dd   : > { %v5162_v16 = vpack.c.bf16 %v2465_v52, %v2463_v63  ;;  %v2486_v63 = vld [vmem:[#allocation12 + $0xb8] sm:$0xff] }
 0x3df   : > { %5155 = vmatpush1.bf16.msra.mxu0 %v5154_v7  ;;  %v2606_v7 = vrot.slane %v2527_v57, 1 }
 0x3e0   : > { %5157 = vmatprep.subr.bf16.mxu0 %v5156_v9 }
 0x3e3   : > { %5159 = vmatpush1.bf16.msra.mxu0 %v5158_v42 }
 0x3e4   : > { %5161 = vmatprep.subr.bf16.mxu0 %v5160_v44 }
 0x49f   : > { %v2346_v21 = vpop.f32.mrb[0].mxu1 }
 0x4a0   : > { %v2389_v56 = vadd.f32 %v2382_v17, %v2346_v21  ;;  %v2348_v2 = vpop.f32.mrb[1].mxu1  ;;  %v5164_v21 = vpack.c.bf16 %v2470_v33, %v2468_v8  ;;  %v2485_v8 = vld [vmem:[#allocation12 + $0xb0] sm:$0xff]  ;;  %v2488_v33 = vld [vmem:[#allocation12 + $0xc8] sm:$0xff] }
 0x4a1   : > { %v2390_v22 = vadd.f32 %v2386_v20, %v2348_v2  ;;  %v2467_v2 = vld [vmem:[#allocation12 + $0x20] sm:$0xff] }
 0x4a2   : > { %v2397_v25 = vmax.f32 %v2389_v56, 0.0 }
 0x4a3   : > { %v2398_v27 = vmax.f32 %v2390_v22, 0.0  ;;  %v2352_v28 = vpop.f32.mrb[2].mxu1  ;;  %v2469_v22 = vld [vmem:[#allocation12 + $0x30] sm:$0xff] }
 0x4a4   : > { %v2405_v31 = vsel %vm633_vm5, %v2397_v25, 0.0  ;;  %v2391_v48 = vadd.f32 %v2382_v17, %v2352_v28  ;;  %v2354_v32 = vpop.f32.mrb[3].mxu1  ;;  %v2472_v28 = vld [vmem:[#allocation12 + $0x48] sm:$0xff] }
 0x4a5   : > { %v2421_v34 = vrot.slane %v2405_v31, 7  ;;  %v2406_v36 = vsel %vm633_vm5, %v2398_v27, 0.0  ;;  %v2392_v37 = vadd.f32 %v2386_v20, %v2354_v32  ;;  %v2474_v31 = vld [vmem:[#allocation12 + $0x58] sm:$0xff] }
 0x4a6   : > { %v2422_v38 = vrot.slane %v2406_v36, 7  ;;  %v2399_v39 = vmax.f32 %v2391_v48, 0.0  ;;  %v5166_v36 = vpack.c.bf16 %v2469_v22, %v2467_v2  ;;  %v2494_v2 = vld [vmem:[#allocation12 + $0xf8] sm:$0xff] }
 0x4a7   : > { %2445 = vst [vmem:[#allocation3 + $0x10] sm:$0xfe] %v2421_v34  ;;  %v2400_v40 = vmax.f32 %v2392_v37, 0.0  ;;  %v2358_v5 = vpop.f32.mrb[4].mxu1 }
 0x4a8   : > { %2446 = vst [vmem:[#allocation3 + $0x18] sm:$0xfe] %v2422_v38  ;;  %v2407_v43 = vsel %vm634_vm6, %v2399_v39, 0.0  ;;  %v2393_v45 = vadd.f32 %v2382_v17, %v2358_v5  ;;  %v2360_v30 = vpop.f32.mrb[5].mxu1  ;;  %v2471_v39 = vld [vmem:[#allocation12 + $0x40] sm:$0xff] }
 0x4a9   : > { %v2423_v12 = vrot.slane %v2407_v43, 7  ;;  %v2408_v3 = vsel %vm634_vm6, %v2400_v40, 0.0  ;;  %v2394_v19 = vadd.f32 %v2386_v20, %v2360_v30  ;;  %v2473_v40 = vld [vmem:[#allocation12 + $0x50] sm:$0xff]  ;;  %v2478_v30 = vld [vmem:[#allocation12 + $0x78] sm:$0xff] }
 0x4aa   : > { %v2425_v41 = vrot.slane %v2408_v3, 7  ;;  %v2401_v46 = vmax.f32 %v2393_v45, 0.0  ;;  %v2476_v45 = vld [vmem:[#allocation12 + $0x68] sm:$0xff]  ;;  %v5170_v3 = vpack.c.bf16 %v2473_v40, %v2471_v39  ;;  %v2495_v40 = vld [vmem:[#allocation12 + $0x100] sm:$0xff] }
 0x4ab   : > { %v6839_v49 = vsel %vm653_vm7, %v2421_v34, %v2423_v12  ;;  %v2402_v50 = vmax.f32 %v2394_v19, 0.0  ;;  %v2364_v23 = vpop.f32.mrb[6].mxu1  ;;  %v5172_v19 = vpack.c.bf16 %v2478_v30, %v2476_v45  ;;  %v2502_v45 = vld [vmem:[#allocation12 + $0x138] sm:$0xff] }
 0x4ac   : > { %2447 = vst [vmem:[#allocation3 + $0x20] sm:$0xff] %v6839_v49  ;;  %v6843_v0 = vsel %vm653_vm7, %v2422_v38, %v2425_v41  ;;  %v2409_v51 = vsel %vm635_vm8, %v2401_v46, 0.0  ;;  %v2395_v35 = vadd.f32 %v2382_v17, %v2364_v23  ;;  %v2366_v54 = vpop.f32.mrb[7].mxu1  ;;  %v2612_v37 = vrot.slane %v6839_v49, 1  ;;  %v2477_v46 = vld [vmem:[#allocation12 + $0x70] sm:$0xff] }
 0x4ad   : > { %2448 = vst [vmem:[#allocation3 + $0x28] sm:$0xff] %v6843_v0  ;;  %v2427_v4 = vrot.slane %v2409_v51, 7  ;;  %v2410_v59 = vsel %vm635_vm8, %v2402_v50, 0.0  ;;  %v2396_v60 = vadd.f32 %v2386_v20, %v2366_v54  ;;  %v2614_v56 = vrot.slane %v6843_v0, 1  ;;  %v2482_v51 = vld [vmem:[#allocation12 + $0x98] sm:$0xff] }
 0x4ae   : > { %v2429_v61 = vrot.slane %v2410_v59, 7  ;;  %v2403_v62 = vmax.f32 %v2395_v35, 0.0  ;;  %v6850_v10 = vld [vmem:[#allocation3 + $0x10] sm:$0xff]  ;;  %v5168_v38 = vpack.c.bf16 %v2474_v31, %v2472_v28  ;;  %v5176_v59 = vpack.c.bf16 %v2482_v51, %v2480_v53  ;;  %v2505_v51 = vld [vmem:[#allocation12 + $0x150] sm:$0xff] }
 0x4af   : > { %v6853_v11 = vsel %vm653_vm7, %v2423_v12, %v2427_v4  ;;  %v2404_v55 = vmax.f32 %v2396_v60, 0.0  ;;  %v6855_v6 = vld [vmem:[#allocation3 + $0x18] sm:$0xff]  ;;  %v2607_v24 = vrot.slane %v6850_v10, 1 }
 0x4b0   : > { %2449 = vst [vmem:[#allocation3 + $0x30] sm:$0xff] %v6853_v11  ;;  %v6860_v9 = vsel %vm653_vm7, %v2425_v41, %v2429_v61  ;;  %v2411_v14 = vsel %vm636_vm9, %v2403_v62, 0.0  ;;  %v2610_v1 = vrot.slane %v6855_v6, 1  ;;  %v2616_v43 = vrot.slane %v6853_v11, 1  ;;  %v2475_v41 = vld [vmem:[#allocation12 + $0x60] sm:$0xff] }
 0x4b1   : > { %2450 = vst [vmem:[#allocation3 + $0x38] sm:$0xff] %v6860_v9  ;;  %v2431_v42 = vrot.slane %v2411_v14, 7  ;;  %v2412_v44 = vsel %vm636_vm9, %v2404_v55, 0.0  ;;  %v2608_v27 = vsel %vm839_vm10, %v2606_v7, %v2607_v24  ;;  %v2618_v34 = vrot.slane %v6860_v9, 1  ;;  %v2479_v60 = vld [vmem:[#allocation12 + $0x80] sm:$0xff]  ;;  %v2490_v14 = vld [vmem:[#allocation12 + $0xd8] sm:$0xff] }
 0x4b2   : > { %v2433_v17 = vrot.slane %v2412_v44, 7  ;;  %v2611_v20 = vsel %vm839_vm10, %v2609_v58, %v2610_v1  ;;  %v2615_v32 = vsel %vm839_vm10, %v2610_v1, %v2614_v56  ;;  %v2613_v5 = vsel %vm839_vm10, %v2607_v24, %v2612_v37  ;;  %v2484_v58 = vld [vmem:[#allocation12 + $0xa8] sm:$0xff]  ;;  %v2483_v24 = vld [vmem:[#allocation12 + $0xa0] sm:$0xff] }
 0x4b3   : > { %v2432_v25 = vsel %vm653_vm7, %v2427_v4, %v2431_v42  ;;  %2453 = vst [vmem:[#allocation3 + $0x50] sm:$0x1] %v2431_v42  ;;  %2696 = vmatprep.mubr.f32.mxu0 %v2611_v20  ;;  %v2619_v12 = vsel %vm839_vm10, %v2614_v56, %v2618_v34  ;;  %v2617_v50 = vsel %vm839_vm10, %v2612_v37, %v2616_v43  ;;  %v6885_v1 = vld [vmem:[#allocation2] sm:$0xff]  ;;  %v2492_v56 = vld [vmem:[#allocation12 + $0xe8] sm:$0xff] }
 0x4b4   : > { %2451 = vst [vmem:[#allocation3 + $0x40] sm:$0xff] %v2432_v25  ;;  %v6873_v48 = vsel %vm653_vm7, %v2429_v61, %v2433_v17  ;;  %2454 = vst [vmem:[#allocation3 + $0x58] sm:$0x1] %v2433_v17  ;;  %2697 = vmatmul.mubr.f32.vlgmr.msra.gmra.mrb[8].mxu0 %v2608_v27  ;;  %v5174_v57 = vpack.c.bf16 %v2477_v46, %v2475_v41  ;;  %v2481_v61 = vld [vmem:[#allocation12 + $0x90] sm:$0xff]  ;;  %v5180_v7 = vpack.c.bf16 %v2486_v63, %v2484_v58  ;;  %v2487_v44 = vld [vmem:[#allocation12 + $0xc0] sm:$0xff] }
 0x4b5   : > { %2452 = vst [vmem:[#allocation3 + $0x48] sm:$0xff] %v6873_v48  ;;  %5163 = vmatpush1.bf16.msra.mxu0 %v5162_v16  ;;  %2702 = vmatprep.mubr.f32.mxu0 %v2615_v32  ;;  %v5178_v55 = vpack.c.bf16 %v2481_v61, %v2479_v60  ;;  %v5182_v42 = vpack.c.bf16 %v2485_v8, %v2483_v24  ;;  %v2489_v17 = vld [vmem:[#allocation12 + $0xd0] sm:$0xff]  ;;  %v2491_v31 = vld [vmem:[#allocation12 + $0xe0] sm:$0xff]  ;;  %v2504_v41 = vld [vmem:[#allocation12 + $0x148] sm:$0xff] }
 0x4b6   : > { %5165 = vmatprep.subr.bf16.mxu0 %v5164_v21  ;;  %v5184_v16 = vpack.c.bf16 %v2490_v14, %v2488_v33  ;;  %v5186_v22 = vpack.c.bf16 %v2489_v17, %v2487_v44  ;;  %v5188_v28 = vpack.c.bf16 %v2494_v2, %v2492_v56  ;;  %v2493_v32 = vld [vmem:[#allocation12 + $0xf0] sm:$0xff]  ;;  %v2506_v46 = vld [vmem:[#allocation12 + $0x158] sm:$0xff]  ;;  %v2503_v53 = vld [vmem:[#allocation12 + $0x140] sm:$0xff] }
 0x4b7   : > { %v3174_v20 = vld [vmem:[#allocation3 + $0x30] sm:$0xff]  ;;  %v2509_v60 = vld [vmem:[#allocation12 + $0x170] sm:$0xff]  ;;  %v2512_v61 = vld [vmem:[#allocation12 + $0x188] sm:$0xff] }
 0x4b8   : > { %2703 = vmatmul.mubr.f32.gmra.mrb[10].mxu0 %v2613_v5  ;;  %v6890_v25 = vrot.slane %v3174_v20, 2  ;;  %v2497_v5 = vld [vmem:[#allocation12 + $0x110] sm:$0xff]  ;;  %v2518_v24 = vld [vmem:[#allocation12 + $0x1b8] sm:$0xff]  ;;  %v2515_v14 = vld [vmem:[#allocation12 + $0x1a0] sm:$0xff] }
 0x4b9   : > { %5167 = vmatpush1.bf16.msra.mxu0 %v5166_v36  ;;  %2708 = vmatprep.mubr.f32.mxu0 %v2619_v12  ;;  %v2498_v36 = vld [vmem:[#allocation12 + $0x118] sm:$0xff]  ;;  %v5194_v30 = vpack.c.bf16 %v2497_v5, %v2495_v40  ;;  %v2520_v44 = vld [vmem:[#allocation12 + $0x1c8] sm:$0xff]  ;;  %v2519_v56 = vld [vmem:[#allocation12 + $0x1c0] sm:$0xff] }
 0x4ba   : > { %5169 = vmatprep.subr.bf16.mxu0 %v5168_v38  ;;  %v5190_v38 = vpack.c.bf16 %v2493_v32, %v2491_v31  ;;  %v2521_v2 = vld [vmem:[#allocation12 + $0x1d0] sm:$0xff] }
 0x4bb   : > { %v2529_v23 = vld [vmem:[#allocation3 + $0x40] sm:$0x1]  ;;  %v5218_v31 = vpack.c.bf16 %v2521_v2, %v2519_v56  ;;  %v2837_v56 = vld [vmem:[#allocation12 + $0x4b0] sm:$0xff] }
 0x4bc   : > { %2709 = vmatmul.mubr.f32.gmra.mrb[12].mxu0 %v2617_v50  ;;  %v2530_v35 = vld [vmem:[#allocation3 + $0x48] sm:$0x1]  ;;  %v2620_v4 = vrot.slane %v2529_v23, 1  ;;  %v6888_v21 = vld [vmem:[#allocation3 + $0x40] sm:$0xff]  ;;  %v5200_v23 = vpack.c.bf16 %v2506_v46, %v2504_v41  ;;  %v2819_v41 = vld [vmem:[#allocation12 + $0x420] sm:$0xff] }
 0x4bd   : > { %5171 = vmatpush1.bf16.msra.mxu0 %v5170_v3  ;;  %v2622_v54 = vrot.slane %v2530_v35, 1  ;;  %v4025_v27 = vrot.slane %v6888_v21, 2  ;;  %v2499_v3 = vld [vmem:[#allocation12 + $0x120] sm:$0xff]  ;;  %v2508_v35 = vld [vmem:[#allocation12 + $0x168] sm:$0xff]  ;;  %v2821_v46 = vld [vmem:[#allocation12 + $0x430] sm:$0xff] }
 0x4be   : > { %5173 = vmatprep.subr.bf16.mxu0 %v5172_v19  ;;  %v2621_v52 = vsel %vm839_vm10, %v2616_v43, %v2620_v4  ;;  %v2500_v43 = vld [vmem:[#allocation12 + $0x128] sm:$0xff]  ;;  %v2501_v19 = vld [vmem:[#allocation12 + $0x130] sm:$0xff]  ;;  %v4198_v21 = vld [vmem:[%s7217_s8] sm:$0xff] }
 0x4bf   : > { %v2623_v62 = vsel %vm839_vm10, %v2618_v34, %v2622_v54  ;;  %v2496_v34 = vld [vmem:[#allocation12 + $0x108] sm:$0xff]  ;;  %v6897_v37 = vsel %vm1117_vm11, %v6890_v25, %v4025_v27  ;;  %v5196_v12 = vpack.c.bf16 %v2502_v45, %v2500_v43  ;;  %v5198_v50 = vpack.c.bf16 %v2501_v19, %v2499_v3  ;;  %v2510_v54 = vld [vmem:[#allocation12 + $0x178] sm:$0xff]  ;;  %v2815_v43 = vld [vmem:[#allocation12 + $0x400] sm:$0xff] }
 0x4c0   : > { %2714 = vmatprep.mubr.f32.mxu0 %v2623_v62  ;;  %v5192_v39 = vpack.c.bf16 %v2498_v36, %v2496_v34  ;;  %v5204_v4 = vpack.c.bf16 %v2510_v54, %v2508_v35  ;;  %v2514_v62 = vld [vmem:[#allocation12 + $0x198] sm:$0xff]  ;;  %v2523_v34 = vld [vmem:[#allocation12 + $0x1e0] sm:$0xff]  ;;  %v2525_v36 = vld [vmem:[#allocation12 + $0x1f0] sm:$0xff] }
 0x4c1   : > { %5175 = vmatpush1.bf16.msra.mxu0 %v5174_v57  ;;  %v5202_v57 = vpack.c.bf16 %v2505_v51, %v2503_v53  ;;  %v5208_v63 = vpack.c.bf16 %v2514_v62, %v2512_v61  ;;  %v5222_v40 = vpack.c.bf16 %v2525_v36, %v2523_v34  ;;  %v2817_v45 = vld [vmem:[#allocation12 + $0x410] sm:$0xff]  ;;  %v5230_v53 = vpack.c.bf16 %v2821_v46, %v2819_v41  ;;  %v2823_v35 = vld [vmem:[#allocation12 + $0x440] sm:$0xff]  ;;  %v2840_v2 = vld [vmem:[#allocation12 + $0x4c8] sm:$0xff] }
 0x4c2   : > { %2715 = vmatmul.mubr.f32.gmra.mrb[14].mxu0 %v2621_v52  ;;  %5177 = vmatprep.subr.bf16.mxu0 %v5176_v59  ;;  %v2507_v59 = vld [vmem:[#allocation12 + $0x160] sm:$0xff]  ;;  %v5226_v3 = vpack.c.bf16 %v2817_v45, %v2815_v43  ;;  %v2825_v54 = vld [vmem:[#allocation12 + $0x450] sm:$0xff]  ;;  %v2844_v36 = vld [vmem:[#allocation12 + $0x4e8] sm:$0xff] }
 0x4c3   : > { %2785 = vmatprep.mubr.f32.mxu0 %v6885_v1  ;;  %v5206_v58 = vpack.c.bf16 %v2509_v60, %v2507_v59  ;;  %v2511_v52 = vld [vmem:[#allocation12 + $0x180] sm:$0xff]  ;;  %v5234_v59 = vpack.c.bf16 %v2825_v54, %v2823_v35  ;;  %v2811_v60 = vld [vmem:[#allocation3 + $0x8] sm:$0xfc]  ;;  %v2848_v45 = vld [vmem:[#allocation12 + $0x508] sm:$0xff] }
 0x4c4   : > { %v2829_v62 = vld [vmem:[#allocation12 + $0x470] sm:$0xff]  ;;  %v2852_v46 = vld [vmem:[#allocation12 + $0x528] sm:$0xff] }
 0x4c5   : > { %5179 = vmatpush1.bf16.msra.mxu0 %v5178_v55  ;;  %v2513_v55 = vld [vmem:[#allocation12 + $0x190] sm:$0xff]  ;;  %v2856_v54 = vld [vmem:[#allocation12 + $0x548] sm:$0xff] }
 0x4c6   : > { %5181 = vmatprep.subr.bf16.mxu0 %v5180_v7  ;;  %v2516_v7 = vld [vmem:[#allocation12 + $0x1a8] sm:$0xff]  ;;  %v5210_v8 = vpack.c.bf16 %v2513_v55, %v2511_v52  ;;  %v2886_v52 = vrot.slane %v2811_v60, 2  ;;  %v2887_v55 = vrot.slane %v6855_v6, 2  ;;  %v2841_v34 = vld [vmem:[#allocation12 + $0x4d0] sm:$0xff]  ;;  %v2855_v60 = vld [vmem:[#allocation12 + $0x540] sm:$0xff] }
 0x4c7   : > { %v5212_v33 = vpack.c.bf16 %v2518_v24, %v2516_v7  ;;  %v2845_v43 = vld [vmem:[#allocation12 + $0x4f0] sm:$0xff] }
 0x4c8   : > { %v2849_v41 = vld [vmem:[#allocation12 + $0x510] sm:$0xff] }
 0x4c9   : > { %5183 = vmatpush1.bf16.msra.mxu0 %v5182_v42  ;;  %v2517_v42 = vld [vmem:[#allocation12 + $0x1b0] sm:$0xff] }
 0x4ca   : > { %5185 = vmatprep.subr.bf16.mxu0 %v5184_v16  ;;  %v2522_v16 = vld [vmem:[#allocation12 + $0x1d8] sm:$0xff]  ;;  %v5214_v17 = vpack.c.bf16 %v2517_v42, %v2515_v14  ;;  %v2836_v14 = vld [vmem:[#allocation12 + $0x4a8] sm:$0xff]  ;;  %v2853_v35 = vld [vmem:[#allocation12 + $0x530] sm:$0xff] }
 0x4cb   : > { %v5216_v20 = vpack.c.bf16 %v2522_v16, %v2520_v44  ;;  %v2838_v42 = vld [vmem:[#allocation12 + $0x4b8] sm:$0xff]  ;;  %v2888_v44 = vsel %vm1117_vm11, %v2886_v52, %v2887_v55  ;;  %v2859_v52 = vld [vmem:[#allocation12 + $0x560] sm:$0xff] }
 0x4cd   : > { %5187 = vmatpush1.bf16.msra.mxu0 %v5186_v22  ;;  %v2524_v22 = vld [vmem:[#allocation12 + $0x1e8] sm:$0xff] }
 0x4ce   : > { %5189 = vmatprep.subr.bf16.mxu0 %v5188_v28  ;;  %v2526_v28 = vld [vmem:[#allocation12 + $0x1f8] sm:$0xff] }
 0x4cf   : > { %v5220_v32 = vpack.c.bf16 %v2526_v28, %v2524_v22  ;;  %v2842_v22 = vld [vmem:[#allocation12 + $0x4d8] sm:$0xff] }
 0x4d1   : > { %5191 = vmatpush1.bf16.msra.mxu0 %v5190_v38  ;;  %v2816_v38 = vld [vmem:[#allocation12 + $0x408] sm:$0xff] }
 0x4d2   : > { %5193 = vmatprep.subr.bf16.mxu0 %v5192_v39  ;;  %v2818_v39 = vld [vmem:[#allocation12 + $0x418] sm:$0xff] }
 0x4d3   : > { %v5224_v5 = vpack.c.bf16 %v2818_v39, %v2816_v38  ;;  %v2846_v38 = vld [vmem:[#allocation12 + $0x4f8] sm:$0xff] }
 0x4d5   : > { %5195 = vmatpush1.bf16.msra.mxu0 %v5194_v30  ;;  %v2820_v30 = vld [vmem:[#allocation12 + $0x428] sm:$0xff] }
 0x4d6   : > { %5197 = vmatprep.subr.bf16.mxu0 %v5196_v12  ;;  %v2822_v12 = vld [vmem:[#allocation12 + $0x438] sm:$0xff] }
 0x4d7   : > { %v5228_v19 = vpack.c.bf16 %v2822_v12, %v2820_v30  ;;  %v2850_v30 = vld [vmem:[#allocation12 + $0x518] sm:$0xff] }
 0x4d9   : > { %5199 = vmatpush1.bf16.msra.mxu0 %v5198_v50  ;;  %v2824_v50 = vld [vmem:[#allocation12 + $0x448] sm:$0xff] }
 0x4da   : > { %5201 = vmatprep.subr.bf16.mxu0 %v5200_v23  ;;  %v2826_v23 = vld [vmem:[#allocation12 + $0x458] sm:$0xff] }
 0x4db   : > { %v5232_v51 = vpack.c.bf16 %v2826_v23, %v2824_v50  ;;  %v2854_v50 = vld [vmem:[#allocation12 + $0x538] sm:$0xff] }
 0x4dd   : > { %5203 = vmatpush1.bf16.msra.mxu0 %v5202_v57  ;;  %v2828_v57 = vld [vmem:[#allocation12 + $0x468] sm:$0xff] }
 0x4de   : > { %5205 = vmatprep.subr.bf16.mxu0 %v5204_v4  ;;  %v2830_v4 = vld [vmem:[#allocation12 + $0x478] sm:$0xff] }
 0x4df   : > { %v5236_v61 = vpack.c.bf16 %v2830_v4, %v2828_v57  ;;  %v2858_v57 = vld [vmem:[#allocation12 + $0x558] sm:$0xff] }
 0x4e1   : > { %5207 = vmatpush1.bf16.msra.mxu0 %v5206_v58  ;;  %v2832_v58 = vld [vmem:[#allocation12 + $0x488] sm:$0xff] }
 0x4e2   : > { %5209 = vmatprep.subr.bf16.mxu0 %v5208_v63  ;;  %v2834_v63 = vld [vmem:[#allocation12 + $0x498] sm:$0xff] }
 0x4e3   : > { %v5240_v24 = vpack.c.bf16 %v2834_v63, %v2832_v58 }
 0x4e5   : > { %5211 = vmatpush1.bf16.msra.mxu0 %v5210_v8  ;;  %v2831_v8 = vld [vmem:[#allocation12 + $0x480] sm:$0xff] }
 0x4e6   : > { %5213 = vmatprep.subr.bf16.mxu0 %v5212_v33  ;;  %v2833_v33 = vld [vmem:[#allocation12 + $0x490] sm:$0xff] }
 0x4e7   : > { %v5242_v16 = vpack.c.bf16 %v2833_v33, %v2831_v8  ;;  %v2866_v8 = vld [vmem:[#allocation12 + $0x598] sm:$0xff] }
 0x4e9   : > { %5215 = vmatpush1.bf16.msra.mxu0 %v5214_v17  ;;  %v5244_v17 = vpack.c.bf16 %v2838_v42, %v2836_v14  ;;  %v2863_v42 = vld [vmem:[#allocation12 + $0x580] sm:$0xff] }
 0x4ea   : > { %5217 = vmatprep.subr.bf16.mxu0 %v5216_v20  ;;  %v2835_v20 = vld [vmem:[#allocation12 + $0x4a0] sm:$0xff] }
 0x4eb   : > { %v5246_v28 = vpack.c.bf16 %v2837_v56, %v2835_v20 }
 0x4ed   : > { %5219 = vmatpush1.bf16.msra.mxu0 %v5218_v31  ;;  %v5248_v31 = vpack.c.bf16 %v2842_v22, %v2840_v2  ;;  %v2867_v2 = vld [vmem:[#allocation12 + $0x5a0] sm:$0xff]  ;;  %v2869_v22 = vld [vmem:[#allocation12 + $0x5b0] sm:$0xff] }
 0x4ee   : > { %5221 = vmatprep.subr.bf16.mxu0 %v5220_v32  ;;  %v2839_v32 = vld [vmem:[#allocation12 + $0x4c0] sm:$0xff] }
 0x4ef   : > { %v5250_v39 = vpack.c.bf16 %v2841_v34, %v2839_v32  ;;  %v5278_v32 = vpack.c.bf16 %v2869_v22, %v2867_v2  ;;  %v2812_v2 = vld [vmem:[#allocation3 + $0x40] sm:$0x3] }
 0x4f1   : > { %5223 = vmatpush1.bf16.msra.mxu0 %v5222_v40  ;;  %v5252_v40 = vpack.c.bf16 %v2846_v38, %v2844_v36  ;;  %v2871_v36 = vld [vmem:[#allocation12 + $0x5c0] sm:$0xff]  ;;  %v2873_v38 = vld [vmem:[#allocation12 + $0x5d0] sm:$0xff] }
 0x4f2   : > { %5225 = vmatprep.subr.bf16.mxu0 %v5224_v5  ;;  %v2843_v5 = vld [vmem:[#allocation12 + $0x4e0] sm:$0xff] }
 0x4f3   : > { %v5254_v12 = vpack.c.bf16 %v2845_v43, %v2843_v5  ;;  %v5282_v5 = vpack.c.bf16 %v2873_v38, %v2871_v36  ;;  %v2897_v36 = vrot.slane %v2812_v2, 2  ;;  %v3026_v38 = vld [vmem:[#allocation12 + $0x688] sm:$0xff] }
 0x4f4   : > { %2786 = vmatmul.mubr.f32.vlgmr.msra.gmra.mrb[8].mxu0 %v6885_v1  ;;  %v2827_v1 = vld [vmem:[#allocation12 + $0x460] sm:$0xff] }
 0x4f5   : > { %2791 = vmatprep.mubr.f32.mxu0 %v6855_v6  ;;  %5227 = vmatpush1.bf16.msra.mxu0 %v5226_v3  ;;  %v5238_v7 = vpack.c.bf16 %v2829_v62, %v2827_v1  ;;  %v5256_v3 = vpack.c.bf16 %v2850_v30, %v2848_v45  ;;  %v2860_v1 = vld [vmem:[#allocation12 + $0x568] sm:$0xff]  ;;  %v2862_v62 = vld [vmem:[#allocation12 + $0x578] sm:$0xff]  ;;  %v2875_v45 = vld [vmem:[#allocation12 + $0x5e0] sm:$0xff] }
 0x4f6   : > { %5229 = vmatprep.subr.bf16.mxu0 %v5228_v19  ;;  %v2847_v19 = vld [vmem:[#allocation12 + $0x500] sm:$0xff]  ;;  %v5268_v63 = vpack.c.bf16 %v2862_v62, %v2860_v1  ;;  %v2877_v30 = vld [vmem:[#allocation12 + $0x5f0] sm:$0xff]  ;;  %v3018_v62 = vld [vmem:[#allocation12 + $0x648] sm:$0xff] }
 0x4f7   : > { %v5258_v23 = vpack.c.bf16 %v2849_v41, %v2847_v19  ;;  %v2810_v19 = vld [vmem:[#allocation3] sm:$0xfc]  ;;  %v5286_v41 = vpack.c.bf16 %v2877_v30, %v2875_v45  ;;  %v3025_v45 = vld [vmem:[#allocation12 + $0x680] sm:$0xff] }
 0x4f8   : > { %2792 = vmatmul.mubr.f32.gmra.mrb[10].mxu0 %v6850_v10  ;;  %v3027_v30 = vld [vmem:[#allocation12 + $0x690] sm:$0xff] }
 0x4f9   : > { %2797 = vmatprep.mubr.f32.mxu0 %v6843_v0  ;;  %5231 = vmatpush1.bf16.msra.mxu0 %v5230_v53  ;;  %v5260_v53 = vpack.c.bf16 %v2854_v50, %v2852_v46  ;;  %v3009_v50 = vld [vmem:[#allocation12 + $0x600] sm:$0xff] }
 0x4fa   : > { %5233 = vmatprep.subr.bf16.mxu0 %v5232_v51  ;;  %v2851_v51 = vld [vmem:[#allocation12 + $0x520] sm:$0xff] }
 0x4fb   : > { %v5262_v4 = vpack.c.bf16 %v2853_v35, %v2851_v51  ;;  %v2884_v51 = vrot.slane %v6850_v10, 2  ;;  %v3014_v35 = vld [vmem:[#allocation12 + $0x628] sm:$0xff] }
 0x4fc   : > { %2798 = vmatmul.mubr.f32.gmra.mrb[12].mxu0 %v6839_v49 }
 0x4fd   : > { %2803 = vmatprep.mubr.f32.mxu0 %v6860_v9  ;;  %5235 = vmatpush1.bf16.msra.mxu0 %v5234_v59  ;;  %v5264_v59 = vpack.c.bf16 %v2858_v57, %v2856_v54  ;;  %v3016_v54 = vld [vmem:[#allocation12 + $0x638] sm:$0xff] }
 0x4fe   : > { %5237 = vmatprep.subr.bf16.mxu0 %v5236_v61  ;;  %v2857_v61 = vld [vmem:[#allocation12 + $0x550] sm:$0xff] }
 0x4ff   : > { %v5266_v58 = vpack.c.bf16 %v2857_v61, %v2855_v60  ;;  %v3013_v60 = vld [vmem:[#allocation12 + $0x620] sm:$0xff]  ;;  %v3015_v61 = vld [vmem:[#allocation12 + $0x630] sm:$0xff] }
 0x500   : > { %2804 = vmatmul.mubr.f32.gmra.mrb[14].mxu0 %v6853_v11 }
 0x501   : > { %5239 = vmatpush1.bf16.msra.mxu0 %v5238_v7  ;;  %2973 = vmatprep.mubr.f32.mxu0 %v2888_v44  ;;  %v2861_v7 = vld [vmem:[#allocation12 + $0x570] sm:$0xff] }
 0x502   : > { %5241 = vmatprep.subr.bf16.mxu0 %v5240_v24  ;;  %v2864_v24 = vld [vmem:[#allocation12 + $0x588] sm:$0xff]  ;;  %v5270_v33 = vpack.c.bf16 %v2861_v7, %v2859_v52  ;;  %v2865_v44 = vld [vmem:[#allocation12 + $0x590] sm:$0xff]  ;;  %v2895_v52 = vrot.slane %v6860_v9, 2  ;;  %v2889_v7 = vrot.slane %v6839_v49, 2 }
 0x503   : > { %v5272_v14 = vpack.c.bf16 %v2866_v8, %v2864_v24  ;;  %v5274_v20 = vpack.c.bf16 %v2865_v44, %v2863_v42  ;;  %v5294_v24 = vpack.c.bf16 %v3015_v61, %v3013_v60  ;;  %v2813_v8 = vld [vmem:[#allocation3 + $0x48] sm:$0x3]  ;;  %v3040_v60 = vld [vmem:[#allocation12 + $0x6f8] sm:$0xff] }
 0x504   : > { %v3019_v42 = vld [vmem:[#allocation12 + $0x650] sm:$0xff]  ;;  %v2890_v44 = vsel %vm1117_vm11, %v2884_v51, %v2889_v7 }
 0x505   : > { %5243 = vmatpush1.bf16.msra.mxu0 %v5242_v16  ;;  %v2868_v16 = vld [vmem:[#allocation12 + $0x5a8] sm:$0xff] }
 0x506   : > { %5245 = vmatprep.subr.bf16.mxu0 %v5244_v17  ;;  %v2870_v17 = vld [vmem:[#allocation12 + $0x5b8] sm:$0xff] }
 0x507   : > { %v5276_v56 = vpack.c.bf16 %v2870_v17, %v2868_v16  ;;  %v2893_v16 = vrot.slane %v6853_v11, 2  ;;  %v3022_v17 = vld [vmem:[#allocation12 + $0x668] sm:$0xff] }
 0x509   : > { %5247 = vmatpush1.bf16.msra.mxu0 %v5246_v28  ;;  %v2872_v28 = vld [vmem:[#allocation12 + $0x5c8] sm:$0xff] }
 0x50a   : > { %5249 = vmatprep.subr.bf16.mxu0 %v5248_v31  ;;  %v2874_v31 = vld [vmem:[#allocation12 + $0x5d8] sm:$0xff] }
 0x50b   : > { %v5280_v34 = vpack.c.bf16 %v2874_v31, %v2872_v28  ;;  %v3021_v31 = vld [vmem:[#allocation12 + $0x660] sm:$0xff] }
 0x50d   : > { %5251 = vmatpush1.bf16.msra.mxu0 %v5250_v39  ;;  %v2876_v39 = vld [vmem:[#allocation12 + $0x5e8] sm:$0xff] }
 0x50e   : > { %5253 = vmatprep.subr.bf16.mxu0 %v5252_v40  ;;  %v2878_v40 = vld [vmem:[#allocation12 + $0x5f8] sm:$0xff] }
 0x50f   : > { %v5284_v43 = vpack.c.bf16 %v2878_v40, %v2876_v39  ;;  %v3028_v39 = vld [vmem:[#allocation12 + $0x698] sm:$0xff] }
 0x511   : > { %5255 = vmatpush1.bf16.msra.mxu0 %v5254_v12  ;;  %v3010_v12 = vld [vmem:[#allocation12 + $0x608] sm:$0xff] }
 0x512   : > { %5257 = vmatprep.subr.bf16.mxu0 %v5256_v3  ;;  %v3012_v3 = vld [vmem:[#allocation12 + $0x618] sm:$0xff] }
 0x513   : > { %v5288_v46 = vpack.c.bf16 %v3012_v3, %v3010_v12  ;;  %v2898_v12 = vsel %vm1117_vm11, %v2893_v16, %v2897_v36  ;;  %v3030_v3 = vld [vmem:[#allocation12 + $0x6a8] sm:$0xff] }
 0x515   : > { %5259 = vmatpush1.bf16.msra.mxu0 %v5258_v23  ;;  %v3011_v23 = vld [vmem:[#allocation12 + $0x610] sm:$0xff] }
 0x516   : > { %5261 = vmatprep.subr.bf16.mxu0 %v5260_v53  ;;  %v2883_v53 = vrot.slane %v2810_v19, 2  ;;  %v5290_v57 = vpack.c.bf16 %v3011_v23, %v3009_v50  ;;  %v3032_v19 = vld [vmem:[#allocation12 + $0x6b8] sm:$0xff]  ;;  %v3029_v50 = vld [vmem:[#allocation12 + $0x6a0] sm:$0xff]  ;;  %v3031_v23 = vld [vmem:[#allocation12 + $0x6b0] sm:$0xff] }
 0x518   : > { %v2885_v1 = vsel %vm1117_vm11, %v2883_v53, %v2884_v51  ;;  %v3034_v53 = vld [vmem:[#allocation12 + $0x6c8] sm:$0xff]  ;;  %v3036_v51 = vld [vmem:[#allocation12 + $0x6d8] sm:$0xff] }
 0x519   : > { %5263 = vmatpush1.bf16.msra.mxu0 %v5262_v4  ;;  %v2891_v4 = vrot.slane %v6843_v0, 2 }
 0x51a   : > { %5265 = vmatprep.subr.bf16.mxu0 %v5264_v59  ;;  %v5292_v59 = vpack.c.bf16 %v3016_v54, %v3014_v35  ;;  %v5310_v35 = vpack.c.bf16 %v3031_v23, %v3029_v50  ;;  %v5312_v54 = vpack.c.bf16 %v3036_v51, %v3034_v53  ;;  %v3061_v50 = vld [vmem:[#allocation12 + $0x7a0] sm:$0xff]  ;;  %v3063_v23 = vld [vmem:[#allocation12 + $0x7b0] sm:$0xff]  ;;  %v3066_v53 = vld [vmem:[#allocation12 + $0x7c8] sm:$0xff] }
 0x51b   : > { %v3068_v51 = vld [vmem:[#allocation12 + $0x7d8] sm:$0xff] }
 0x51d   : > { %5267 = vmatpush1.bf16.msra.mxu0 %v5266_v58  ;;  %v3020_v58 = vld [vmem:[#allocation12 + $0x658] sm:$0xff] }
 0x51e   : > { %5269 = vmatprep.subr.bf16.mxu0 %v5268_v63  ;;  %v2892_v63 = vsel %vm1117_vm11, %v2887_v55, %v2891_v4  ;;  %v2896_v55 = vsel %vm1117_vm11, %v2891_v4, %v2895_v52  ;;  %v3035_v4 = vld [vmem:[#allocation12 + $0x6d0] sm:$0xff] }
 0x521   : > { %5271 = vmatpush1.bf16.msra.mxu0 %v5270_v33  ;;  %v5296_v33 = vpack.c.bf16 %v3020_v58, %v3018_v62  ;;  %v3039_v62 = vld [vmem:[#allocation12 + $0x6f0] sm:$0xff]  ;;  %v3042_v58 = vld [vmem:[#allocation12 + $0x708] sm:$0xff] }
 0x522   : > { %5273 = vmatprep.subr.bf16.mxu0 %v5272_v14  ;;  %v3017_v14 = vld [vmem:[#allocation12 + $0x640] sm:$0xff] }
 0x523   : > { %v5298_v22 = vpack.c.bf16 %v3019_v42, %v3017_v14  ;;  %v3048_v14 = vld [vmem:[#allocation12 + $0x738] sm:$0xff] }
 0x525   : > { %5275 = vmatpush1.bf16.msra.mxu0 %v5274_v20  ;;  %v3024_v20 = vld [vmem:[#allocation12 + $0x678] sm:$0xff] }
 0x526   : > { %5277 = vmatprep.subr.bf16.mxu0 %v5276_v56  ;;  %v2899_v56 = vrot.slane %v2813_v8, 2  ;;  %v5300_v28 = vpack.c.bf16 %v3024_v20, %v3022_v17  ;;  %v3043_v8 = vld [vmem:[#allocation12 + $0x710] sm:$0xff]  ;;  %v3050_v20 = vld [vmem:[#allocation12 + $0x748] sm:$0xff] }
 0x527   : > { %v3047_v17 = vld [vmem:[#allocation12 + $0x730] sm:$0xff] }
 0x528   : > { %v2900_v40 = vsel %vm1117_vm11, %v2895_v52, %v2899_v56 }
 0x529   : > { %5279 = vmatpush1.bf16.msra.mxu0 %v5278_v32  ;;  %v3023_v32 = vld [vmem:[#allocation12 + $0x670] sm:$0xff] }
 0x52a   : > { %5281 = vmatprep.subr.bf16.mxu0 %v5280_v34  ;;  %v2894_v34 = vsel %vm1117_vm11, %v2889_v7, %v2893_v16  ;;  %v3045_v16 = vld [vmem:[#allocation12 + $0x720] sm:$0xff] }
 0x52b   : > { %v5326_v56 = vpack.c.bf16 %v3047_v17, %v3045_v16  ;;  %v3185_v16 = vld [vmem:[#allocation12 + $0x820] sm:$0xff]  ;;  %v3187_v17 = vld [vmem:[#allocation12 + $0x830] sm:$0xff] }
 0x52d   : > { %5283 = vmatpush1.bf16.msra.mxu0 %v5282_v5  ;;  %v5302_v5 = vpack.c.bf16 %v3023_v32, %v3021_v31  ;;  %v3054_v31 = vld [vmem:[#allocation12 + $0x768] sm:$0xff]  ;;  %v3056_v32 = vld [vmem:[#allocation12 + $0x778] sm:$0xff] }
 0x52e   : > { %5285 = vmatprep.subr.bf16.mxu0 %v5284_v43  ;;  %v5304_v43 = vpack.c.bf16 %v3028_v39, %v3026_v38  ;;  %v5332_v36 = vpack.c.bf16 %v3056_v32, %v3054_v31  ;;  %v3053_v38 = vld [vmem:[#allocation12 + $0x760] sm:$0xff]  ;;  %v3055_v39 = vld [vmem:[#allocation12 + $0x770] sm:$0xff]  ;;  %v3194_v31 = vld [vmem:[#allocation12 + $0x868] sm:$0xff] }
 0x52f   : > { %v3196_v32 = vld [vmem:[#allocation12 + $0x878] sm:$0xff] }
 0x531   : > { %5287 = vmatpush1.bf16.msra.mxu0 %v5286_v41  ;;  %v5306_v41 = vpack.c.bf16 %v3027_v30, %v3025_v45  ;;  %v3057_v30 = vld [vmem:[#allocation12 + $0x780] sm:$0xff] }
 0x532   : > { %5289 = vmatprep.subr.bf16.mxu0 %v5288_v46  ;;  %v5308_v46 = vpack.c.bf16 %v3032_v19, %v3030_v3  ;;  %v3062_v3 = vld [vmem:[#allocation12 + $0x7a8] sm:$0xff]  ;;  %v3064_v19 = vld [vmem:[#allocation12 + $0x7b8] sm:$0xff] }
 0x534   : > { %2974 = vmatmul.mubr.f32.vlgmr.msra.gmra.mrb[8].mxu0 %v2885_v1 }
 0x535   : > { %2979 = vmatprep.mubr.f32.mxu0 %v2892_v63  ;;  %5291 = vmatpush1.bf16.msra.mxu0 %v5290_v57  ;;  %v3033_v57 = vld [vmem:[#allocation12 + $0x6c0] sm:$0xff]  ;;  %v3044_v63 = vld [vmem:[#allocation12 + $0x718] sm:$0xff] }
 0x536   : > { %5293 = vmatprep.subr.bf16.mxu0 %v5292_v59  ;;  %v3038_v59 = vld [vmem:[#allocation12 + $0x6e8] sm:$0xff]  ;;  %v5314_v61 = vpack.c.bf16 %v3035_v4, %v3033_v57  ;;  %v5320_v7 = vpack.c.bf16 %v3044_v63, %v3042_v58  ;;  %v3065_v57 = vld [vmem:[#allocation12 + $0x7c0] sm:$0xff]  ;;  %v3067_v4 = vld [vmem:[#allocation12 + $0x7d0] sm:$0xff] }
 0x537   : > { %v5316_v1 = vpack.c.bf16 %v3040_v60, %v3038_v59  ;;  %v3070_v59 = vld [vmem:[#allocation12 + $0x7e8] sm:$0xff]  ;;  %v3072_v60 = vld [vmem:[#allocation12 + $0x7f8] sm:$0xff] }
 0x538   : > { %2980 = vmatmul.mubr.f32.gmra.mrb[10].mxu0 %v2890_v44  ;;  %v3182_v58 = vld [vmem:[#allocation12 + $0x808] sm:$0xff]  ;;  %v3184_v63 = vld [vmem:[#allocation12 + $0x818] sm:$0xff] }
 0x539   : > { %2985 = vmatprep.mubr.f32.mxu0 %v2896_v55  ;;  %5295 = vmatpush1.bf16.msra.mxu0 %v5294_v24  ;;  %v3041_v24 = vld [vmem:[#allocation12 + $0x700] sm:$0xff]  ;;  %v3052_v55 = vld [vmem:[#allocation12 + $0x758] sm:$0xff] }
 0x53a   : > { %5297 = vmatprep.subr.bf16.mxu0 %v5296_v33  ;;  %v3046_v33 = vld [vmem:[#allocation12 + $0x728] sm:$0xff]  ;;  %v5322_v42 = vpack.c.bf16 %v3043_v8, %v3041_v24  ;;  %v5328_v2 = vpack.c.bf16 %v3052_v55, %v3050_v20  ;;  %v3181_v24 = vld [vmem:[#allocation12 + $0x800] sm:$0xff]  ;;  %v3183_v8 = vld [vmem:[#allocation12 + $0x810] sm:$0xff] }
 0x53b   : > { %v5324_v44 = vpack.c.bf16 %v3048_v14, %v3046_v33  ;;  %v3186_v33 = vld [vmem:[#allocation12 + $0x828] sm:$0xff]  ;;  %v3188_v14 = vld [vmem:[#allocation12 + $0x838] sm:$0xff] }
 0x53c   : > { %2986 = vmatmul.mubr.f32.gmra.mrb[12].mxu0 %v2894_v34  ;;  %v3190_v20 = vld [vmem:[#allocation12 + $0x848] sm:$0xff]  ;;  %v3192_v55 = vld [vmem:[#allocation12 + $0x858] sm:$0xff] }
 0x53d   : > { %2991 = vmatprep.mubr.f32.mxu0 %v2900_v40  ;;  %5299 = vmatpush1.bf16.msra.mxu0 %v5298_v22  ;;  %v3049_v22 = vld [vmem:[#allocation12 + $0x740] sm:$0xff]  ;;  %v3058_v40 = vld [vmem:[#allocation12 + $0x788] sm:$0xff] }
 0x53e   : > { %5301 = vmatprep.subr.bf16.mxu0 %v5300_v28  ;;  %v3051_v28 = vld [vmem:[#allocation12 + $0x750] sm:$0xff] }
 0x53f   : > { %v5330_v34 = vpack.c.bf16 %v3051_v28, %v3049_v22  ;;  %v3189_v22 = vld [vmem:[#allocation12 + $0x840] sm:$0xff]  ;;  %v3191_v28 = vld [vmem:[#allocation12 + $0x850] sm:$0xff] }
 0x540   : > { %2992 = vmatmul.mubr.f32.gmra.mrb[14].mxu0 %v2898_v12  ;;  %v3059_v12 = vld [vmem:[#allocation12 + $0x790] sm:$0xff] }
 0x541   : > { %5303 = vmatpush1.bf16.msra.mxu0 %v5302_v5  ;;  %3137 = vmatprep.mubr.f32.mxu0 %v6855_v6  ;;  %v3037_v6 = vld [vmem:[#allocation12 + $0x6e0] sm:$0xff]  ;;  %v3060_v5 = vld [vmem:[#allocation12 + $0x798] sm:$0xff] }
 0x542   : > { %5305 = vmatprep.subr.bf16.mxu0 %v5304_v43  ;;  %v5318_v52 = vpack.c.bf16 %v3039_v62, %v3037_v6  ;;  %v5334_v43 = vpack.c.bf16 %v3055_v39, %v3053_v38  ;;  %v5336_v45 = vpack.c.bf16 %v3060_v5, %v3058_v40  ;;  %v3069_v6 = vld [vmem:[#allocation12 + $0x7e0] sm:$0xff]  ;;  %v3071_v62 = vld [vmem:[#allocation12 + $0x7f0] sm:$0xff]  ;;  %v3198_v40 = vld [vmem:[#allocation12 + $0x888] sm:$0xff] }
 0x543   : > { %v3193_v38 = vld [vmem:[#allocation12 + $0x860] sm:$0xff]  ;;  %v3200_v5 = vld [vmem:[#allocation12 + $0x898] sm:$0xff] }
 0x544   : > { %v3171_v39 = vld [vmem:[#allocation3 + $0x18] sm:$0xfe] }
 0x545   : > { %5307 = vmatpush1.bf16.msra.mxu0 %v5306_v41  ;;  %v5338_v41 = vpack.c.bf16 %v3059_v12, %v3057_v30  ;;  %v3197_v30 = vld [vmem:[#allocation12 + $0x880] sm:$0xff]  ;;  %v3199_v12 = vld [vmem:[#allocation12 + $0x890] sm:$0xff] }
 0x546   : > { %5309 = vmatprep.subr.bf16.mxu0 %v5308_v46  ;;  %v5340_v46 = vpack.c.bf16 %v3064_v19, %v3062_v3  ;;  %v6934_v3 = vld [vmem:[#allocation3 + $0x40] sm:$0xff] }
 0x547   : > { %v3202_v19 = vld [vmem:[#allocation12 + $0x8a8] sm:$0xff] }
 0x549   : > { %5311 = vmatpush1.bf16.msra.mxu0 %v5310_v35  ;;  %v5342_v35 = vpack.c.bf16 %v3063_v23, %v3061_v50  ;;  %v3201_v50 = vld [vmem:[#allocation12 + $0x8a0] sm:$0xff]  ;;  %v3203_v23 = vld [vmem:[#allocation12 + $0x8b0] sm:$0xff] }
 0x54a   : > { %5313 = vmatprep.subr.bf16.mxu0 %v5312_v54  ;;  %v5344_v54 = vpack.c.bf16 %v3068_v51, %v3066_v53  ;;  %v3206_v53 = vld [vmem:[#allocation12 + $0x8c8] sm:$0xff]  ;;  %v3208_v51 = vld [vmem:[#allocation12 + $0x8d8] sm:$0xff] }
 0x54d   : > { %5315 = vmatpush1.bf16.msra.mxu0 %v5314_v61  ;;  %v5346_v61 = vpack.c.bf16 %v3067_v4, %v3065_v57  ;;  %v3205_v57 = vld [vmem:[#allocation12 + $0x8c0] sm:$0xff]  ;;  %v3207_v4 = vld [vmem:[#allocation12 + $0x8d0] sm:$0xff] }
 0x54e   : > { %5317 = vmatprep.subr.bf16.mxu0 %v5316_v1  ;;  %v5348_v1 = vpack.c.bf16 %v3072_v60, %v3070_v59  ;;  %v3210_v59 = vld [vmem:[#allocation12 + $0x8e8] sm:$0xff]  ;;  %v3212_v60 = vld [vmem:[#allocation12 + $0x8f8] sm:$0xff] }
 0x551   : > { %5319 = vmatpush1.bf16.msra.mxu0 %v5318_v52  ;;  %v5350_v52 = vpack.c.bf16 %v3071_v62, %v3069_v6  ;;  %v3209_v6 = vld [vmem:[#allocation12 + $0x8e0] sm:$0xff]  ;;  %v3211_v62 = vld [vmem:[#allocation12 + $0x8f0] sm:$0xff] }
 0x552   : > { %5321 = vmatprep.subr.bf16.mxu0 %v5320_v7  ;;  %v5352_v7 = vpack.c.bf16 %v3184_v63, %v3182_v58  ;;  %v3214_v58 = vld [vmem:[#allocation12 + $0x908] sm:$0xff]  ;;  %v3216_v63 = vld [vmem:[#allocation12 + $0x918] sm:$0xff] }
 0x555   : > { %5323 = vmatpush1.bf16.msra.mxu0 %v5322_v42  ;;  %v5354_v42 = vpack.c.bf16 %v3183_v8, %v3181_v24  ;;  %v3213_v24 = vld [vmem:[#allocation12 + $0x900] sm:$0xff]  ;;  %v3215_v8 = vld [vmem:[#allocation12 + $0x910] sm:$0xff] }
 0x556   : > { %5325 = vmatprep.subr.bf16.mxu0 %v5324_v44  ;;  %v5356_v44 = vpack.c.bf16 %v3188_v14, %v3186_v33  ;;  %v3218_v33 = vld [vmem:[#allocation12 + $0x928] sm:$0xff]  ;;  %v3220_v14 = vld [vmem:[#allocation12 + $0x938] sm:$0xff] }
 0x559   : > { %5327 = vmatpush1.bf16.msra.mxu0 %v5326_v56  ;;  %v5358_v56 = vpack.c.bf16 %v3187_v17, %v3185_v16  ;;  %v3217_v16 = vld [vmem:[#allocation12 + $0x920] sm:$0xff]  ;;  %v3219_v17 = vld [vmem:[#allocation12 + $0x930] sm:$0xff] }
 0x55a   : > { %5329 = vmatprep.subr.bf16.mxu0 %v5328_v2  ;;  %v5360_v2 = vpack.c.bf16 %v3192_v55, %v3190_v20  ;;  %v3222_v20 = vld [vmem:[#allocation12 + $0x948] sm:$0xff]  ;;  %v3224_v55 = vld [vmem:[#allocation12 + $0x958] sm:$0xff] }
 0x55d   : > { %5331 = vmatpush1.bf16.msra.mxu0 %v5330_v34  ;;  %v5362_v34 = vpack.c.bf16 %v3191_v28, %v3189_v22  ;;  %v3221_v22 = vld [vmem:[#allocation12 + $0x940] sm:$0xff]  ;;  %v3223_v28 = vld [vmem:[#allocation12 + $0x950] sm:$0xff] }
 0x55e   : > { %5333 = vmatprep.subr.bf16.mxu0 %v5332_v36  ;;  %v6929_v36 = vld [vmem:[#allocation3 + $0x28] sm:$0xff] }
 0x561   : > { %5335 = vmatpush1.bf16.msra.mxu0 %v5334_v43  ;;  %v3259_v43 = vrot.slane %v6929_v36, 1 }
 0x562   : > { %5337 = vmatprep.subr.bf16.mxu0 %v5336_v45  ;;  %v5368_v45 = vpack.c.bf16 %v3200_v5, %v3198_v40  ;;  %v3232_v40 = vld [vmem:[#allocation12 + $0x998] sm:$0xff] }
 0x565   : > { %5339 = vmatpush1.bf16.msra.mxu0 %v5338_v41  ;;  %v3204_v41 = vld [vmem:[#allocation12 + $0x8b8] sm:$0xff] }
 0x566   : > { %5341 = vmatprep.subr.bf16.mxu0 %v5340_v46  ;;  %v5372_v46 = vpack.c.bf16 %v3204_v41, %v3202_v19 }
 0x569   : > { %5343 = vmatpush1.bf16.msra.mxu0 %v5342_v35  ;;  %v5374_v35 = vpack.c.bf16 %v3203_v23, %v3201_v50  ;;  %v3240_v50 = vld [vmem:[#allocation12 + $0x9d8] sm:$0xff] }
 0x56a   : > { %5345 = vmatprep.subr.bf16.mxu0 %v5344_v54  ;;  %v5376_v54 = vpack.c.bf16 %v3208_v51, %v3206_v53  ;;  %v3237_v51 = vld [vmem:[#allocation12 + $0x9c0] sm:$0xff] }
 0x56d   : > { %5347 = vmatpush1.bf16.msra.mxu0 %v5346_v61  ;;  %v5378_v61 = vpack.c.bf16 %v3207_v4, %v3205_v57  ;;  %v3244_v57 = vld [vmem:[#allocation12 + $0x9f8] sm:$0xff] }
 0x56e   : > { %5349 = vmatprep.subr.bf16.mxu0 %v5348_v1  ;;  %v5380_v1 = vpack.c.bf16 %v3212_v60, %v3210_v59  ;;  %v3241_v60 = vld [vmem:[#allocation12 + $0x9e0] sm:$0xff] }
 0x571   : > { %5351 = vmatpush1.bf16.msra.mxu0 %v5350_v52  ;;  %v5382_v52 = vpack.c.bf16 %v3211_v62, %v3209_v6  ;;  %v3386_v6 = vld [vmem:[#allocation12 + $0xa18] sm:$0xff]  ;;  %v6940_v62 = vld [vmem:[#allocation3 + $0x20] sm:$0xff] }
 0x572   : > { %5353 = vmatprep.subr.bf16.mxu0 %v5352_v7  ;;  %v5384_v7 = vpack.c.bf16 %v3216_v63, %v3214_v58  ;;  %v6942_v63 = vld [vmem:[#allocation3 + $0x38] sm:$0xff] }
 0x574   : > { %3138 = vmatmul.mubr.f32.vlgmr.msra.gmra.mrb[8].mxu0 %v6850_v10  ;;  %v5364_v10 = vpack.c.bf16 %v3196_v32, %v3194_v31  ;;  %v3226_v31 = vld [vmem:[#allocation12 + $0x968] sm:$0xff]  ;;  %v3228_v32 = vld [vmem:[#allocation12 + $0x978] sm:$0xff] }
 0x575   : > { %3143 = vmatprep.mubr.f32.mxu0 %v6843_v0  ;;  %5355 = vmatpush1.bf16.msra.mxu0 %v5354_v42  ;;  %v3195_v0 = vld [vmem:[#allocation12 + $0x870] sm:$0xff]  ;;  %v5386_v42 = vpack.c.bf16 %v3215_v8, %v3213_v24  ;;  %v3383_v24 = vld [vmem:[#allocation12 + $0xa00] sm:$0xff] }
 0x576   : > { %5357 = vmatprep.subr.bf16.mxu0 %v5356_v44  ;;  %v5388_v44 = vpack.c.bf16 %v3220_v14, %v3218_v33  ;;  %v3385_v8 = vld [vmem:[#allocation12 + $0xa10] sm:$0xff]  ;;  %v3256_v33 = vrot.slane %v6940_v62, 1  ;;  %v3388_v14 = vld [vmem:[#allocation12 + $0xa28] sm:$0xff] }
 0x578   : > { %3144 = vmatmul.mubr.f32.gmra.mrb[10].mxu0 %v6839_v49  ;;  %v5366_v49 = vpack.c.bf16 %v3195_v0, %v3193_v38  ;;  %v3225_v38 = vld [vmem:[#allocation12 + $0x960] sm:$0xff]  ;;  %v3227_v0 = vld [vmem:[#allocation12 + $0x970] sm:$0xff] }
 0x579   : > { %3149 = vmatprep.mubr.f32.mxu0 %v6860_v9  ;;  %5359 = vmatpush1.bf16.msra.mxu0 %v5358_v56  ;;  %v3258_v9 = vrot.slane %v3171_v39, 1  ;;  %v5390_v56 = vpack.c.bf16 %v3219_v17, %v3217_v16  ;;  %v3230_v39 = vld [vmem:[#allocation12 + $0x988] sm:$0xff]  ;;  %v5398_v5 = vpack.c.bf16 %v3227_v0, %v3225_v38  ;;  %v5418_v17 = vpack.c.bf16 %v3385_v8, %v3383_v24 }
 0x57a   : > { %5361 = vmatprep.subr.bf16.mxu0 %v5360_v2  ;;  %v5392_v2 = vpack.c.bf16 %v3224_v55, %v3222_v20  ;;  %v6948_v20 = vld [vmem:[#allocation3 + $0x48] sm:$0xff] }
 0x57b   : > { %v6961_v38 = vrot.slane %v6948_v20, 1 }
 0x57c   : > { %3150 = vmatmul.mubr.f32.gmra.mrb[12].mxu0 %v6853_v11  ;;  %v3260_v11 = vsel %vm839_vm10, %v3258_v9, %v3259_v43  ;;  %v3229_v9 = vld [vmem:[#allocation12 + $0x980] sm:$0xff] }
 0x57d   : > { %3155 = vmatprep.mubr.f32.mxu0 %v6873_v48  ;;  %5363 = vmatpush1.bf16.msra.mxu0 %v5362_v34  ;;  %v5370_v48 = vpack.c.bf16 %v3199_v12, %v3197_v30  ;;  %v5394_v34 = vpack.c.bf16 %v3223_v28, %v3221_v22  ;;  %v3234_v30 = vld [vmem:[#allocation12 + $0x9a8] sm:$0xff]  ;;  %v3236_v12 = vld [vmem:[#allocation12 + $0x9b8] sm:$0xff] }
 0x57e   : > { %5365 = vmatprep.subr.bf16.mxu0 %v5364_v10  ;;  %v5396_v10 = vpack.c.bf16 %v3228_v32, %v3226_v31  ;;  %v5404_v41 = vpack.c.bf16 %v3236_v12, %v3234_v30  ;;  %v6951_v28 = vld [vmem:[#allocation3 + $0x30] sm:$0xff]  ;;  %v3392_v32 = vld [vmem:[#allocation12 + $0xa48] sm:$0xff] }
 0x57f   : > { %v6954_v31 = vrot.slane %v6951_v28, 1  ;;  %v3396_v30 = vld [vmem:[#allocation12 + $0xa68] sm:$0xff]  ;;  %v3398_v12 = vld [vmem:[#allocation12 + $0xa78] sm:$0xff] }
 0x580   : > { %3156 = vmatmul.mubr.f32.gmra.mrb[14].mxu0 %v6934_v3 }
 0x581   : > { %5367 = vmatpush1.bf16.msra.mxu0 %v5366_v49  ;;  %3345 = vmatprep.mubr.f32.mxu0 %v3260_v11  ;;  %v5400_v49 = vpack.c.bf16 %v3232_v40, %v3230_v39  ;;  %v3233_v11 = vld [vmem:[#allocation12 + $0x9a0] sm:$0xff] }
 0x582   : > { %5369 = vmatprep.subr.bf16.mxu0 %v5368_v45  ;;  %v3231_v45 = vld [vmem:[#allocation12 + $0x990] sm:$0xff]  ;;  %v3179_v39 = vld [vmem:[#allocation3 + $0x58] sm:$0x1] }
 0x583   : > { %v5402_v19 = vpack.c.bf16 %v3231_v45, %v3229_v9  ;;  %v3262_v9 = vsel %vm839_vm10, %v3256_v33, %v6954_v31  ;;  %v3265_v45 = vrot.slane %v6934_v3, 1 }
 0x585   : > { %5371 = vmatpush1.bf16.msra.mxu0 %v5370_v48  ;;  %v3235_v48 = vld [vmem:[#allocation12 + $0x9b0] sm:$0xff] }
 0x586   : > { %5373 = vmatprep.subr.bf16.mxu0 %v5372_v46  ;;  %v3238_v46 = vld [vmem:[#allocation12 + $0x9c8] sm:$0xff]  ;;  %v5406_v23 = vpack.c.bf16 %v3235_v48, %v3233_v11  ;;  %v5428_v48 = vpack.c.bf16 %v3398_v12, %v3396_v30  ;;  %v3415_v30 = vld [vmem:[#allocation12 + $0xb00] sm:$0xff]  ;;  %v3417_v12 = vld [vmem:[#allocation12 + $0xb10] sm:$0xff] }
 0x587   : > { %v5408_v53 = vpack.c.bf16 %v3240_v50, %v3238_v46  ;;  %v3395_v46 = vld [vmem:[#allocation12 + $0xa60] sm:$0xff]  ;;  %v3397_v50 = vld [vmem:[#allocation12 + $0xa70] sm:$0xff] }
 0x589   : > { %5375 = vmatpush1.bf16.msra.mxu0 %v5374_v35  ;;  %v3239_v35 = vld [vmem:[#allocation12 + $0x9d0] sm:$0xff] }
 0x58a   : > { %5377 = vmatprep.subr.bf16.mxu0 %v5376_v54  ;;  %v3242_v54 = vld [vmem:[#allocation12 + $0x9e8] sm:$0xff]  ;;  %v5410_v4 = vpack.c.bf16 %v3239_v35, %v3237_v51 }
 0x58b   : > { %v5412_v59 = vpack.c.bf16 %v3244_v57, %v3242_v54  ;;  %v3379_v51 = vld [vmem:[#allocation3 + $0x18] sm:$0xfc]  ;;  %v3402_v54 = vld [vmem:[#allocation12 + $0xa98] sm:$0xff] }
 0x58c   : > { %v3400_v35 = vld [vmem:[#allocation12 + $0xa88] sm:$0xff] }
 0x58d   : > { %5379 = vmatpush1.bf16.msra.mxu0 %v5378_v61  ;;  %v3243_v61 = vld [vmem:[#allocation12 + $0x9f0] sm:$0xff] }
 0x58e   : > { %5381 = vmatprep.subr.bf16.mxu0 %v5380_v1  ;;  %v3384_v1 = vld [vmem:[#allocation12 + $0xa08] sm:$0xff]  ;;  %v5414_v58 = vpack.c.bf16 %v3243_v61, %v3241_v60  ;;  %v3454_v60 = vrot.slane %v3379_v51, 2  ;;  %v5432_v61 = vpack.c.bf16 %v3402_v54, %v3400_v35  ;;  %v3423_v54 = vld [vmem:[#allocation12 + $0xb40] sm:$0xff] }
 0x591   : > { %5383 = vmatpush1.bf16.msra.mxu0 %v5382_v52  ;;  %v3170_v52 = vld [vmem:[#allocation3 + $0x10] sm:$0xfe] }
 0x592   : > { %5385 = vmatprep.subr.bf16.mxu0 %v5384_v7  ;;  %v5416_v7 = vpack.c.bf16 %v3386_v6, %v3384_v1  ;;  %v3255_v16 = vrot.slane %v3170_v52, 1  ;;  %v3399_v1 = vld [vmem:[#allocation12 + $0xa80] sm:$0xff]  ;;  %v3401_v6 = vld [vmem:[#allocation12 + $0xa90] sm:$0xff]  ;;  %v3404_v52 = vld [vmem:[#allocation12 + $0xaa8] sm:$0xff] }
 0x593   : > { %v5434_v8 = vpack.c.bf16 %v3401_v6, %v3399_v1  ;;  %v3427_v6 = vld [vmem:[#allocation12 + $0xb60] sm:$0xff] }
 0x594   : > { %v3257_v22 = vsel %vm839_vm10, %v3255_v16, %v3256_v33  ;;  %v3408_v16 = vld [vmem:[#allocation12 + $0xac8] sm:$0xff] }
 0x595   : > { %5387 = vmatpush1.bf16.msra.mxu0 %v5386_v42  ;;  %v3390_v42 = vld [vmem:[#allocation12 + $0xa38] sm:$0xff] }
 0x596   : > { %5389 = vmatprep.subr.bf16.mxu0 %v5388_v44  ;;  %v6946_v44 = vrot.slane %v6942_v63, 1  ;;  %v5420_v55 = vpack.c.bf16 %v3390_v42, %v3388_v14  ;;  %v3403_v14 = vld [vmem:[#allocation12 + $0xaa0] sm:$0xff]  ;;  %v3405_v42 = vld [vmem:[#allocation12 + $0xab0] sm:$0xff] }
 0x599   : > { %5391 = vmatpush1.bf16.msra.mxu0 %v5390_v56  ;;  %v3387_v56 = vld [vmem:[#allocation12 + $0xa20] sm:$0xff] }
 0x59a   : > { %5393 = vmatprep.subr.bf16.mxu0 %v5392_v2  ;;  %v3389_v2 = vld [vmem:[#allocation12 + $0xa30] sm:$0xff] }
 0x59b   : > { %v5422_v0 = vpack.c.bf16 %v3389_v2, %v3387_v56  ;;  %v3407_v2 = vld [vmem:[#allocation12 + $0xac0] sm:$0xff] }
 0x59d   : > { %5395 = vmatpush1.bf16.msra.mxu0 %v5394_v34  ;;  %v3394_v34 = vld [vmem:[#allocation12 + $0xa58] sm:$0xff] }
 0x59e   : > { %5397 = vmatprep.subr.bf16.mxu0 %v5396_v10  ;;  %v3264_v10 = vsel %vm839_vm10, %v3259_v43, %v6946_v44  ;;  %v5424_v40 = vpack.c.bf16 %v3394_v34, %v3392_v32  ;;  %v6969_v43 = vsel %vm839_vm10, %v6946_v44, %v6961_v38  ;;  %v3412_v32 = vld [vmem:[#allocation12 + $0xae8] sm:$0xff]  ;;  %v3414_v34 = vld [vmem:[#allocation12 + $0xaf8] sm:$0xff] }
 0x5a1   : > { %5399 = vmatpush1.bf16.msra.mxu0 %v5398_v5  ;;  %v3391_v5 = vld [vmem:[#allocation12 + $0xa40] sm:$0xff] }
 0x5a2   : > { %5401 = vmatprep.subr.bf16.mxu0 %v5400_v49  ;;  %v3393_v49 = vld [vmem:[#allocation12 + $0xa50] sm:$0xff] }
 0x5a3   : > { %v5426_v11 = vpack.c.bf16 %v3393_v49, %v3391_v5  ;;  %v3416_v5 = vld [vmem:[#allocation12 + $0xb08] sm:$0xff]  ;;  %v3418_v49 = vld [vmem:[#allocation12 + $0xb18] sm:$0xff] }
 0x5a5   : > { %5403 = vmatpush1.bf16.msra.mxu0 %v5402_v19  ;;  %v3271_v19 = vrot.slane %v3179_v39, 1  ;;  %v3411_v39 = vld [vmem:[#allocation12 + $0xae0] sm:$0xff] }
 0x5a6   : > { %5405 = vmatprep.subr.bf16.mxu0 %v5404_v41  ;;  %v3178_v41 = vld [vmem:[#allocation3 + $0x50] sm:$0x1] }
 0x5a7   : > { %v3272_v57 = vsel %vm839_vm10, %v6961_v38, %v3271_v19  ;;  %v3420_v19 = vld [vmem:[#allocation12 + $0xb28] sm:$0xff] }
 0x5a9   : > { %5407 = vmatpush1.bf16.msra.mxu0 %v5406_v23  ;;  %v3266_v23 = vsel %vm839_vm10, %v6954_v31, %v3265_v45 }
 0x5aa   : > { %5409 = vmatprep.subr.bf16.mxu0 %v5408_v53  ;;  %v3269_v53 = vrot.slane %v3178_v41, 1  ;;  %v3422_v41 = vld [vmem:[#allocation12 + $0xb38] sm:$0xff] }
 0x5ad   : > { %5411 = vmatpush1.bf16.msra.mxu0 %v5410_v4  ;;  %v3455_v4 = vrot.slane %v6929_v36, 2 }
 0x5ae   : > { %5413 = vmatprep.subr.bf16.mxu0 %v5412_v59  ;;  %v5430_v59 = vpack.c.bf16 %v3397_v50, %v3395_v46  ;;  %v3419_v46 = vld [vmem:[#allocation12 + $0xb20] sm:$0xff]  ;;  %v3421_v50 = vld [vmem:[#allocation12 + $0xb30] sm:$0xff] }
 0x5af   : > { %v3456_v24 = vsel %vm1117_vm11, %v3454_v60, %v3455_v4  ;;  %v5454_v51 = vpack.c.bf16 %v3421_v50, %v3419_v46  ;;  %v3430_v60 = vld [vmem:[#allocation12 + $0xb78] sm:$0xff]  ;;  %v3577_v46 = vld [vmem:[#allocation12 + $0xc00] sm:$0xff]  ;;  %v3579_v50 = vld [vmem:[#allocation12 + $0xc10] sm:$0xff] }
 0x5b1   : > { %5415 = vmatpush1.bf16.msra.mxu0 %v5414_v58  ;;  %v3270_v58 = vsel %vm839_vm10, %v3265_v45, %v3269_v53  ;;  %v5448_v45 = vpack.c.bf16 %v3418_v49, %v3416_v5  ;;  %v3426_v53 = vld [vmem:[#allocation12 + $0xb58] sm:$0xff] }
 0x5b2   : > { %5417 = vmatprep.subr.bf16.mxu0 %v5416_v7  ;;  %v3406_v7 = vld [vmem:[#allocation12 + $0xab8] sm:$0xff] }
 0x5b3   : > { %v5436_v33 = vpack.c.bf16 %v3406_v7, %v3404_v52  ;;  %v3432_v52 = vld [vmem:[#allocation12 + $0xb88] sm:$0xff]  ;;  %v3434_v7 = vld [vmem:[#allocation12 + $0xb98] sm:$0xff] }
 0x5b4   : > { %3346 = vmatmul.mubr.f32.vlgmr.msra.gmra.mrb[8].mxu0 %v3257_v22  ;;  %v3409_v22 = vld [vmem:[#allocation12 + $0xad0] sm:$0xff]  ;;  %v3446_v5 = vld [vmem:[#allocation12 + $0xbf8] sm:$0xff] }
 0x5b5   : > { %3351 = vmatprep.mubr.f32.mxu0 %v3264_v10  ;;  %5419 = vmatpush1.bf16.msra.mxu0 %v5418_v17  ;;  %v3410_v17 = vld [vmem:[#allocation12 + $0xad8] sm:$0xff]  ;;  %v5442_v10 = vpack.c.bf16 %v3409_v22, %v3407_v2  ;;  %v3437_v2 = vld [vmem:[#allocation12 + $0xbb0] sm:$0xff]  ;;  %v3440_v22 = vld [vmem:[#allocation12 + $0xbc8] sm:$0xff] }
 0x5b6   : > { %5421 = vmatprep.subr.bf16.mxu0 %v5420_v55  ;;  %v5438_v55 = vpack.c.bf16 %v3405_v42, %v3403_v14  ;;  %v5440_v56 = vpack.c.bf16 %v3410_v17, %v3408_v16  ;;  %v3433_v14 = vld [vmem:[#allocation12 + $0xb90] sm:$0xff]  ;;  %v3436_v42 = vld [vmem:[#allocation12 + $0xba8] sm:$0xff]  ;;  %v3438_v16 = vld [vmem:[#allocation12 + $0xbb8] sm:$0xff] }
 0x5b8   : > { %3352 = vmatmul.mubr.f32.gmra.mrb[10].mxu0 %v3262_v9 }
 0x5b9   : > { %3357 = vmatprep.mubr.f32.mxu0 %v6969_v43  ;;  %5423 = vmatpush1.bf16.msra.mxu0 %v5422_v0  ;;  %v5444_v0 = vpack.c.bf16 %v3414_v34, %v3412_v32  ;;  %v3442_v32 = vld [vmem:[#allocation12 + $0xbd8] sm:$0xff] }
 0x5ba   : > { %5425 = vmatprep.subr.bf16.mxu0 %v5424_v40  ;;  %v3413_v40 = vld [vmem:[#allocation12 + $0xaf0] sm:$0xff] }
 0x5bb   : > { %v5446_v9 = vpack.c.bf16 %v3413_v40, %v3411_v39  ;;  %v3441_v39 = vld [vmem:[#allocation12 + $0xbd0] sm:$0xff]  ;;  %v3444_v40 = vld [vmem:[#allocation12 + $0xbe8] sm:$0xff] }
 0x5bc   : > { %3358 = vmatmul.mubr.f32.gmra.mrb[12].mxu0 %v3266_v23  ;;  %v3424_v23 = vld [vmem:[#allocation12 + $0xb48] sm:$0xff] }
 0x5bd   : > { %3363 = vmatprep.mubr.f32.mxu0 %v3272_v57  ;;  %5427 = vmatpush1.bf16.msra.mxu0 %v5426_v11  ;;  %v5450_v11 = vpack.c.bf16 %v3417_v12, %v3415_v30  ;;  %v5456_v35 = vpack.c.bf16 %v3426_v53, %v3424_v23  ;;  %v3425_v57 = vld [vmem:[#allocation12 + $0xb50] sm:$0xff]  ;;  %v3578_v12 = vld [vmem:[#allocation12 + $0xc08] sm:$0xff]  ;;  %v3452_v23 = vrot.slane %v6940_v62, 2 }
 0x5be   : > { %5429 = vmatprep.subr.bf16.mxu0 %v5428_v48  ;;  %v5452_v48 = vpack.c.bf16 %v3422_v41, %v3420_v19  ;;  %v3445_v30 = vld [vmem:[#allocation12 + $0xbf0] sm:$0xff]  ;;  %v3580_v19 = vld [vmem:[#allocation12 + $0xc18] sm:$0xff]  ;;  %v3582_v53 = vld [vmem:[#allocation12 + $0xc28] sm:$0xff] }
 0x5c0   : > { %3364 = vmatmul.mubr.f32.gmra.mrb[14].mxu0 %v3270_v58  ;;  %v3429_v58 = vld [vmem:[#allocation12 + $0xb70] sm:$0xff] }
 0x5c1   : > { %5431 = vmatpush1.bf16.msra.mxu0 %v5430_v59  ;;  %3541 = vmatprep.mubr.f32.mxu0 %v3456_v24  ;;  %v3428_v59 = vld [vmem:[#allocation12 + $0xb68] sm:$0xff]  ;;  %v5462_v24 = vpack.c.bf16 %v3429_v58, %v3427_v6  ;;  %v3588_v58 = vld [vmem:[#allocation12 + $0xc58] sm:$0xff] }
 0x5c2   : > { %5433 = vmatprep.subr.bf16.mxu0 %v5432_v61  ;;  %v5458_v61 = vpack.c.bf16 %v3425_v57, %v3423_v54  ;;  %v5460_v1 = vpack.c.bf16 %v3430_v60, %v3428_v59  ;;  %v5482_v57 = vpack.c.bf16 %v3579_v50, %v3577_v46  ;;  %v3581_v60 = vld [vmem:[#allocation12 + $0xc20] sm:$0xff]  ;;  %v3586_v6 = vld [vmem:[#allocation12 + $0xc48] sm:$0xff] }
 0x5c5   : > { %5435 = vmatpush1.bf16.msra.mxu0 %v5434_v8  ;;  %v5464_v8 = vpack.c.bf16 %v3434_v7, %v3432_v52  ;;  %v6991_v7 = vrot.slane %v6948_v20, 2 }
 0x5c6   : > { %5437 = vmatprep.subr.bf16.mxu0 %v5436_v33  ;;  %v3431_v33 = vld [vmem:[#allocation12 + $0xb80] sm:$0xff] }
 0x5c7   : > { %v5466_v17 = vpack.c.bf16 %v3433_v14, %v3431_v33  ;;  %v5488_v33 = vpack.c.bf16 %v3588_v58, %v3586_v6  ;;  %v3585_v14 = vld [vmem:[#allocation12 + $0xc40] sm:$0xff]  ;;  %v3608_v6 = vld [vmem:[#allocation12 + $0xcf8] sm:$0xff] }
 0x5c9   : > { %5439 = vmatpush1.bf16.msra.mxu0 %v5438_v55  ;;  %v5468_v55 = vpack.c.bf16 %v3438_v16, %v3436_v42  ;;  %v3587_v42 = vld [vmem:[#allocation12 + $0xc50] sm:$0xff]  ;;  %v3458_v16 = vsel %vm1117_vm11, %v3452_v23, %v6890_v25 }
 0x5ca   : > { %5441 = vmatprep.subr.bf16.mxu0 %v5440_v56  ;;  %v3435_v56 = vld [vmem:[#allocation12 + $0xba0] sm:$0xff] }
 0x5cb   : > { %v5470_v34 = vpack.c.bf16 %v3437_v2, %v3435_v56  ;;  %v3592_v56 = vld [vmem:[#allocation12 + $0xc78] sm:$0xff] }
 0x5cd   : > { %5443 = vmatpush1.bf16.msra.mxu0 %v5442_v10  ;;  %v5472_v10 = vpack.c.bf16 %v3442_v32, %v3440_v22  ;;  %v3380_v22 = vld [vmem:[#allocation3 + $0x50] sm:$0x3]  ;;  %v5490_v32 = vpack.c.bf16 %v3587_v42, %v3585_v14 }
 0x5ce   : > { %5445 = vmatprep.subr.bf16.mxu0 %v5444_v0  ;;  %v3439_v0 = vld [vmem:[#allocation12 + $0xbc0] sm:$0xff] }
 0x5cf   : > { %v5474_v49 = vpack.c.bf16 %v3441_v39, %v3439_v0  ;;  %v3591_v0 = vld [vmem:[#allocation12 + $0xc70] sm:$0xff] }
 0x5d1   : > { %5447 = vmatpush1.bf16.msra.mxu0 %v5446_v9  ;;  %v5476_v9 = vpack.c.bf16 %v3446_v5, %v3444_v40  ;;  %v3465_v40 = vrot.slane %v3380_v22, 2  ;;  %v3594_v5 = vld [vmem:[#allocation12 + $0xc88] sm:$0xff] }
 0x5d2   : > { %5449 = vmatprep.subr.bf16.mxu0 %v5448_v45  ;;  %v3443_v45 = vld [vmem:[#allocation12 + $0xbe0] sm:$0xff] }
 0x5d3   : > { %v5478_v41 = vpack.c.bf16 %v3445_v30, %v3443_v45 }
 0x5d5   : > { %5451 = vmatpush1.bf16.msra.mxu0 %v5450_v11  ;;  %v3378_v11 = vld [vmem:[#allocation3 + $0x10] sm:$0xfc] }
 0x5d6   : > { %5453 = vmatprep.subr.bf16.mxu0 %v5452_v48  ;;  %v5480_v48 = vpack.c.bf16 %v3580_v19, %v3578_v12  ;;  %v3451_v54 = vrot.slane %v3378_v11, 2  ;;  %v3593_v12 = vld [vmem:[#allocation12 + $0xc80] sm:$0xff]  ;;  %v3595_v19 = vld [vmem:[#allocation12 + $0xc90] sm:$0xff]  ;;  %v3598_v11 = vld [vmem:[#allocation12 + $0xca8] sm:$0xff] }
 0x5d7   : > { %v5498_v46 = vpack.c.bf16 %v3595_v19, %v3593_v12  ;;  %v3621_v19 = vld [vmem:[#allocation12 + $0xd60] sm:$0xff] }
 0x5d9   : > { %5455 = vmatpush1.bf16.msra.mxu0 %v5454_v51  ;;  %v3584_v51 = vld [vmem:[#allocation12 + $0xc38] sm:$0xff] }
 0x5da   : > { %5457 = vmatprep.subr.bf16.mxu0 %v5456_v35  ;;  %v6983_v35 = vrot.slane %v6942_v63, 2  ;;  %v5484_v59 = vpack.c.bf16 %v3584_v51, %v3582_v53  ;;  %v3599_v53 = vld [vmem:[#allocation12 + $0xcb0] sm:$0xff]  ;;  %v3602_v51 = vld [vmem:[#allocation12 + $0xcc8] sm:$0xff] }
 0x5dc   : > { %v3460_v52 = vsel %vm1117_vm11, %v3455_v4, %v6983_v35  ;;  %v6999_v4 = vsel %vm1117_vm11, %v6983_v35, %v6991_v7 }
 0x5dd   : > { %5459 = vmatpush1.bf16.msra.mxu0 %v5458_v61  ;;  %v3583_v61 = vld [vmem:[#allocation12 + $0xc30] sm:$0xff] }
 0x5de   : > { %5461 = vmatprep.subr.bf16.mxu0 %v5460_v1  ;;  %v3453_v1 = vsel %vm1117_vm11, %v3451_v54, %v3452_v23  ;;  %v3597_v23 = vld [vmem:[#allocation12 + $0xca0] sm:$0xff]  ;;  %v3604_v54 = vld [vmem:[#allocation12 + $0xcd8] sm:$0xff] }
 0x5e1   : > { %5463 = vmatpush1.bf16.msra.mxu0 %v5462_v24  ;;  %v5486_v24 = vpack.c.bf16 %v3583_v61, %v3581_v60  ;;  %v3601_v60 = vld [vmem:[#allocation12 + $0xcc0] sm:$0xff]  ;;  %v3603_v61 = vld [vmem:[#allocation12 + $0xcd0] sm:$0xff] }
 0x5e2   : > { %5465 = vmatprep.subr.bf16.mxu0 %v5464_v8  ;;  %v3381_v8 = vld [vmem:[#allocation3 + $0x58] sm:$0x3]  ;;  %v5506_v58 = vpack.c.bf16 %v3603_v61, %v3601_v60  ;;  %v3631_v61 = vld [vmem:[#allocation12 + $0xdb0] sm:$0xff] }
 0x5e3   : > { %v3467_v2 = vrot.slane %v3381_v8, 2  ;;  %v3610_v8 = vld [vmem:[#allocation12 + $0xd08] sm:$0xff]  ;;  %v3629_v60 = vld [vmem:[#allocation12 + $0xda0] sm:$0xff] }
 0x5e5   : > { %5467 = vmatpush1.bf16.msra.mxu0 %v5466_v17  ;;  %v3461_v17 = vrot.slane %v6934_v3, 2 }
 0x5e6   : > { %5469 = vmatprep.subr.bf16.mxu0 %v5468_v55  ;;  %v3590_v55 = vld [vmem:[#allocation12 + $0xc68] sm:$0xff] }
 0x5e7   : > { %v3462_v39 = vsel %vm1117_vm11, %v6890_v25, %v3461_v17 }
 0x5e9   : > { %5471 = vmatpush1.bf16.msra.mxu0 %v5470_v34  ;;  %v5492_v34 = vpack.c.bf16 %v3592_v56, %v3590_v55  ;;  %v3614_v55 = vld [vmem:[#allocation12 + $0xd28] sm:$0xff]  ;;  %v3616_v56 = vld [vmem:[#allocation12 + $0xd38] sm:$0xff] }
 0x5ea   : > { %5473 = vmatprep.subr.bf16.mxu0 %v5472_v10  ;;  %v3589_v10 = vld [vmem:[#allocation12 + $0xc60] sm:$0xff]  ;;  %v5516_v22 = vpack.c.bf16 %v3616_v56, %v3614_v55  ;;  %v3750_v55 = vld [vmem:[#allocation12 + $0xe08] sm:$0xff]  ;;  %v3752_v56 = vld [vmem:[#allocation12 + $0xe18] sm:$0xff] }
 0x5eb   : > { %v5494_v45 = vpack.c.bf16 %v3591_v0, %v3589_v10  ;;  %v3618_v10 = vld [vmem:[#allocation12 + $0xd48] sm:$0xff]  ;;  %v3620_v0 = vld [vmem:[#allocation12 + $0xd58] sm:$0xff] }
 0x5ed   : > { %5475 = vmatpush1.bf16.msra.mxu0 %v5474_v49  ;;  %v3596_v49 = vld [vmem:[#allocation12 + $0xc98] sm:$0xff] }
 0x5ee   : > { %5477 = vmatprep.subr.bf16.mxu0 %v5476_v9  ;;  %v3468_v9 = vsel %vm1117_vm11, %v6991_v7, %v3467_v2  ;;  %v5496_v30 = vpack.c.bf16 %v3596_v49, %v3594_v5  ;;  %v3617_v5 = vld [vmem:[#allocation12 + $0xd40] sm:$0xff]  ;;  %v3619_v49 = vld [vmem:[#allocation12 + $0xd50] sm:$0xff] }
 0x5f1   : > { %5479 = vmatpush1.bf16.msra.mxu0 %v5478_v41  ;;  %v3466_v41 = vsel %vm1117_vm11, %v3461_v17, %v3465_v40  ;;  %v3611_v17 = vld [vmem:[#allocation12 + $0xd10] sm:$0xff]  ;;  %v5520_v40 = vpack.c.bf16 %v3620_v0, %v3618_v10  ;;  %v3754_v10 = vld [vmem:[#allocation12 + $0xe28] sm:$0xff]  ;;  %v3756_v0 = vld [vmem:[#allocation12 + $0xe38] sm:$0xff] }
 0x5f2   : > { %5481 = vmatprep.subr.bf16.mxu0 %v5480_v48  ;;  %v3600_v48 = vld [vmem:[#allocation12 + $0xcb8] sm:$0xff] }
 0x5f3   : > { %v5500_v50 = vpack.c.bf16 %v3600_v48, %v3598_v11  ;;  %v3626_v11 = vld [vmem:[#allocation12 + $0xd88] sm:$0xff]  ;;  %v3628_v48 = vld [vmem:[#allocation12 + $0xd98] sm:$0xff] }
 0x5f4   : > { %3542 = vmatmul.mubr.f32.vlgmr.msra.gmra.mrb[8].mxu0 %v3453_v1  ;;  %v3606_v1 = vld [vmem:[#allocation12 + $0xce8] sm:$0xff] }
 0x5f5   : > { %3547 = vmatprep.mubr.f32.mxu0 %v3460_v52  ;;  %5483 = vmatpush1.bf16.msra.mxu0 %v5482_v57  ;;  %v5502_v57 = vpack.c.bf16 %v3599_v53, %v3597_v23  ;;  %v5508_v52 = vpack.c.bf16 %v3608_v6, %v3606_v1  ;;  %v3625_v23 = vld [vmem:[#allocation12 + $0xd80] sm:$0xff]  ;;  %v3627_v53 = vld [vmem:[#allocation12 + $0xd90] sm:$0xff]  ;;  %v3634_v1 = vld [vmem:[#allocation12 + $0xdc8] sm:$0xff] }
 0x5f6   : > { %5485 = vmatprep.subr.bf16.mxu0 %v5484_v59  ;;  %v5504_v59 = vpack.c.bf16 %v3604_v54, %v3602_v51  ;;  %v3630_v51 = vld [vmem:[#allocation12 + $0xda8] sm:$0xff]  ;;  %v3632_v54 = vld [vmem:[#allocation12 + $0xdb8] sm:$0xff] }
 0x5f7   : > { %v3636_v6 = vld [vmem:[#allocation12 + $0xdd8] sm:$0xff] }
 0x5f8   : > { %3548 = vmatmul.mubr.f32.gmra.mrb[10].mxu0 %v3458_v16  ;;  %v3609_v16 = vld [vmem:[#allocation12 + $0xd00] sm:$0xff] }
 0x5f9   : > { %3553 = vmatprep.mubr.f32.mxu0 %v6999_v4  ;;  %5487 = vmatpush1.bf16.msra.mxu0 %v5486_v24  ;;  %v3607_v24 = vld [vmem:[#allocation12 + $0xcf0] sm:$0xff]  ;;  %v5514_v2 = vpack.c.bf16 %v3611_v17, %v3609_v16  ;;  %v3637_v16 = vld [vmem:[#allocation12 + $0xde0] sm:$0xff] }
 0x5fa   : > { %5489 = vmatprep.subr.bf16.mxu0 %v5488_v33  ;;  %v3612_v33 = vld [vmem:[#allocation12 + $0xd18] sm:$0xff]  ;;  %v3639_v17 = vld [vmem:[#allocation12 + $0xdf0] sm:$0xff] }
 0x5fb   : > { %v5512_v42 = vpack.c.bf16 %v3612_v33, %v3610_v8  ;;  %v3638_v8 = vld [vmem:[#allocation12 + $0xde8] sm:$0xff]  ;;  %v3640_v33 = vld [vmem:[#allocation12 + $0xdf8] sm:$0xff] }
 0x5fc   : > { %3554 = vmatmul.mubr.f32.gmra.mrb[12].mxu0 %v3462_v39 }
 0x5fd   : > { %3559 = vmatprep.mubr.f32.mxu0 %v3468_v9  ;;  %5491 = vmatpush1.bf16.msra.mxu0 %v5490_v32  ;;  %v3613_v32 = vld [vmem:[#allocation12 + $0xd20] sm:$0xff]  ;;  %v3622_v9 = vld [vmem:[#allocation12 + $0xd68] sm:$0xff] }
 0x5fe   : > { %5493 = vmatprep.subr.bf16.mxu0 %v5492_v34  ;;  %v3615_v34 = vld [vmem:[#allocation12 + $0xd30] sm:$0xff] }
 0x5ff   : > { %v5518_v39 = vpack.c.bf16 %v3615_v34, %v3613_v32  ;;  %v3749_v32 = vld [vmem:[#allocation12 + $0xe00] sm:$0xff]  ;;  %v3751_v34 = vld [vmem:[#allocation12 + $0xe10] sm:$0xff] }
 0x600   : > { %3560 = vmatmul.mubr.f32.gmra.mrb[14].mxu0 %v3466_v41  ;;  %v3623_v41 = vld [vmem:[#allocation12 + $0xd70] sm:$0xff] }
 0x601   : > { %5495 = vmatpush1.bf16.msra.mxu0 %v5494_v45  ;;  %3705 = vmatprep.mubr.f32.mxu0 %v6929_v36  ;;  %v3605_v36 = vld [vmem:[#allocation12 + $0xce0] sm:$0xff]  ;;  %v3624_v45 = vld [vmem:[#allocation12 + $0xd78] sm:$0xff] }
 0x602   : > { %5497 = vmatprep.subr.bf16.mxu0 %v5496_v30  ;;  %v5510_v14 = vpack.c.bf16 %v3607_v24, %v3605_v36  ;;  %v5522_v30 = vpack.c.bf16 %v3619_v49, %v3617_v5  ;;  %v5524_v12 = vpack.c.bf16 %v3624_v45, %v3622_v9  ;;  %v3633_v36 = vld [vmem:[#allocation12 + $0xdc0] sm:$0xff]  ;;  %v3635_v24 = vld [vmem:[#allocation12 + $0xdd0] sm:$0xff]  ;;  %v3758_v9 = vld [vmem:[#allocation12 + $0xe48] sm:$0xff] }
 0x603   : > { %v3753_v5 = vld [vmem:[#allocation12 + $0xe20] sm:$0xff]  ;;  %v3755_v49 = vld [vmem:[#allocation12 + $0xe30] sm:$0xff]  ;;  %v3760_v45 = vld [vmem:[#allocation12 + $0xe58] sm:$0xff] }
 0x605   : > { %5499 = vmatpush1.bf16.msra.mxu0 %v5498_v46  ;;  %v5526_v46 = vpack.c.bf16 %v3623_v41, %v3621_v19  ;;  %v3757_v19 = vld [vmem:[#allocation12 + $0xe40] sm:$0xff]  ;;  %v3759_v41 = vld [vmem:[#allocation12 + $0xe50] sm:$0xff] }
 0x606   : > { %5501 = vmatprep.subr.bf16.mxu0 %v5500_v50  ;;  %v5528_v50 = vpack.c.bf16 %v3628_v48, %v3626_v11  ;;  %v3762_v11 = vld [vmem:[#allocation12 + $0xe68] sm:$0xff]  ;;  %v3764_v48 = vld [vmem:[#allocation12 + $0xe78] sm:$0xff] }
 0x609   : > { %5503 = vmatpush1.bf16.msra.mxu0 %v5502_v57  ;;  %v5530_v57 = vpack.c.bf16 %v3627_v53, %v3625_v23  ;;  %v3761_v23 = vld [vmem:[#allocation12 + $0xe60] sm:$0xff]  ;;  %v3739_v53 = vld [vmem:[#allocation3 + $0x28] sm:$0xfe] }
 0x60a   : > { %5505 = vmatprep.subr.bf16.mxu0 %v5504_v59  ;;  %v5532_v59 = vpack.c.bf16 %v3632_v54, %v3630_v51  ;;  %v3768_v51 = vld [vmem:[#allocation12 + $0xe98] sm:$0xff]  ;;  %v7013_v54 = vld [vmem:[#allocation3 + $0x58] sm:$0xff] }
 0x60d   : > { %5507 = vmatpush1.bf16.msra.mxu0 %v5506_v58  ;;  %v5534_v58 = vpack.c.bf16 %v3631_v61, %v3629_v60  ;;  %v3767_v60 = vld [vmem:[#allocation12 + $0xe90] sm:$0xff]  ;;  %v7016_v61 = vld [vmem:[#allocation3 + $0x50] sm:$0xff] }
 0x60e   : > { %5509 = vmatprep.subr.bf16.mxu0 %v5508_v52  ;;  %v5536_v52 = vpack.c.bf16 %v3636_v6, %v3634_v1  ;;  %v3770_v1 = vld [vmem:[#allocation12 + $0xea8] sm:$0xff]  ;;  %v3772_v6 = vld [vmem:[#allocation12 + $0xeb8] sm:$0xff] }
 0x611   : > { %5511 = vmatpush1.bf16.msra.mxu0 %v5510_v14  ;;  %v5538_v14 = vpack.c.bf16 %v3635_v24, %v3633_v36  ;;  %v3769_v36 = vld [vmem:[#allocation12 + $0xea0] sm:$0xff]  ;;  %v3771_v24 = vld [vmem:[#allocation12 + $0xeb0] sm:$0xff] }
 0x612   : > { %5513 = vmatprep.subr.bf16.mxu0 %v5512_v42  ;;  %v5540_v42 = vpack.c.bf16 %v3640_v33, %v3638_v8  ;;  %v3774_v8 = vld [vmem:[#allocation12 + $0xec8] sm:$0xff]  ;;  %v3776_v33 = vld [vmem:[#allocation12 + $0xed8] sm:$0xff] }
 0x615   : > { %5515 = vmatpush1.bf16.msra.mxu0 %v5514_v2  ;;  %v5542_v2 = vpack.c.bf16 %v3639_v17, %v3637_v16  ;;  %v3773_v16 = vld [vmem:[#allocation12 + $0xec0] sm:$0xff]  ;;  %v3775_v17 = vld [vmem:[#allocation12 + $0xed0] sm:$0xff] }
 0x616   : > { %5517 = vmatprep.subr.bf16.mxu0 %v5516_v22  ;;  %v5544_v22 = vpack.c.bf16 %v3752_v56, %v3750_v55  ;;  %v3778_v55 = vld [vmem:[#allocation12 + $0xee8] sm:$0xff]  ;;  %v3780_v56 = vld [vmem:[#allocation12 + $0xef8] sm:$0xff] }
 0x619   : > { %5519 = vmatpush1.bf16.msra.mxu0 %v5518_v39  ;;  %v5546_v39 = vpack.c.bf16 %v3751_v34, %v3749_v32  ;;  %v3779_v32 = vld [vmem:[#allocation12 + $0xef0] sm:$0xff]  ;;  %v3782_v34 = vld [vmem:[#allocation12 + $0xf08] sm:$0xff] }
 0x61a   : > { %5521 = vmatprep.subr.bf16.mxu0 %v5520_v40  ;;  %v5548_v40 = vpack.c.bf16 %v3756_v0, %v3754_v10  ;;  %v3784_v10 = vld [vmem:[#allocation12 + $0xf18] sm:$0xff] }
 0x61d   : > { %5523 = vmatpush1.bf16.msra.mxu0 %v5522_v30  ;;  %v5550_v30 = vpack.c.bf16 %v3755_v49, %v3753_v5  ;;  %v3783_v5 = vld [vmem:[#allocation12 + $0xf10] sm:$0xff]  ;;  %v3786_v49 = vld [vmem:[#allocation12 + $0xf28] sm:$0xff] }
 0x61e   : > { %5525 = vmatprep.subr.bf16.mxu0 %v5524_v12  ;;  %v5552_v12 = vpack.c.bf16 %v3760_v45, %v3758_v9  ;;  %v3788_v9 = vld [vmem:[#allocation12 + $0xf38] sm:$0xff] }
 0x621   : > { %5527 = vmatpush1.bf16.msra.mxu0 %v5526_v46  ;;  %v5554_v46 = vpack.c.bf16 %v3759_v41, %v3757_v19  ;;  %v3787_v19 = vld [vmem:[#allocation12 + $0xf30] sm:$0xff]  ;;  %v3790_v41 = vld [vmem:[#allocation12 + $0xf48] sm:$0xff] }
 0x622   : > { %5529 = vmatprep.subr.bf16.mxu0 %v5528_v50  ;;  %v5556_v50 = vpack.c.bf16 %v3764_v48, %v3762_v11  ;;  %v3792_v11 = vld [vmem:[#allocation12 + $0xf58] sm:$0xff] }
 0x625   : > { %5531 = vmatpush1.bf16.msra.mxu0 %v5530_v57 }
 0x626   : > { %5533 = vmatprep.subr.bf16.mxu0 %v5532_v59  ;;  %v3765_v59 = vld [vmem:[#allocation12 + $0xe80] sm:$0xff] }
 0x629   : > { %5535 = vmatpush1.bf16.msra.mxu0 %v5534_v58  ;;  %v5562_v58 = vpack.c.bf16 %v3767_v60, %v3765_v59  ;;  %v3800_v59 = vld [vmem:[#allocation12 + $0xf98] sm:$0xff] }
 0x62a   : > { %5537 = vmatprep.subr.bf16.mxu0 %v5536_v52  ;;  %v5564_v52 = vpack.c.bf16 %v3772_v6, %v3770_v1  ;;  %v3797_v6 = vld [vmem:[#allocation12 + $0xf80] sm:$0xff] }
 0x62d   : > { %5539 = vmatpush1.bf16.msra.mxu0 %v5538_v14  ;;  %v5566_v14 = vpack.c.bf16 %v3771_v24, %v3769_v36 }
 0x62e   : > { %5541 = vmatprep.subr.bf16.mxu0 %v5540_v42  ;;  %v5568_v42 = vpack.c.bf16 %v3776_v33, %v3774_v8  ;;  %v3801_v8 = vld [vmem:[#allocation12 + $0xfa0] sm:$0xff]  ;;  %v3803_v33 = vld [vmem:[#allocation12 + $0xfb0] sm:$0xff] }
 0x631   : > { %5543 = vmatpush1.bf16.msra.mxu0 %v5542_v2  ;;  %v5570_v2 = vpack.c.bf16 %v3775_v17, %v3773_v16  ;;  %v5598_v16 = vpack.c.bf16 %v3803_v33, %v3801_v8  ;;  %v3963_v33 = vld [vmem:[#allocation12 + $0x1060] sm:$0xff] }
 0x632   : > { %5545 = vmatprep.subr.bf16.mxu0 %v5544_v22  ;;  %v3777_v22 = vld [vmem:[#allocation12 + $0xee0] sm:$0xff] }
 0x633   : > { %v5574_v0 = vpack.c.bf16 %v3779_v32, %v3777_v22 }
 0x634   : > { %3706 = vmatmul.mubr.f32.vlgmr.msra.gmra.mrb[8].mxu0 %v6940_v62  ;;  %v3763_v62 = vld [vmem:[#allocation12 + $0xe70] sm:$0xff] }
 0x635   : > { %3711 = vmatprep.mubr.f32.mxu0 %v6942_v63  ;;  %5547 = vmatpush1.bf16.msra.mxu0 %v5546_v39  ;;  %v3766_v63 = vld [vmem:[#allocation12 + $0xe88] sm:$0xff]  ;;  %v5558_v57 = vpack.c.bf16 %v3763_v62, %v3761_v23  ;;  %v5576_v39 = vpack.c.bf16 %v3784_v10, %v3782_v34  ;;  %v3791_v23 = vld [vmem:[#allocation12 + $0xf50] sm:$0xff]  ;;  %v3809_v34 = vld [vmem:[#allocation12 + $0xfe0] sm:$0xff] }
 0x636   : > { %5549 = vmatprep.subr.bf16.mxu0 %v5548_v40  ;;  %v3781_v40 = vld [vmem:[#allocation12 + $0xf00] sm:$0xff]  ;;  %v3794_v62 = vld [vmem:[#allocation12 + $0xf68] sm:$0xff]  ;;  %v3811_v10 = vld [vmem:[#allocation12 + $0xff0] sm:$0xff] }
 0x637   : > { %v5578_v45 = vpack.c.bf16 %v3783_v5, %v3781_v40  ;;  %v5606_v40 = vpack.c.bf16 %v3811_v10, %v3809_v34  ;;  %v3738_v5 = vld [vmem:[#allocation3 + $0x20] sm:$0xfe] }
 0x638   : > { %3712 = vmatmul.mubr.f32.gmra.mrb[10].mxu0 %v6951_v28  ;;  %v3826_v28 = vrot.slane %v3739_v53, 1  ;;  %v3796_v53 = vld [vmem:[#allocation12 + $0xf78] sm:$0xff]  ;;  %v3972_v10 = vld [vmem:[#allocation12 + $0x10a8] sm:$0xff] }
 0x639   : > { %3717 = vmatprep.mubr.f32.mxu0 %v6948_v20  ;;  %5551 = vmatpush1.bf16.msra.mxu0 %v5550_v30  ;;  %v5560_v20 = vpack.c.bf16 %v3768_v51, %v3766_v63  ;;  %v5580_v30 = vpack.c.bf16 %v3788_v9, %v3786_v49  ;;  %v5588_v51 = vpack.c.bf16 %v3796_v53, %v3794_v62  ;;  %v3951_v9 = vld [vmem:[#allocation12 + $0x1000] sm:$0xff]  ;;  %v3960_v53 = vld [vmem:[#allocation12 + $0x1048] sm:$0xff] }
 0x63a   : > { %5553 = vmatprep.subr.bf16.mxu0 %v5552_v12  ;;  %v3785_v12 = vld [vmem:[#allocation12 + $0xf20] sm:$0xff] }
 0x63b   : > { %v5582_v48 = vpack.c.bf16 %v3787_v19, %v3785_v12  ;;  %v3958_v12 = vld [vmem:[#allocation12 + $0x1038] sm:$0xff]  ;;  %v3823_v19 = vrot.slane %v3738_v5, 1 }
 0x63c   : > { %3718 = vmatmul.mubr.f32.gmra.mrb[12].mxu0 %v6934_v3  ;;  %v3828_v3 = vsel %vm839_vm10, %v3826_v28, %v6946_v44  ;;  %v5572_v44 = vpack.c.bf16 %v3780_v56, %v3778_v55  ;;  %v3795_v28 = vld [vmem:[#allocation12 + $0xf70] sm:$0xff]  ;;  %v3805_v55 = vld [vmem:[#allocation12 + $0xfc0] sm:$0xff] }
 0x63d   : > { %3723 = vmatprep.mubr.f32.mxu0 %v7013_v54  ;;  %5555 = vmatpush1.bf16.msra.mxu0 %v5554_v46  ;;  %v5584_v46 = vpack.c.bf16 %v3792_v11, %v3790_v41  ;;  %v3807_v56 = vld [vmem:[#allocation12 + $0xfd0] sm:$0xff] }
 0x63e   : > { %5557 = vmatprep.subr.bf16.mxu0 %v5556_v50  ;;  %v3789_v50 = vld [vmem:[#allocation12 + $0xf40] sm:$0xff]  ;;  %v5602_v22 = vpack.c.bf16 %v3807_v56, %v3805_v55  ;;  %v3970_v55 = vld [vmem:[#allocation12 + $0x1098] sm:$0xff] }
 0x63f   : > { %v5586_v63 = vpack.c.bf16 %v3791_v23, %v3789_v50  ;;  %v3825_v50 = vsel %vm839_vm10, %v3823_v19, %v6954_v31  ;;  %v5950_v23 = vld [vmem:[#allocation3 + $0x40] sm:$0xff] }
 0x640   : > { %3724 = vmatmul.mubr.f32.gmra.mrb[14].mxu0 %v7016_v61  ;;  %v3829_v62 = vrot.slane %v5950_v23, 1  ;;  %v3979_v23 = vld [vmem:[#allocation12 + $0x10e0] sm:$0xff] }
 0x641   : > { %5559 = vmatpush1.bf16.msra.mxu0 %v5558_v57  ;;  %3913 = vmatprep.mubr.f32.mxu0 %v3828_v3  ;;  %v3793_v57 = vld [vmem:[#allocation12 + $0xf60] sm:$0xff]  ;;  %v3799_v3 = vld [vmem:[#allocation12 + $0xf90] sm:$0xff] }
 0x642   : > { %5561 = vmatprep.subr.bf16.mxu0 %v5560_v20  ;;  %v3798_v20 = vld [vmem:[#allocation12 + $0xf88] sm:$0xff]  ;;  %v5590_v60 = vpack.c.bf16 %v3795_v28, %v3793_v57  ;;  %v5594_v36 = vpack.c.bf16 %v3799_v3, %v3797_v6  ;;  %v3747_v28 = vld [vmem:[#allocation3 + $0x68] sm:$0x1]  ;;  %v3833_v6 = vrot.slane %v7016_v61, 1 }
 0x643   : > { %v5592_v1 = vpack.c.bf16 %v3800_v59, %v3798_v20  ;;  %v3959_v59 = vld [vmem:[#allocation12 + $0x1040] sm:$0xff]  ;;  %v3964_v3 = vld [vmem:[#allocation12 + $0x1068] sm:$0xff] }
 0x645   : > { %5563 = vmatpush1.bf16.msra.mxu0 %v5562_v58  ;;  %v3802_v58 = vld [vmem:[#allocation12 + $0xfa8] sm:$0xff] }
 0x646   : > { %5565 = vmatprep.subr.bf16.mxu0 %v5564_v52  ;;  %v3804_v52 = vld [vmem:[#allocation12 + $0xfb8] sm:$0xff] }
 0x647   : > { %v5596_v24 = vpack.c.bf16 %v3804_v52, %v3802_v58  ;;  %v3966_v58 = vld [vmem:[#allocation12 + $0x1078] sm:$0xff] }
 0x648   : > { %v5620_v8 = vpack.c.bf16 %v3966_v58, %v3964_v3  ;;  %v3987_v3 = vld [vmem:[#allocation12 + $0x1120] sm:$0xff]  ;;  %v3989_v58 = vld [vmem:[#allocation12 + $0x1130] sm:$0xff] }
 0x649   : > { %5567 = vmatpush1.bf16.msra.mxu0 %v5566_v14  ;;  %v3806_v14 = vld [vmem:[#allocation12 + $0xfc8] sm:$0xff] }
 0x64a   : > { %5569 = vmatprep.subr.bf16.mxu0 %v5568_v42  ;;  %v3808_v42 = vld [vmem:[#allocation12 + $0xfd8] sm:$0xff] }
 0x64b   : > { %v5600_v17 = vpack.c.bf16 %v3808_v42, %v3806_v14  ;;  %v3965_v14 = vld [vmem:[#allocation12 + $0x1070] sm:$0xff]  ;;  %v3834_v42 = vsel %vm839_vm10, %v3829_v62, %v3833_v6 }
 0x64d   : > { %5571 = vmatpush1.bf16.msra.mxu0 %v5570_v2  ;;  %v3810_v2 = vld [vmem:[#allocation12 + $0xfe8] sm:$0xff] }
 0x64e   : > { %5573 = vmatprep.subr.bf16.mxu0 %v5572_v44  ;;  %v3812_v44 = vld [vmem:[#allocation12 + $0xff8] sm:$0xff] }
 0x64f   : > { %v5604_v32 = vpack.c.bf16 %v3812_v44, %v3810_v2 }
 0x651   : > { %5575 = vmatpush1.bf16.msra.mxu0 %v5574_v0  ;;  %v3952_v0 = vld [vmem:[#allocation12 + $0x1008] sm:$0xff] }
 0x652   : > { %5577 = vmatprep.subr.bf16.mxu0 %v5576_v39  ;;  %v3954_v39 = vld [vmem:[#allocation12 + $0x1018] sm:$0xff] }
 0x653   : > { %v5608_v49 = vpack.c.bf16 %v3954_v39, %v3952_v0  ;;  %v3974_v0 = vld [vmem:[#allocation12 + $0x10b8] sm:$0xff] }
 0x654   : > { %v5628_v5 = vpack.c.bf16 %v3974_v0, %v3972_v10  ;;  %v4006_v10 = vld [vmem:[#allocation12 + $0x11b8] sm:$0xff] }
 0x655   : > { %5579 = vmatpush1.bf16.msra.mxu0 %v5578_v45  ;;  %v3953_v45 = vld [vmem:[#allocation12 + $0x1010] sm:$0xff] }
 0x656   : > { %5581 = vmatprep.subr.bf16.mxu0 %v5580_v30  ;;  %v3956_v30 = vld [vmem:[#allocation12 + $0x1028] sm:$0xff]  ;;  %v5610_v41 = vpack.c.bf16 %v3953_v45, %v3951_v9  ;;  %v3973_v9 = vld [vmem:[#allocation12 + $0x10b0] sm:$0xff] }
 0x657   : > { %v5612_v11 = vpack.c.bf16 %v3958_v12, %v3956_v30  ;;  %v3976_v45 = vld [vmem:[#allocation12 + $0x10c8] sm:$0xff]  ;;  %v3978_v30 = vld [vmem:[#allocation12 + $0x10d8] sm:$0xff] }
 0x658   : > { %v5632_v19 = vpack.c.bf16 %v3978_v30, %v3976_v45 }
 0x659   : > { %5583 = vmatpush1.bf16.msra.mxu0 %v5582_v48  ;;  %v3955_v48 = vld [vmem:[#allocation12 + $0x1020] sm:$0xff] }
 0x65a   : > { %5585 = vmatprep.subr.bf16.mxu0 %v5584_v46  ;;  %v3957_v46 = vld [vmem:[#allocation12 + $0x1030] sm:$0xff] }
 0x65b   : > { %v5614_v57 = vpack.c.bf16 %v3957_v46, %v3955_v48  ;;  %v3980_v48 = vld [vmem:[#allocation12 + $0x10e8] sm:$0xff]  ;;  %v3982_v46 = vld [vmem:[#allocation12 + $0x10f8] sm:$0xff] }
 0x65d   : > { %5587 = vmatpush1.bf16.msra.mxu0 %v5586_v63  ;;  %v3962_v63 = vld [vmem:[#allocation12 + $0x1058] sm:$0xff] }
 0x65e   : > { %5589 = vmatprep.subr.bf16.mxu0 %v5588_v51  ;;  %v3835_v51 = vrot.slane %v7013_v54, 1  ;;  %v5616_v20 = vpack.c.bf16 %v3962_v63, %v3960_v53  ;;  %v3984_v53 = vld [vmem:[#allocation12 + $0x1108] sm:$0xff]  ;;  %v3986_v63 = vld [vmem:[#allocation12 + $0x1118] sm:$0xff] }
 0x660   : > { %v3836_v52 = vsel %vm839_vm10, %v6961_v38, %v3835_v51  ;;  %v5622_v38 = vpack.c.bf16 %v3965_v14, %v3963_v33  ;;  %v3993_v33 = vld [vmem:[#allocation12 + $0x1150] sm:$0xff]  ;;  %v3996_v14 = vld [vmem:[#allocation12 + $0x1168] sm:$0xff] }
 0x661   : > { %5591 = vmatpush1.bf16.msra.mxu0 %v5590_v60  ;;  %v3961_v60 = vld [vmem:[#allocation12 + $0x1050] sm:$0xff] }
 0x662   : > { %5593 = vmatprep.subr.bf16.mxu0 %v5592_v1  ;;  %v3830_v1 = vsel %vm839_vm10, %v6954_v31, %v3829_v62  ;;  %v3981_v62 = vld [vmem:[#allocation12 + $0x10f0] sm:$0xff] }
 0x665   : > { %5595 = vmatpush1.bf16.msra.mxu0 %v5594_v36  ;;  %v3839_v36 = vrot.slane %v3747_v28, 1  ;;  %v3983_v28 = vld [vmem:[#allocation12 + $0x1100] sm:$0xff] }
 0x666   : > { %5597 = vmatprep.subr.bf16.mxu0 %v5596_v24  ;;  %v5618_v24 = vpack.c.bf16 %v3961_v60, %v3959_v59  ;;  %v3988_v59 = vld [vmem:[#allocation12 + $0x1128] sm:$0xff]  ;;  %v3990_v60 = vld [vmem:[#allocation12 + $0x1138] sm:$0xff] }
 0x667   : > { %v3840_v56 = vsel %vm839_vm10, %v3835_v51, %v3839_v36  ;;  %v5638_v51 = vpack.c.bf16 %v3981_v62, %v3979_v23  ;;  %v3994_v36 = vld [vmem:[#allocation12 + $0x1158] sm:$0xff]  ;;  %v3946_v62 = vld [vmem:[#allocation3 + $0x20] sm:$0xfc] }
 0x669   : > { %5599 = vmatpush1.bf16.msra.mxu0 %v5598_v16  ;;  %v3947_v16 = vld [vmem:[#allocation3 + $0x28] sm:$0xfc] }
 0x66a   : > { %5601 = vmatprep.subr.bf16.mxu0 %v5600_v17  ;;  %v3968_v17 = vld [vmem:[#allocation12 + $0x1088] sm:$0xff]  ;;  %v4022_v2 = vrot.slane %v3947_v16, 2 }
 0x66b   : > { %v5624_v44 = vpack.c.bf16 %v3970_v55, %v3968_v17  ;;  %v3995_v17 = vld [vmem:[#allocation12 + $0x1160] sm:$0xff]  ;;  %v3997_v55 = vld [vmem:[#allocation12 + $0x1170] sm:$0xff] }
 0x66c   : > { %v4024_v39 = vsel %vm1117_vm11, %v4022_v2, %v6983_v35  ;;  %v5636_v35 = vpack.c.bf16 %v3982_v46, %v3980_v48  ;;  %v5654_v2 = vpack.c.bf16 %v3997_v55, %v3995_v17  ;;  %v4220_v17 = vld [vmem:[%s7217_s8 + $0xb0] sm:$0xff]  ;;  %v4221_v55 = vld [vmem:[%s7217_s8 + $0xb8] sm:$0xff] }
 0x66d   : > { %5603 = vmatpush1.bf16.msra.mxu0 %v5602_v22  ;;  %v3967_v22 = vld [vmem:[#allocation12 + $0x1080] sm:$0xff] }
 0x66e   : > { %5605 = vmatprep.subr.bf16.mxu0 %v5604_v32  ;;  %v3969_v32 = vld [vmem:[#allocation12 + $0x1090] sm:$0xff] }
 0x671   : > { %5607 = vmatpush1.bf16.msra.mxu0 %v5606_v40  ;;  %v5626_v40 = vpack.c.bf16 %v3969_v32, %v3967_v22  ;;  %v3999_v22 = vld [vmem:[#allocation12 + $0x1180] sm:$0xff]  ;;  %v4001_v32 = vld [vmem:[#allocation12 + $0x1190] sm:$0xff] }
 0x672   : > { %5609 = vmatprep.subr.bf16.mxu0 %v5608_v49  ;;  %v3971_v49 = vld [vmem:[#allocation12 + $0x10a0] sm:$0xff]  ;;  %v5658_v0 = vpack.c.bf16 %v4001_v32, %v3999_v22 }
 0x673   : > { %v5630_v12 = vpack.c.bf16 %v3973_v9, %v3971_v49  ;;  %v4008_v49 = vld [vmem:[#allocation12 + $0x11c8] sm:$0xff]  ;;  %v4010_v9 = vld [vmem:[#allocation12 + $0x11d8] sm:$0xff] }
 0x674   : > { %3914 = vmatmul.mubr.f32.vlgmr.msra.gmra.mrb[8].mxu0 %v3825_v50  ;;  %v5664_v30 = vpack.c.bf16 %v4010_v9, %v4008_v49  ;;  %v4223_v22 = vld [vmem:[%s7217_s8 + $0xc8] sm:$0xff]  ;;  %v4208_v9 = vld [vmem:[%s7217_s8 + $0x50] sm:$0xff] }
 0x675   : > { %3919 = vmatprep.mubr.f32.mxu0 %v6969_v43  ;;  %5611 = vmatpush1.bf16.msra.mxu0 %v5610_v41  ;;  %v3746_v43 = vld [vmem:[#allocation3 + $0x60] sm:$0x1]  ;;  %v3975_v41 = vld [vmem:[#allocation12 + $0x10c0] sm:$0xff] }
 0x676   : > { %5613 = vmatprep.subr.bf16.mxu0 %v5612_v11  ;;  %v3837_v31 = vrot.slane %v3746_v43, 1  ;;  %v3977_v11 = vld [vmem:[#allocation12 + $0x10d0] sm:$0xff]  ;;  %v5646_v43 = vpack.c.bf16 %v3989_v58, %v3987_v3 }
 0x677   : > { %v5634_v50 = vpack.c.bf16 %v3977_v11, %v3975_v41  ;;  %v4012_v41 = vld [vmem:[#allocation12 + $0x11e8] sm:$0xff]  ;;  %v4014_v11 = vld [vmem:[#allocation12 + $0x11f8] sm:$0xff] }
 0x678   : > { %3920 = vmatmul.mubr.f32.gmra.mrb[10].mxu0 %v3830_v1  ;;  %v3838_v34 = vsel %vm839_vm10, %v3833_v6, %v3837_v31  ;;  %v5644_v6 = vpack.c.bf16 %v3990_v60, %v3988_v59  ;;  %v5668_v46 = vpack.c.bf16 %v4014_v11, %v4012_v41  ;;  %v3948_v60 = vld [vmem:[#allocation3 + $0x60] sm:$0x3]  ;;  %v4217_v58 = vld [vmem:[%s7217_s8 + $0x98] sm:$0xff]  ;;  %v4210_v11 = vld [vmem:[%s7217_s8 + $0x60] sm:$0xff] }
 0x679   : > { %3925 = vmatprep.mubr.f32.mxu0 %v3836_v52  ;;  %5615 = vmatpush1.bf16.msra.mxu0 %v5614_v57  ;;  %v5640_v57 = vpack.c.bf16 %v3986_v63, %v3984_v53  ;;  %v3992_v52 = vld [vmem:[#allocation12 + $0x1148] sm:$0xff]  ;;  %v4019_v53 = vrot.slane %v3946_v62, 2 }
 0x67a   : > { %5617 = vmatprep.subr.bf16.mxu0 %v5616_v20  ;;  %v3985_v20 = vld [vmem:[#allocation12 + $0x1110] sm:$0xff] }
 0x67b   : > { %v5642_v1 = vpack.c.bf16 %v3985_v20, %v3983_v28  ;;  %v4021_v63 = vsel %vm1117_vm11, %v4019_v53, %v6890_v25  ;;  %v4029_v28 = vrot.slane %v7016_v61, 2  ;;  %v4216_v3 = vld [vmem:[%s7217_s8 + $0x90] sm:$0xff]  ;;  %v4213_v53 = vld [vmem:[%s7217_s8 + $0x78] sm:$0xff] }
 0x67c   : > { %3926 = vmatmul.mubr.f32.gmra.mrb[12].mxu0 %v3834_v42  ;;  %v3998_v42 = vld [vmem:[#allocation12 + $0x1178] sm:$0xff]  ;;  %v4212_v62 = vld [vmem:[%s7217_s8 + $0x70] sm:$0xff] }
 0x67d   : > { %3931 = vmatprep.mubr.f32.mxu0 %v3840_v56  ;;  %5619 = vmatpush1.bf16.msra.mxu0 %v5618_v24  ;;  %v5648_v24 = vpack.c.bf16 %v3994_v36, %v3992_v52  ;;  %v5652_v16 = vpack.c.bf16 %v3998_v42, %v3996_v14  ;;  %v4000_v56 = vld [vmem:[#allocation12 + $0x1188] sm:$0xff]  ;;  %v4030_v25 = vsel %vm1117_vm11, %v4025_v27, %v4029_v28  ;;  %v4202_v42 = vld [vmem:[%s7217_s8 + $0x20] sm:$0xff] }
 0x67e   : > { %5621 = vmatprep.subr.bf16.mxu0 %v5620_v8  ;;  %v3991_v8 = vld [vmem:[#allocation12 + $0x1140] sm:$0xff]  ;;  %v5676_v52 = vpack.c.bf16 %v4217_v58, %v4216_v3  ;;  %v4200_v36 = vld [vmem:[%s7217_s8 + $0x10] sm:$0xff] }
 0x67f   : > { %v5650_v31 = vpack.c.bf16 %v3993_v33, %v3991_v8  ;;  %v4199_v27 = vld [vmem:[%s7217_s8 + $0x8] sm:$0xff]  ;;  %v4218_v8 = vld [vmem:[%s7217_s8 + $0xa0] sm:$0xff] }
 0x680   : > { %3932 = vmatmul.mubr.f32.gmra.mrb[14].mxu0 %v3838_v34  ;;  %v4004_v34 = vld [vmem:[#allocation12 + $0x11a8] sm:$0xff] }
 0x681   : > { %5623 = vmatpush1.bf16.msra.mxu0 %v5622_v38  ;;  %4109 = vmatprep.mubr.f32.mxu0 %v4024_v39  ;;  %v4002_v38 = vld [vmem:[#allocation12 + $0x1198] sm:$0xff]  ;;  %v5660_v39 = vpack.c.bf16 %v4006_v10, %v4004_v34  ;;  %v4219_v33 = vld [vmem:[%s7217_s8 + $0xa8] sm:$0xff] }
 0x682   : > { %5625 = vmatprep.subr.bf16.mxu0 %v5624_v44  ;;  %v5656_v44 = vpack.c.bf16 %v4002_v38, %v4000_v56  ;;  %v5680_v14 = vpack.c.bf16 %v4219_v33, %v4218_v8  ;;  %v4204_v56 = vld [vmem:[%s7217_s8 + $0x30] sm:$0xff]  ;;  %v5684_v38 = vpack.c.bf16 %v4221_v55, %v4220_v17  ;;  %v4206_v10 = vld [vmem:[%s7217_s8 + $0x40] sm:$0xff] }
 0x685   : > { %5627 = vmatpush1.bf16.msra.mxu0 %v5626_v40  ;;  %v4003_v40 = vld [vmem:[#allocation12 + $0x11a0] sm:$0xff] }
 0x686   : > { %5629 = vmatprep.subr.bf16.mxu0 %v5628_v5  ;;  %v4005_v5 = vld [vmem:[#allocation12 + $0x11b0] sm:$0xff] }
 0x687   : > { %v5662_v45 = vpack.c.bf16 %v4005_v5, %v4003_v40  ;;  %v4225_v40 = vld [vmem:[%s7217_s8 + $0xd8] sm:$0xff] }
 0x689   : > { %5631 = vmatpush1.bf16.msra.mxu0 %v5630_v12  ;;  %v4007_v12 = vld [vmem:[#allocation12 + $0x11c0] sm:$0xff] }
 0x68a   : > { %5633 = vmatprep.subr.bf16.mxu0 %v5632_v19  ;;  %v4009_v19 = vld [vmem:[#allocation12 + $0x11d0] sm:$0xff] }
 0x68b   : > { %v5666_v48 = vpack.c.bf16 %v4009_v19, %v4007_v12  ;;  %v4227_v12 = vld [vmem:[%s7217_s8 + $0xe8] sm:$0xff] }
 0x68d   : > { %5635 = vmatpush1.bf16.msra.mxu0 %v5634_v50  ;;  %v4011_v50 = vld [vmem:[#allocation12 + $0x11e0] sm:$0xff] }
 0x68e   : > { %5637 = vmatprep.subr.bf16.mxu0 %v5636_v35  ;;  %v4013_v35 = vld [vmem:[#allocation12 + $0x11f0] sm:$0xff] }
 0x68f   : > { %v5670_v23 = vpack.c.bf16 %v4013_v35, %v4011_v50  ;;  %v4229_v50 = vld [vmem:[%s7217_s8 + $0xf8] sm:$0xff] }
 0x691   : > { %5639 = vmatpush1.bf16.msra.mxu0 %v5638_v51  ;;  %v4031_v51 = vrot.slane %v7013_v54, 2 }
 0x692   : > { %5641 = vmatprep.subr.bf16.mxu0 %v5640_v57  ;;  %v3949_v57 = vld [vmem:[#allocation3 + $0x68] sm:$0x3] }
 0x693   : > { %v4032_v20 = vsel %vm1117_vm11, %v6991_v7, %v4031_v51  ;;  %v4035_v59 = vrot.slane %v3949_v57, 2  ;;  %v4215_v7 = vld [vmem:[%s7217_s8 + $0x88] sm:$0xff] }
 0x695   : > { %5643 = vmatpush1.bf16.msra.mxu0 %v5642_v1  ;;  %v4033_v1 = vrot.slane %v3948_v60, 2  ;;  %v4036_v54 = vsel %vm1117_vm11, %v4031_v51, %v4035_v59  ;;  %v4142_v51 = vld [vmem:[#allocation13] sm:$0x3] }
 0x696   : > { %5645 = vmatprep.subr.bf16.mxu0 %v5644_v6  ;;  %v5674_v6 = vpack.c.bf16 %v4199_v27, %v4198_v21  ;;  %v4147_v57 = vrot.slane %v4142_v51, %v6586_v13 }
 0x699   : > { %5647 = vmatpush1.bf16.msra.mxu0 %v5646_v43  ;;  %v4201_v43 = vld [vmem:[%s7217_s8 + $0x18] sm:$0xff] }
 0x69a   : > { %5649 = vmatprep.subr.bf16.mxu0 %v5648_v24  ;;  %v5678_v24 = vpack.c.bf16 %v4201_v43, %v4200_v36 }
 0x69d   : > { %5651 = vmatpush1.bf16.msra.mxu0 %v5650_v31  ;;  %v4203_v31 = vld [vmem:[%s7217_s8 + $0x28] sm:$0xff] }
 0x69e   : > { %5653 = vmatprep.subr.bf16.mxu0 %v5652_v16  ;;  %v5682_v16 = vpack.c.bf16 %v4203_v31, %v4202_v42 }
 0x6a1   : > { %5655 = vmatpush1.bf16.msra.mxu0 %v5654_v2  ;;  %v4205_v2 = vld [vmem:[%s7217_s8 + $0x38] sm:$0xff] }
 0x6a2   : > { %5657 = vmatprep.subr.bf16.mxu0 %v5656_v44  ;;  %v4222_v44 = vld [vmem:[%s7217_s8 + $0xc0] sm:$0xff]  ;;  %v5686_v32 = vpack.c.bf16 %v4205_v2, %v4204_v56 }
 0x6a3   : > { %v5688_v34 = vpack.c.bf16 %v4223_v22, %v4222_v44 }
 0x6a5   : > { %5659 = vmatpush1.bf16.msra.mxu0 %v5658_v0  ;;  %v4207_v0 = vld [vmem:[%s7217_s8 + $0x48] sm:$0xff] }
 0x6a6   : > { %5661 = vmatprep.subr.bf16.mxu0 %v5660_v39  ;;  %v4224_v39 = vld [vmem:[%s7217_s8 + $0xd0] sm:$0xff]  ;;  %v5690_v5 = vpack.c.bf16 %v4207_v0, %v4206_v10 }
 0x6a7   : > { %v5692_v49 = vpack.c.bf16 %v4225_v40, %v4224_v39 }
 0x6a9   : > { %5663 = vmatpush1.bf16.msra.mxu0 %v5662_v45  ;;  %v4209_v45 = vld [vmem:[%s7217_s8 + $0x58] sm:$0xff] }
 0x6aa   : > { %5665 = vmatprep.subr.bf16.mxu0 %v5664_v30  ;;  %v4226_v30 = vld [vmem:[%s7217_s8 + $0xe0] sm:$0xff]  ;;  %v5694_v19 = vpack.c.bf16 %v4209_v45, %v4208_v9 }
 0x6ab   : > { %v5696_v41 = vpack.c.bf16 %v4227_v12, %v4226_v30 }
 0x6ad   : > { %5667 = vmatpush1.bf16.msra.mxu0 %v5666_v48  ;;  %v4211_v48 = vld [vmem:[%s7217_s8 + $0x68] sm:$0xff] }
 0x6ae   : > { %5669 = vmatprep.subr.bf16.mxu0 %v5668_v46  ;;  %v4228_v46 = vld [vmem:[%s7217_s8 + $0xf0] sm:$0xff]  ;;  %v5698_v35 = vpack.c.bf16 %v4211_v48, %v4210_v11  ;;  %v4230_v48 = vld [vmem:[#allocation15] sm:$0x1] }
 0x6b1   : > { %5671 = vmatpush1.bf16.msra.mxu0 %v5670_v23  ;;  %v5700_v23 = vpack.c.bf16 %v4229_v50, %v4228_v46 }
 0x6b4   : > { %4110 = vmatmul.mubr.f32.vlgmr.msra.gmra.mrb[8].mxu0 %v4021_v63  ;;  %v5702_v63 = vpack.c.bf16 %v4213_v53, %v4212_v62 }
 0x6b5   : > { %4115 = vmatprep.mubr.f32.mxu0 %v6999_v4  ;;  %v4034_v4 = vsel %vm1117_vm11, %v4029_v28, %v4033_v1  ;;  %v4151_v28 = vrot.slane %v4142_v51, %v6588_v15 }
 0x6b8   : > { %4116 = vmatmul.mubr.f32.gmra.mrb[10].mxu0 %v6897_v37  ;;  %v4214_v37 = vld [vmem:[%s7217_s8 + $0x80] sm:$0xff] }
 0x6b9   : > { %4121 = vmatprep.mubr.f32.mxu0 %v4032_v20  ;;  %v5672_v61 = vpack.c.bf16 %v4215_v7, %v4214_v37 }
 0x6bb   : > { %5673 = vmatprep.subr.bf16.mxu1 %v5672_v61 }
 0x6bc   : > { %4122 = vmatmul.mubr.f32.gmra.mrb[12].mxu0 %v4030_v25  ;;  %5675 = vmatpush3.bf16.msra.mxu1 %v5674_v6 }
 0x6bd   : > { %4127 = vmatprep.mubr.f32.mxu0 %v4036_v54  ;;  %5677 = vmatprep.subr.bf16.mxu1 %v5676_v52 }
 0x6c0   : > { %4128 = vmatmul.mubr.f32.gmra.mrb[14].mxu0 %v4034_v4  ;;  %5679 = vmatpush3.bf16.msra.mxu1 %v5678_v24 }
 0x6c1   : > { %5681 = vmatprep.subr.bf16.mxu1 %v5680_v14 }
 0x6c4   : > { %5683 = vmatpush3.bf16.msra.mxu1 %v5682_v16 }
 0x6c5   : > { %5685 = vmatprep.subr.bf16.mxu1 %v5684_v38 }
 0x6c8   : > { %5687 = vmatpush3.bf16.msra.mxu1 %v5686_v32 }
 0x6c9   : > { %5689 = vmatprep.subr.bf16.mxu1 %v5688_v34 }
 0x6cc   : > { %5691 = vmatpush3.bf16.msra.mxu1 %v5690_v5 }
 0x6cd   : > { %5693 = vmatprep.subr.bf16.mxu1 %v5692_v49 }
 0x6d0   : > { %5695 = vmatpush3.bf16.msra.mxu1 %v5694_v19 }
 0x6d1   : > { %5697 = vmatprep.subr.bf16.mxu1 %v5696_v41 }
 0x6d4   : > { %5699 = vmatpush3.bf16.msra.mxu1 %v5698_v35 }
 0x6d5   : > { %5701 = vmatprep.subr.bf16.mxu1 %v5700_v23 }
 0x6d8   : > { %5703 = vmatpush3.bf16.msra.mxu1 %v5702_v63 }
 0x787   : > { %v4111_v20 = vpop.f32.mrb[8].mxu0 }
 0x788   : > { %v4154_v59 = vadd.f32 %v4147_v57, %v4111_v20  ;;  %v4113_v60 = vpop.f32.mrb[9].mxu0 }
 0x789   : > { %v4155_v25 = vadd.f32 %v4151_v28, %v4113_v60 }
 0x78a   : > { %v4162_v54 = vmax.f32 %v4154_v59, 0.0 }
 0x78b   : > { %v4117_v1 = vpop.f32.mrb[10].mxu0  ;;  %v4163_v7 = vmax.f32 %v4155_v25, 0.0 }
 0x78c   : > { %v4156_v4 = vadd.f32 %v4147_v57, %v4117_v1  ;;  %v4119_v37 = vpop.f32.mrb[11].mxu0  ;;  %v4170_v3 = vsel %vm633_vm5, %v4162_v54, 0.0 }
 0x78d   : > { %v4157_v61 = vadd.f32 %v4151_v28, %v4119_v37  ;;  %v4171_v52 = vsel %vm633_vm5, %v4163_v7, 0.0 }
 0x78e   : > { %v4164_v21 = vmax.f32 %v4156_v4, 0.0 }
 0x78f   : > { %v4165_v27 = vmax.f32 %v4157_v61, 0.0  ;;  %v4123_v6 = vpop.f32.mrb[12].mxu0 }
 0x790   : > { %v4172_v13 = vsel %vm634_vm6, %v4164_v21, 0.0  ;;  %v4158_v15 = vadd.f32 %v4147_v57, %v4123_v6  ;;  %v4125_v58 = vpop.f32.mrb[13].mxu0 }
 0x791   : > { %v4178_v36 = vadd.f32 %v4172_v13, %v4170_v3  ;;  %v4173_v43 = vsel %vm634_vm6, %v4165_v27, 0.0  ;;  %v4159_v24 = vadd.f32 %v4151_v28, %v4125_v58 }
 0x792   : > { %v4187_v8 = vadd.f32 %v4173_v43, %v4171_v52  ;;  %v4166_v33 = vmax.f32 %v4158_v15, 0.0 }
 0x793   : > { %v4167_v14 = vmax.f32 %v4159_v24, 0.0  ;;  %v4129_v42 = vpop.f32.mrb[14].mxu0 }
 0x794   : > { %v4174_v31 = vsel %vm635_vm8, %v4166_v33, 0.0  ;;  %v4160_v16 = vadd.f32 %v4147_v57, %v4129_v42  ;;  %v4131_v17 = vpop.f32.mrb[15].mxu0 }
 0x795   : > { %v4179_v55 = vadd.f32 %v4178_v36, %v4174_v31  ;;  %v4175_v56 = vsel %vm635_vm8, %v4167_v14, 0.0  ;;  %v4161_v18 = vadd.f32 %v4151_v28, %v4131_v17 }
 0x796   : > { %v4188_v38 = vadd.f32 %v4187_v8, %v4175_v56  ;;  %v4168_v2 = vmax.f32 %v4160_v16, 0.0 }
 0x797   : > { %v4169_v44 = vmax.f32 %v4161_v18, 0.0 }
 0x798   : > { %v4176_v29 = vsel %vm636_vm9, %v4168_v2, 0.0 }
 0x799   : > { %v4180_v22 = vadd.f32 %v4179_v55, %v4176_v29  ;;  %v4177_v32 = vsel %vm636_vm9, %v4169_v44, 0.0 }
 0x79a   : > { %v4189_v34 = vadd.f32 %v4188_v38, %v4177_v32 }
 0x79b   : > { %v4181_v10 = vrot.slane %v4180_v22, 4 }
 0x79c   : > { %v4190_v0 = vrot.slane %v4189_v34, 4 }
 0x79d   : > { %v4182_v39 = vadd.f32 %v4181_v10, %v4180_v22 }
 0x79e   : > { %v4191_v40 = vadd.f32 %v4190_v0, %v4189_v34 }
 0x79f   : > { %v4183_v5 = vrot.slane %v4182_v39, 2 }
 0x7a0   : > { %v4192_v26 = vrot.slane %v4191_v40, 2 }
 0x7a1   : > { %v4184_v49 = vadd.f32 %v4183_v5, %v4182_v39 }
 0x7a2   : > { %v4193_v9 = vadd.f32 %v4192_v26, %v4191_v40 }
 0x7a3   : > { %v4185_v45 = vrot.slane %v4184_v49, 1 }
 0x7a4   : > { %v4194_v30 = vrot.slane %v4193_v9, 1 }
 0x7a5   : > { %v4186_v12 = vadd.f32 %v4185_v45, %v4184_v49 }
 0x7a6   : > { %v4195_v19 = vadd.f32 %v4194_v30, %v4193_v9 }
 0x7a7   : > { %v4196_v11 = vmul.f32 0.041666668, %v4186_v12 }
 0x7a8   : > { %v4197_v41 = vmul.f32 0.041666668, %v4195_v19 }
 0x7aa   : > { %4295 = vmatprep.mubr.f32.mxu1 %v4197_v41 }
 0x7ab   : > { %4296 = vmatmul.mubr.f32.vlgmr.msra.gmra.mrb[8].mxu1 %v4196_v11 }
 0x87e   : > { %v4501_v47 = vpop.f32.mrb[8].mxu1 }
 0x87f   : > { %v4502_v46 = vpop.f32.mrb[9].mxu1 }
 0x880   : > { %v4503_v50 = vadd.f32 %v4502_v46, %v4501_v47 }
 0x882   : > { %v4298_v35 = vadd.f32 %v4503_v50, %v4230_v48 }
 0x884   : > { %v4301_v23 = vmul.f32 0.01, %v4298_v35 }
 0x886   : > { %4303 = vst.msk [vmem:[%s445_s22] sm:$0x1] %vm4302_vm12, %v4301_v23 }
 0x887   : > { %6160 = shalt.err (!%p6157_p6)
}
 0x888   : > { %s6161_s3 = scalar_lea.hbm %s7167_s11, 16  ;;  %s6165_s26 = scalar_lea.hbm %s7219_s10, 32 }
 0x889   : > { %p6162_p5 = scmp.ne.s32.totalorder %s7167_s11, %s6161_s3  ;;  %p6166_p10 = scmp.lt.u32.totalorder %s7167_s11, %s7219_s10 }
 0x88a   : > { %p6167_p2 = scmp.lt.u32.totalorder %s6165_s26, %s6161_s3  ;;  %p6169_p4 = scmp.lt.u32.totalorder %s6161_s3, %s7167_s11 }
 0x88b   : > { %p6163_p9 = pnand %p6162_p5, %p7249_p7 }
 0x88c   : > { %p6168_p3 = por %p6167_p2, %p6166_p10 }
 0x88d   : > { %p6164_p12 = pneg %p6163_p9 }
 0x88e   : > { %p6170_p8 = por %p6169_p4, %p6168_p3 }
 0x890   : > { %p6171_p11 = pnand %p6170_p8, %p6164_p12 }
 0x892   : > { %6174 = shalt.err (!%p6171_p11)
}
 0x893   : > { %5860 = dma.vmem_to_hbm [thread:$0]  (%p7249_p7), %s7169_s21, 16, %s7167_s11, %s4305_s20  }
 0x894 PF: > { %s7250_s12 = sld [smem:[#allocation25_spill]]  ;;  %p5902_p13 = scmp.ge.s32.totalorder %s6225_s16, 2 }
 0x895   : > { %s4329_s24 = sand.u32 1, %s6213_s13  }
 0x896   : > { %s4330_s22 = scalar_lea.sflag [#allocation6], %s4329_s24 }
 0x89a   : > { %p7251_p1 = scmp.ne.s32.totalorder %s7250_s12, 0 }
 0x89c   : > { %p5885_p0 = pnand %p5902_p13, %p7251_p1 }
 0x89e   : > { %6208 = dma.done.wait (!%p5885_p0), %s4330_s22, 16  }
 0x89f   : > { %6210 = vsyncadd (!%p5885_p0), %s4330_s22, 4294967280  ;;  %s7252_s16 = sld [smem:[#allocation23_spill]]  ;;  %s7253_s27 = sld [smem:[#allocation22_spill]] }
 0x8a0   : > { %s7254_s15 = sld [smem:[#allocation24_spill]]  ;;  %s7255_s13 = smov %s6217_s14 }
 0x8a5   : > { %p24_p6 = scmp.ge.s32.totalorder %s7252_s16, 4   ;;  %s7256_s14 = smov %s7253_s27 }
 0x8a7   :  { %26 = sbr.rel (!%p24_p6) target bundleno = 10 (0xa), region = 140 }
 0x8ae   :  { %4334 = vsyncpa [#allocation5], 1 }
 0x8af   :  { %4336 = vsyncpa [#allocation5 + $0x1], 1 }
 0x8b0   :  { %4337 = vsyncpa [#allocation8], 1 }
 0x8b1   :  { %4338 = vsyncpa [#allocation11], 1 }
 0x8b2   :  { %4339 = vsyncpa [#allocation14], 1 }
 0x8b3   :  { %4340 = vsyncpa [#allocation6], 1 }
 0x8b4   :  { %4342 = vsyncpa [#allocation6 + $0x1], 1 }

</bundles_post_ra>
